<compile_context>
chip_gen: v6e
topology: v6e:2x2x1
jax: 0.10.0
libtpu: 0.0.40
codegen_flags: <defaults>
</compile_context>

<pallas_src>
import math

import jax
import jax.numpy as jnp
from jax.experimental import pallas as pl
from jax.experimental.pallas import tpu as pltpu


def _make_gru_kernel(num_layers, hidden_size, batch, seq_len):
    L, H, B, T = num_layers, hidden_size, batch, seq_len

    def kernel(*refs):
        # ref order:
        #   inputs : gi0_r, gi0_z, gi0_n (T,B,H)  -- precomputed layer-0 input gates
        #            h0 (L,B,H)
        #            layer 0:  w_hh0 (3,H,H), b_hh0 (3,1,H)
        #            layer l>=1: w_ih_l (3,H,H), b_ih_l (3,1,H),
        #                        w_hh_l (3,H,H), b_hh_l (3,1,H)
        #   outputs: h_top (T,B,H) f32, h_last (L,B,H)
        gi_r_ref, gi_z_ref, gi_n_ref, h0_ref = refs[:4]
        idx = 4
        w_hh0_ref, b_hh0_ref = refs[idx], refs[idx + 1]
        idx += 2
        upper = []
        for _ in range(L - 1):
            upper.append(refs[idx:idx + 4])  # (w_ih, b_ih, w_hh, b_hh)
            idx += 4
        h_top_ref, hlast_ref = refs[idx], refs[idx + 1]

        # Loop-invariant bias broadcasts, hoisted (JAX does not CSE broadcasts).
        b_hh0 = [jnp.broadcast_to(b_hh0_ref[g], (B, H)) for g in range(3)]
        upper_biases = []
        for (_, b_ih_ref, _, b_hh_ref) in upper:
            upper_biases.append((
                [jnp.broadcast_to(b_ih_ref[g], (B, H)) for g in range(3)],
                [jnp.broadcast_to(b_hh_ref[g], (B, H)) for g in range(3)],
            ))

        def gru_cell(h_prev, gi_r, gi_z, gi_n, w_hh_ref, b_hh):
            gh_r = jnp.dot(h_prev, w_hh_ref[0],
                           preferred_element_type=jnp.float32) + b_hh[0]
            gh_z = jnp.dot(h_prev, w_hh_ref[1],
                           preferred_element_type=jnp.float32) + b_hh[1]
            gh_n = jnp.dot(h_prev, w_hh_ref[2],
                           preferred_element_type=jnp.float32) + b_hh[2]
            r = jax.nn.sigmoid(gi_r + gh_r)
            z = jax.nn.sigmoid(gi_z + gh_z)
            n = jnp.tanh(gi_n + r * gh_n)
            return (1.0 - z) * n + z * h_prev

        def step(t, hs):
            hs = list(hs)
            # Layer 0: input-side gates were precomputed for all timesteps.
            h_new = gru_cell(hs[0], gi_r_ref[t], gi_z_ref[t], gi_n_ref[t],
                             w_hh0_ref, b_hh0)
            hs[0] = h_new
            layer_in = h_new
            # Upper layers: only the hidden-side + this layer's input matmuls
            # remain on the serial path.
            for l in range(1, L):
                w_ih_ref, _, w_hh_ref, _ = upper[l - 1]
                b_ih, b_hh = upper_biases[l - 1]
                gi_r = jnp.dot(layer_in, w_ih_ref[0],
                               preferred_element_type=jnp.float32) + b_ih[0]
                gi_z = jnp.dot(layer_in, w_ih_ref[1],
                               preferred_element_type=jnp.float32) + b_ih[1]
                gi_n = jnp.dot(layer_in, w_ih_ref[2],
                               preferred_element_type=jnp.float32) + b_ih[2]
                h_new = gru_cell(hs[l], gi_r, gi_z, gi_n, w_hh_ref, b_hh)
                hs[l] = h_new
                layer_in = h_new
            h_top_ref[t] = layer_in.astype(h_top_ref.dtype)
            return tuple(hs)

        h_init = tuple(h0_ref[l].astype(jnp.float32) for l in range(L))
        hs_final = jax.lax.fori_loop(0, T, step, h_init, unroll=True)

        # Final hidden state written once, after the loop.
        for l in range(L):
            hlast_ref[l] = hs_final[l].astype(hlast_ref.dtype)

    return kernel


def decoder_rnn_forward(input_tensor, hidden, params):
    """Forward pass of DecoderRNN.

    input_tensor: (B, T, F)   -- batch_first sequence
    hidden:       (L, B, H)   -- initial GRU hidden state
    returns: (output (B, T, F), hidden (L, B, H))
    """
    B, T, F = input_tensor.shape
    L, _, H = hidden.shape

    w_ih0, _, b_ih0, _ = params["layer0"]
    x_f32 = input_tensor.astype(jnp.float32)

    # Layer-0 input projection for ALL timesteps in one batched matmul
    # (per gate), producing time-major (3, T, B, H).  The layout change is
    # folded into the dot_general; no standalone HBM transpose.
    gi0 = jnp.einsum("btf,gfh->gtbh", x_f32, w_ih0,
                     precision=jax.lax.Precision.HIGHEST) + b_ih0[:, None]
    gi0_r, gi0_z, gi0_n = gi0[0], gi0[1], gi0[2]

    kernel_inputs = [gi0_r, gi0_z, gi0_n, hidden]
    w_ih_l0, w_hh_l0, b_ih_l0, b_hh_l0 = params["layer0"]
    kernel_inputs += [w_hh_l0, b_hh_l0]
    for l in range(1, L):
        w_ih, w_hh, b_ih, b_hh = params[f"layer{l}"]
        kernel_inputs += [w_ih, b_ih, w_hh, b_hh]

    def full_spec(a):
        nd = a.ndim
        return pl.BlockSpec(a.shape, lambda i, nd=nd: (0,) * nd)

    in_specs = [full_spec(a) for a in kernel_inputs]

    out_shapes = (
        jax.ShapeDtypeStruct((T, B, H), jnp.float32),   # top-layer hidden per t
        jax.ShapeDtypeStruct((L, B, H), hidden.dtype),  # final hidden state
    )
    out_specs = [
        pl.BlockSpec((T, B, H), lambda i: (0, 0, 0)),
        pl.BlockSpec((L, B, H), lambda i: (0, 0, 0)),
    ]

    kernel = _make_gru_kernel(L, H, B, T)

    h_top, h_last = pl.pallas_call(
        kernel,
        out_shape=out_shapes,
        grid_spec=pltpu.PrefetchScalarGridSpec(
            num_scalar_prefetch=0,
            grid=(1,),                      # whole recurrence in one invocation
            in_specs=in_specs,
            out_specs=out_specs,
        ),
        compiler_params=pltpu.CompilerParams(
            dimension_semantics=("arbitrary",),
        ),
    )(*kernel_inputs)

    # Output Linear hoisted out of the recurrence: one lane-dense matmul over
    # all T*B rows; 'tbh,hf->btf' also restores the batch_first layout.
    w_out, b_out = params["out"]
    output = jnp.einsum("tbh,hf->btf", h_top, w_out,
                        precision=jax.lax.Precision.HIGHEST) + b_out
    return output.astype(input_tensor.dtype), h_last


decoder_rnn_forward_jit = jax.jit(decoder_rnn_forward)


def init_params(key, output_size, hidden_size, num_layers):
    """Deterministic init matching PyTorch GRU/Linear shapes.

    Weights are stored per-gate (leading gate axis, order r,z,n) and
    transposed relative to PyTorch: w_ih (3, in_l, H), w_hh (3, H, H),
    biases (3, 1, H); output Linear w_out (H, F), b_out (1, F).
    """
    params = {}
    H = hidden_size
    bound = 1.0 / math.sqrt(H)
    for l in range(num_layers):
        in_l = output_size if l == 0 else H
        key, k1, k2, k3, k4 = jax.random.split(key, 5)
        w_ih = jax.random.uniform(k1, (3, in_l, H), jnp.float32, -bound, bound)
        w_hh = jax.random.uniform(k2, (3, H, H), jnp.float32, -bound, bound)
        b_ih = jax.random.uniform(k3, (3, 1, H), jnp.float32, -bound, bound)
        b_hh = jax.random.uniform(k4, (3, 1, H), jnp.float32, -bound, bound)
        params[f"layer{l}"] = (w_ih, w_hh, b_ih, b_hh)
    key, k1, k2 = jax.random.split(key, 3)
    w_out = jax.random.uniform(k1, (hidden_size, output_size), jnp.float32, -bound, bound)
    b_out = jax.random.uniform(k2, (1, output_size), jnp.float32, -bound, bound)
    params["out"] = (w_out, b_out)
    return params


def reference_forward(x, h0, params):
    """Pure-JAX reference of the PyTorch DecoderRNN forward (GRU + Linear)."""
    B, T, F = x.shape
    L, _, H = h0.shape
    hs = [h0[l] for l in range(L)]
    w_out, b_out = params["out"]
    outs = []
    for t in range(T):
        layer_in = x[:, t, :]
        for l in range(L):
            w_ih, w_hh, b_ih, b_hh = params[f"layer{l}"]
            gi = [layer_in @ w_ih[g] + b_ih[g] for g in range(3)]
            gh = [hs[l] @ w_hh[g] + b_hh[g] for g in range(3)]
            r = jax.nn.sigmoid(gi[0] + gh[0])
            z = jax.nn.sigmoid(gi[1] + gh[1])
            n = jnp.tanh(gi[2] + r * gh[2])
            hs[l] = (1.0 - z) * n + z * hs[l]
            layer_in = hs[l]
        outs.append(layer_in @ w_out + b_out)
    return jnp.stack(outs, axis=1), jnp.stack(hs, axis=0)


if __name__ == "__main__":
    B, T = 2, 8           # batch, sequence length
    output_size = 16      # input & output feature size
    hidden_size = 32
    num_layers = 2

    key = jax.random.PRNGKey(0)
    key, kx, kh, kp = jax.random.split(key, 4)

    x = jax.random.normal(kx, (B, T, output_size), jnp.float32)
    h0 = jax.random.normal(kh, (num_layers, B, hidden_size), jnp.float32)
    params = init_params(kp, output_size, hidden_size, num_layers)

    out, h_last = decoder_rnn_forward_jit(x, h0, params)
    out = jax.block_until_ready(out)
    h_last = jax.block_until_ready(h_last)

    out_ref, h_ref = reference_forward(x, h0, params)
    assert out.shape == (B, T, output_size)
    assert h_last.shape == (num_layers, B, hidden_size)
    assert jnp.allclose(out, out_ref, atol=1e-4, rtol=1e-4)
    assert jnp.allclose(h_last, h_ref, atol=1e-4, rtol=1e-4)

    print("KERNEL_OK")
</pallas_src>

<mosaic_0001>
module attributes {stable_mosaic.version = 11 : i64} {
  func.func @kernel(%arg0: i32, %arg1: memref<8x2x32xf32, #tpu.memory_space<vmem>>, %arg2: memref<8x2x32xf32, #tpu.memory_space<vmem>>, %arg3: memref<8x2x32xf32, #tpu.memory_space<vmem>>, %arg4: memref<2x2x32xf32, #tpu.memory_space<vmem>>, %arg5: memref<3x32x32xf32, #tpu.memory_space<vmem>>, %arg6: memref<3x1x32xf32, #tpu.memory_space<vmem>>, %arg7: memref<3x32x32xf32, #tpu.memory_space<vmem>>, %arg8: memref<3x1x32xf32, #tpu.memory_space<vmem>>, %arg9: memref<3x32x32xf32, #tpu.memory_space<vmem>>, %arg10: memref<3x1x32xf32, #tpu.memory_space<vmem>>, %arg11: memref<8x2x32xf32, #tpu.memory_space<vmem>>, %arg12: memref<2x2x32xf32, #tpu.memory_space<vmem>>) attributes {dimension_semantics = [#tpu.dimension_semantics<arbitrary>], iteration_bounds = array<i64: 1>, scalar_prefetch = 0 : i64, scratch_operands = 0 : i64, tpu.core_type = #tpu.core_type<tc>, window_params = [{pipeline_mode = #tpu.pipeline_mode<synchronous>, transform_indices = @transform_0, window_bounds = array<i64: 8, 2, 32>}, {pipeline_mode = #tpu.pipeline_mode<synchronous>, transform_indices = @transform_1, window_bounds = array<i64: 8, 2, 32>}, {pipeline_mode = #tpu.pipeline_mode<synchronous>, transform_indices = @transform_2, window_bounds = array<i64: 8, 2, 32>}, {pipeline_mode = #tpu.pipeline_mode<synchronous>, transform_indices = @transform_3, window_bounds = array<i64: 2, 2, 32>}, {pipeline_mode = #tpu.pipeline_mode<synchronous>, transform_indices = @transform_4, window_bounds = array<i64: 3, 32, 32>}, {pipeline_mode = #tpu.pipeline_mode<synchronous>, transform_indices = @transform_5, window_bounds = array<i64: 3, 1, 32>}, {pipeline_mode = #tpu.pipeline_mode<synchronous>, transform_indices = @transform_6, window_bounds = array<i64: 3, 32, 32>}, {pipeline_mode = #tpu.pipeline_mode<synchronous>, transform_indices = @transform_7, window_bounds = array<i64: 3, 1, 32>}, {pipeline_mode = #tpu.pipeline_mode<synchronous>, transform_indices = @transform_8, window_bounds = array<i64: 3, 32, 32>}, {pipeline_mode = #tpu.pipeline_mode<synchronous>, transform_indices = @transform_9, window_bounds = array<i64: 3, 1, 32>}, {pipeline_mode = #tpu.pipeline_mode<synchronous>, transform_indices = @transform_10, window_bounds = array<i64: 8, 2, 32>}, {pipeline_mode = #tpu.pipeline_mode<synchronous>, transform_indices = @transform_11, window_bounds = array<i64: 2, 2, 32>}]} {
    %c0 = arith.constant 0 : index
    %c0_0 = arith.constant 0 : index
    %c0_1 = arith.constant 0 : index
    %0 = vector.load %arg6[%c0, %c0_0, %c0_1] : memref<3x1x32xf32, #tpu.memory_space<vmem>>, vector<1x1x32xf32>
    %1 = vector.shape_cast %0 : vector<1x1x32xf32> to vector<1x32xf32>
    %2 = vector.shape_cast %1 : vector<1x32xf32> to vector<1x32xf32>
    %3 = vector.broadcast %2 : vector<1x32xf32> to vector<2x32xf32>
    %c1 = arith.constant 1 : index
    %c0_2 = arith.constant 0 : index
    %c0_3 = arith.constant 0 : index
    %4 = vector.load %arg6[%c1, %c0_2, %c0_3] : memref<3x1x32xf32, #tpu.memory_space<vmem>>, vector<1x1x32xf32>
    %5 = vector.shape_cast %4 : vector<1x1x32xf32> to vector<1x32xf32>
    %6 = vector.shape_cast %5 : vector<1x32xf32> to vector<1x32xf32>
    %7 = vector.broadcast %6 : vector<1x32xf32> to vector<2x32xf32>
    %c2 = arith.constant 2 : index
    %c0_4 = arith.constant 0 : index
    %c0_5 = arith.constant 0 : index
    %8 = vector.load %arg6[%c2, %c0_4, %c0_5] : memref<3x1x32xf32, #tpu.memory_space<vmem>>, vector<1x1x32xf32>
    %9 = vector.shape_cast %8 : vector<1x1x32xf32> to vector<1x32xf32>
    %10 = vector.shape_cast %9 : vector<1x32xf32> to vector<1x32xf32>
    %11 = vector.broadcast %10 : vector<1x32xf32> to vector<2x32xf32>
    %c0_6 = arith.constant 0 : index
    %c0_7 = arith.constant 0 : index
    %c0_8 = arith.constant 0 : index
    %12 = vector.load %arg8[%c0_6, %c0_7, %c0_8] : memref<3x1x32xf32, #tpu.memory_space<vmem>>, vector<1x1x32xf32>
    %13 = vector.shape_cast %12 : vector<1x1x32xf32> to vector<1x32xf32>
    %14 = vector.shape_cast %13 : vector<1x32xf32> to vector<1x32xf32>
    %15 = vector.broadcast %14 : vector<1x32xf32> to vector<2x32xf32>
    %c1_9 = arith.constant 1 : index
    %c0_10 = arith.constant 0 : index
    %c0_11 = arith.constant 0 : index
    %16 = vector.load %arg8[%c1_9, %c0_10, %c0_11] : memref<3x1x32xf32, #tpu.memory_space<vmem>>, vector<1x1x32xf32>
    %17 = vector.shape_cast %16 : vector<1x1x32xf32> to vector<1x32xf32>
    %18 = vector.shape_cast %17 : vector<1x32xf32> to vector<1x32xf32>
    %19 = vector.broadcast %18 : vector<1x32xf32> to vector<2x32xf32>
    %c2_12 = arith.constant 2 : index
    %c0_13 = arith.constant 0 : index
    %c0_14 = arith.constant 0 : index
    %20 = vector.load %arg8[%c2_12, %c0_13, %c0_14] : memref<3x1x32xf32, #tpu.memory_space<vmem>>, vector<1x1x32xf32>
    %21 = vector.shape_cast %20 : vector<1x1x32xf32> to vector<1x32xf32>
    %22 = vector.shape_cast %21 : vector<1x32xf32> to vector<1x32xf32>
    %23 = vector.broadcast %22 : vector<1x32xf32> to vector<2x32xf32>
    %c0_15 = arith.constant 0 : index
    %c0_16 = arith.constant 0 : index
    %c0_17 = arith.constant 0 : index
    %24 = vector.load %arg10[%c0_15, %c0_16, %c0_17] : memref<3x1x32xf32, #tpu.memory_space<vmem>>, vector<1x1x32xf32>
    %25 = vector.shape_cast %24 : vector<1x1x32xf32> to vector<1x32xf32>
    %26 = vector.shape_cast %25 : vector<1x32xf32> to vector<1x32xf32>
    %27 = vector.broadcast %26 : vector<1x32xf32> to vector<2x32xf32>
    %c1_18 = arith.constant 1 : index
    %c0_19 = arith.constant 0 : index
    %c0_20 = arith.constant 0 : index
    %28 = vector.load %arg10[%c1_18, %c0_19, %c0_20] : memref<3x1x32xf32, #tpu.memory_space<vmem>>, vector<1x1x32xf32>
    %29 = vector.shape_cast %28 : vector<1x1x32xf32> to vector<1x32xf32>
    %30 = vector.shape_cast %29 : vector<1x32xf32> to vector<1x32xf32>
    %31 = vector.broadcast %30 : vector<1x32xf32> to vector<2x32xf32>
    %c2_21 = arith.constant 2 : index
    %c0_22 = arith.constant 0 : index
    %c0_23 = arith.constant 0 : index
    %32 = vector.load %arg10[%c2_21, %c0_22, %c0_23] : memref<3x1x32xf32, #tpu.memory_space<vmem>>, vector<1x1x32xf32>
    %33 = vector.shape_cast %32 : vector<1x1x32xf32> to vector<1x32xf32>
    %34 = vector.shape_cast %33 : vector<1x32xf32> to vector<1x32xf32>
    %35 = vector.broadcast %34 : vector<1x32xf32> to vector<2x32xf32>
    %c0_24 = arith.constant 0 : index
    %c0_25 = arith.constant 0 : index
    %c0_26 = arith.constant 0 : index
    %36 = vector.load %arg4[%c0_24, %c0_25, %c0_26] : memref<2x2x32xf32, #tpu.memory_space<vmem>>, vector<1x2x32xf32>
    %37 = vector.shape_cast %36 : vector<1x2x32xf32> to vector<2x32xf32>
    %c1_27 = arith.constant 1 : index
    %c0_28 = arith.constant 0 : index
    %c0_29 = arith.constant 0 : index
    %38 = vector.load %arg4[%c1_27, %c0_28, %c0_29] : memref<2x2x32xf32, #tpu.memory_space<vmem>>, vector<1x2x32xf32>
    %39 = vector.shape_cast %38 : vector<1x2x32xf32> to vector<2x32xf32>
    %c0_i32 = arith.constant 0 : i32
    %40 = arith.index_cast %c0_i32 : i32 to index
    %c0_30 = arith.constant 0 : index
    %c0_31 = arith.constant 0 : index
    %41 = vector.load %arg1[%40, %c0_30, %c0_31] : memref<8x2x32xf32, #tpu.memory_space<vmem>>, vector<1x2x32xf32>
    %42 = vector.shape_cast %41 : vector<1x2x32xf32> to vector<2x32xf32>
    %43 = arith.index_cast %c0_i32 : i32 to index
    %c0_32 = arith.constant 0 : index
    %c0_33 = arith.constant 0 : index
    %44 = vector.load %arg2[%43, %c0_32, %c0_33] : memref<8x2x32xf32, #tpu.memory_space<vmem>>, vector<1x2x32xf32>
    %45 = vector.shape_cast %44 : vector<1x2x32xf32> to vector<2x32xf32>
    %46 = arith.index_cast %c0_i32 : i32 to index
    %c0_34 = arith.constant 0 : index
    %c0_35 = arith.constant 0 : index
    %47 = vector.load %arg3[%46, %c0_34, %c0_35] : memref<8x2x32xf32, #tpu.memory_space<vmem>>, vector<1x2x32xf32>
    %48 = vector.shape_cast %47 : vector<1x2x32xf32> to vector<2x32xf32>
    %c0_36 = arith.constant 0 : index
    %c0_37 = arith.constant 0 : index
    %c0_38 = arith.constant 0 : index
    %49 = vector.load %arg5[%c0_36, %c0_37, %c0_38] : memref<3x32x32xf32, #tpu.memory_space<vmem>>, vector<1x32x32xf32>
    %50 = vector.shape_cast %49 : vector<1x32x32xf32> to vector<32x32xf32>
    %cst = arith.constant dense<0.000000e+00> : vector<2x32xf32>
    %51 = tpu.matmul %37, %50, %cst {dimension_numbers = #tpu.dot_dimension_numbers<[1], [0], [0], [1], [0, 0, 1, 1], [], []>} : vector<2x32xf32>, vector<32x32xf32>, vector<2x32xf32> -> vector<2x32xf32>
    %52 = arith.addf %51, %3 : vector<2x32xf32>
    %c1_39 = arith.constant 1 : index
    %c0_40 = arith.constant 0 : index
    %c0_41 = arith.constant 0 : index
    %53 = vector.load %arg5[%c1_39, %c0_40, %c0_41] : memref<3x32x32xf32, #tpu.memory_space<vmem>>, vector<1x32x32xf32>
    %54 = vector.shape_cast %53 : vector<1x32x32xf32> to vector<32x32xf32>
    %cst_42 = arith.constant dense<0.000000e+00> : vector<2x32xf32>
    %55 = tpu.matmul %37, %54, %cst_42 {dimension_numbers = #tpu.dot_dimension_numbers<[1], [0], [0], [1], [0, 0, 1, 1], [], []>} : vector<2x32xf32>, vector<32x32xf32>, vector<2x32xf32> -> vector<2x32xf32>
    %56 = arith.addf %55, %7 : vector<2x32xf32>
    %c2_43 = arith.constant 2 : index
    %c0_44 = arith.constant 0 : index
    %c0_45 = arith.constant 0 : index
    %57 = vector.load %arg5[%c2_43, %c0_44, %c0_45] : memref<3x32x32xf32, #tpu.memory_space<vmem>>, vector<1x32x32xf32>
    %58 = vector.shape_cast %57 : vector<1x32x32xf32> to vector<32x32xf32>
    %cst_46 = arith.constant dense<0.000000e+00> : vector<2x32xf32>
    %59 = tpu.matmul %37, %58, %cst_46 {dimension_numbers = #tpu.dot_dimension_numbers<[1], [0], [0], [1], [0, 0, 1, 1], [], []>} : vector<2x32xf32>, vector<32x32xf32>, vector<2x32xf32> -> vector<2x32xf32>
    %60 = arith.addf %59, %11 : vector<2x32xf32>
    %61 = arith.addf %42, %52 : vector<2x32xf32>
    %62 = arith.negf %61 : vector<2x32xf32>
    %63 = math.exp %62 : vector<2x32xf32>
    %cst_47 = arith.constant 1.000000e+00 : f32
    %64 = vector.broadcast %cst_47 : f32 to vector<2x32xf32>
    %65 = arith.addf %64, %63 : vector<2x32xf32>
    %66 = arith.divf %64, %65 : vector<2x32xf32>
    %67 = arith.addf %45, %56 : vector<2x32xf32>
    %68 = arith.negf %67 : vector<2x32xf32>
    %69 = math.exp %68 : vector<2x32xf32>
    %cst_48 = arith.constant 1.000000e+00 : f32
    %70 = vector.broadcast %cst_48 : f32 to vector<2x32xf32>
    %71 = arith.addf %70, %69 : vector<2x32xf32>
    %72 = arith.divf %70, %71 : vector<2x32xf32>
    %73 = arith.mulf %66, %60 : vector<2x32xf32>
    %74 = arith.addf %48, %73 : vector<2x32xf32>
    %75 = math.tanh %74 : vector<2x32xf32>
    %cst_49 = arith.constant 1.000000e+00 : f32
    %76 = vector.broadcast %cst_49 : f32 to vector<2x32xf32>
    %77 = arith.subf %76, %72 : vector<2x32xf32>
    %78 = arith.mulf %77, %75 : vector<2x32xf32>
    %79 = arith.mulf %72, %37 : vector<2x32xf32>
    %80 = arith.addf %78, %79 : vector<2x32xf32>
    %c0_50 = arith.constant 0 : index
    %c0_51 = arith.constant 0 : index
    %c0_52 = arith.constant 0 : index
    %81 = vector.load %arg7[%c0_50, %c0_51, %c0_52] : memref<3x32x32xf32, #tpu.memory_space<vmem>>, vector<1x32x32xf32>
    %82 = vector.shape_cast %81 : vector<1x32x32xf32> to vector<32x32xf32>
    %cst_53 = arith.constant dense<0.000000e+00> : vector<2x32xf32>
    %83 = tpu.matmul %80, %82, %cst_53 {dimension_numbers = #tpu.dot_dimension_numbers<[1], [0], [0], [1], [0, 0, 1, 1], [], []>} : vector<2x32xf32>, vector<32x32xf32>, vector<2x32xf32> -> vector<2x32xf32>
    %84 = arith.addf %83, %15 : vector<2x32xf32>
    %c1_54 = arith.constant 1 : index
    %c0_55 = arith.constant 0 : index
    %c0_56 = arith.constant 0 : index
    %85 = vector.load %arg7[%c1_54, %c0_55, %c0_56] : memref<3x32x32xf32, #tpu.memory_space<vmem>>, vector<1x32x32xf32>
    %86 = vector.shape_cast %85 : vector<1x32x32xf32> to vector<32x32xf32>
    %cst_57 = arith.constant dense<0.000000e+00> : vector<2x32xf32>
    %87 = tpu.matmul %80, %86, %cst_57 {dimension_numbers = #tpu.dot_dimension_numbers<[1], [0], [0], [1], [0, 0, 1, 1], [], []>} : vector<2x32xf32>, vector<32x32xf32>, vector<2x32xf32> -> vector<2x32xf32>
    %88 = arith.addf %87, %19 : vector<2x32xf32>
    %c2_58 = arith.constant 2 : index
    %c0_59 = arith.constant 0 : index
    %c0_60 = arith.constant 0 : index
    %89 = vector.load %arg7[%c2_58, %c0_59, %c0_60] : memref<3x32x32xf32, #tpu.memory_space<vmem>>, vector<1x32x32xf32>
    %90 = vector.shape_cast %89 : vector<1x32x32xf32> to vector<32x32xf32>
    %cst_61 = arith.constant dense<0.000000e+00> : vector<2x32xf32>
    %91 = tpu.matmul %80, %90, %cst_61 {dimension_numbers = #tpu.dot_dimension_numbers<[1], [0], [0], [1], [0, 0, 1, 1], [], []>} : vector<2x32xf32>, vector<32x32xf32>, vector<2x32xf32> -> vector<2x32xf32>
    %92 = arith.addf %91, %23 : vector<2x32xf32>
    %c0_62 = arith.constant 0 : index
    %c0_63 = arith.constant 0 : index
    %c0_64 = arith.constant 0 : index
    %93 = vector.load %arg9[%c0_62, %c0_63, %c0_64] : memref<3x32x32xf32, #tpu.memory_space<vmem>>, vector<1x32x32xf32>
    %94 = vector.shape_cast %93 : vector<1x32x32xf32> to vector<32x32xf32>
    %cst_65 = arith.constant dense<0.000000e+00> : vector<2x32xf32>
    %95 = tpu.matmul %39, %94, %cst_65 {dimension_numbers = #tpu.dot_dimension_numbers<[1], [0], [0], [1], [0, 0, 1, 1], [], []>} : vector<2x32xf32>, vector<32x32xf32>, vector<2x32xf32> -> vector<2x32xf32>
    %96 = arith.addf %95, %27 : vector<2x32xf32>
    %c1_66 = arith.constant 1 : index
    %c0_67 = arith.constant 0 : index
    %c0_68 = arith.constant 0 : index
    %97 = vector.load %arg9[%c1_66, %c0_67, %c0_68] : memref<3x32x32xf32, #tpu.memory_space<vmem>>, vector<1x32x32xf32>
    %98 = vector.shape_cast %97 : vector<1x32x32xf32> to vector<32x32xf32>
    %cst_69 = arith.constant dense<0.000000e+00> : vector<2x32xf32>
    %99 = tpu.matmul %39, %98, %cst_69 {dimension_numbers = #tpu.dot_dimension_numbers<[1], [0], [0], [1], [0, 0, 1, 1], [], []>} : vector<2x32xf32>, vector<32x32xf32>, vector<2x32xf32> -> vector<2x32xf32>
    %100 = arith.addf %99, %31 : vector<2x32xf32>
    %c2_70 = arith.constant 2 : index
    %c0_71 = arith.constant 0 : index
    %c0_72 = arith.constant 0 : index
    %101 = vector.load %arg9[%c2_70, %c0_71, %c0_72] : memref<3x32x32xf32, #tpu.memory_space<vmem>>, vector<1x32x32xf32>
    %102 = vector.shape_cast %101 : vector<1x32x32xf32> to vector<32x32xf32>
    %cst_73 = arith.constant dense<0.000000e+00> : vector<2x32xf32>
    %103 = tpu.matmul %39, %102, %cst_73 {dimension_numbers = #tpu.dot_dimension_numbers<[1], [0], [0], [1], [0, 0, 1, 1], [], []>} : vector<2x32xf32>, vector<32x32xf32>, vector<2x32xf32> -> vector<2x32xf32>
    %104 = arith.addf %103, %35 : vector<2x32xf32>
    %105 = arith.addf %84, %96 : vector<2x32xf32>
    %106 = arith.negf %105 : vector<2x32xf32>
    %107 = math.exp %106 : vector<2x32xf32>
    %cst_74 = arith.constant 1.000000e+00 : f32
    %108 = vector.broadcast %cst_74 : f32 to vector<2x32xf32>
    %109 = arith.addf %108, %107 : vector<2x32xf32>
    %110 = arith.divf %108, %109 : vector<2x32xf32>
    %111 = arith.addf %88, %100 : vector<2x32xf32>
    %112 = arith.negf %111 : vector<2x32xf32>
    %113 = math.exp %112 : vector<2x32xf32>
    %cst_75 = arith.constant 1.000000e+00 : f32
    %114 = vector.broadcast %cst_75 : f32 to vector<2x32xf32>
    %115 = arith.addf %114, %113 : vector<2x32xf32>
    %116 = arith.divf %114, %115 : vector<2x32xf32>
    %117 = arith.mulf %110, %104 : vector<2x32xf32>
    %118 = arith.addf %92, %117 : vector<2x32xf32>
    %119 = math.tanh %118 : vector<2x32xf32>
    %cst_76 = arith.constant 1.000000e+00 : f32
    %120 = vector.broadcast %cst_76 : f32 to vector<2x32xf32>
    %121 = arith.subf %120, %116 : vector<2x32xf32>
    %122 = arith.mulf %121, %119 : vector<2x32xf32>
    %123 = arith.mulf %116, %39 : vector<2x32xf32>
    %124 = arith.addf %122, %123 : vector<2x32xf32>
    %125 = arith.index_cast %c0_i32 : i32 to index
    %c0_77 = arith.constant 0 : index
    %c0_78 = arith.constant 0 : index
    %126 = vector.load %arg11[%125, %c0_77, %c0_78] : memref<8x2x32xf32, #tpu.memory_space<vmem>>, vector<1x2x32xf32>
    %127 = vector.shape_cast %126 : vector<1x2x32xf32> to vector<2x32xf32>
    %128 = vector.shape_cast %124 : vector<2x32xf32> to vector<1x2x32xf32>
    tpu.vector_store %arg11[%125, %c0_77, %c0_78], %128 {strides = array<i32>} : memref<8x2x32xf32, #tpu.memory_space<vmem>>, vector<1x2x32xf32>,
    %c1_i32 = arith.constant 1 : i32
    %129 = arith.index_cast %c1_i32 : i32 to index
    %c0_79 = arith.constant 0 : index
    %c0_80 = arith.constant 0 : index
    %130 = vector.load %arg1[%129, %c0_79, %c0_80] : memref<8x2x32xf32, #tpu.memory_space<vmem>>, vector<1x2x32xf32>
    %131 = vector.shape_cast %130 : vector<1x2x32xf32> to vector<2x32xf32>
    %132 = arith.index_cast %c1_i32 : i32 to index
    %c0_81 = arith.constant 0 : index
    %c0_82 = arith.constant 0 : index
    %133 = vector.load %arg2[%132, %c0_81, %c0_82] : memref<8x2x32xf32, #tpu.memory_space<vmem>>, vector<1x2x32xf32>
    %134 = vector.shape_cast %133 : vector<1x2x32xf32> to vector<2x32xf32>
    %135 = arith.index_cast %c1_i32 : i32 to index
    %c0_83 = arith.constant 0 : index
    %c0_84 = arith.constant 0 : index
    %136 = vector.load %arg3[%135, %c0_83, %c0_84] : memref<8x2x32xf32, #tpu.memory_space<vmem>>, vector<1x2x32xf32>
    %137 = vector.shape_cast %136 : vector<1x2x32xf32> to vector<2x32xf32>
    %c0_85 = arith.constant 0 : index
    %c0_86 = arith.constant 0 : index
    %c0_87 = arith.constant 0 : index
    %138 = vector.load %arg5[%c0_85, %c0_86, %c0_87] : memref<3x32x32xf32, #tpu.memory_space<vmem>>, vector<1x32x32xf32>
    %139 = vector.shape_cast %138 : vector<1x32x32xf32> to vector<32x32xf32>
    %cst_88 = arith.constant dense<0.000000e+00> : vector<2x32xf32>
    %140 = tpu.matmul %80, %139, %cst_88 {dimension_numbers = #tpu.dot_dimension_numbers<[1], [0], [0], [1], [0, 0, 1, 1], [], []>} : vector<2x32xf32>, vector<32x32xf32>, vector<2x32xf32> -> vector<2x32xf32>
    %141 = arith.addf %140, %3 : vector<2x32xf32>
    %c1_89 = arith.constant 1 : index
    %c0_90 = arith.constant 0 : index
    %c0_91 = arith.constant 0 : index
    %142 = vector.load %arg5[%c1_89, %c0_90, %c0_91] : memref<3x32x32xf32, #tpu.memory_space<vmem>>, vector<1x32x32xf32>
    %143 = vector.shape_cast %142 : vector<1x32x32xf32> to vector<32x32xf32>
    %cst_92 = arith.constant dense<0.000000e+00> : vector<2x32xf32>
    %144 = tpu.matmul %80, %143, %cst_92 {dimension_numbers = #tpu.dot_dimension_numbers<[1], [0], [0], [1], [0, 0, 1, 1], [], []>} : vector<2x32xf32>, vector<32x32xf32>, vector<2x32xf32> -> vector<2x32xf32>
    %145 = arith.addf %144, %7 : vector<2x32xf32>
    %c2_93 = arith.constant 2 : index
    %c0_94 = arith.constant 0 : index
    %c0_95 = arith.constant 0 : index
    %146 = vector.load %arg5[%c2_93, %c0_94, %c0_95] : memref<3x32x32xf32, #tpu.memory_space<vmem>>, vector<1x32x32xf32>
    %147 = vector.shape_cast %146 : vector<1x32x32xf32> to vector<32x32xf32>
    %cst_96 = arith.constant dense<0.000000e+00> : vector<2x32xf32>
    %148 = tpu.matmul %80, %147, %cst_96 {dimension_numbers = #tpu.dot_dimension_numbers<[1], [0], [0], [1], [0, 0, 1, 1], [], []>} : vector<2x32xf32>, vector<32x32xf32>, vector<2x32xf32> -> vector<2x32xf32>
    %149 = arith.addf %148, %11 : vector<2x32xf32>
    %150 = arith.addf %131, %141 : vector<2x32xf32>
    %151 = arith.negf %150 : vector<2x32xf32>
    %152 = math.exp %151 : vector<2x32xf32>
    %cst_97 = arith.constant 1.000000e+00 : f32
    %153 = vector.broadcast %cst_97 : f32 to vector<2x32xf32>
    %154 = arith.addf %153, %152 : vector<2x32xf32>
    %155 = arith.divf %153, %154 : vector<2x32xf32>
    %156 = arith.addf %134, %145 : vector<2x32xf32>
    %157 = arith.negf %156 : vector<2x32xf32>
    %158 = math.exp %157 : vector<2x32xf32>
    %cst_98 = arith.constant 1.000000e+00 : f32
    %159 = vector.broadcast %cst_98 : f32 to vector<2x32xf32>
    %160 = arith.addf %159, %158 : vector<2x32xf32>
    %161 = arith.divf %159, %160 : vector<2x32xf32>
    %162 = arith.mulf %155, %149 : vector<2x32xf32>
    %163 = arith.addf %137, %162 : vector<2x32xf32>
    %164 = math.tanh %163 : vector<2x32xf32>
    %cst_99 = arith.constant 1.000000e+00 : f32
    %165 = vector.broadcast %cst_99 : f32 to vector<2x32xf32>
    %166 = arith.subf %165, %161 : vector<2x32xf32>
    %167 = arith.mulf %166, %164 : vector<2x32xf32>
    %168 = arith.mulf %161, %80 : vector<2x32xf32>
    %169 = arith.addf %167, %168 : vector<2x32xf32>
    %c0_100 = arith.constant 0 : index
    %c0_101 = arith.constant 0 : index
    %c0_102 = arith.constant 0 : index
    %170 = vector.load %arg7[%c0_100, %c0_101, %c0_102] : memref<3x32x32xf32, #tpu.memory_space<vmem>>, vector<1x32x32xf32>
    %171 = vector.shape_cast %170 : vector<1x32x32xf32> to vector<32x32xf32>
    %cst_103 = arith.constant dense<0.000000e+00> : vector<2x32xf32>
    %172 = tpu.matmul %169, %171, %cst_103 {dimension_numbers = #tpu.dot_dimension_numbers<[1], [0], [0], [1], [0, 0, 1, 1], [], []>} : vector<2x32xf32>, vector<32x32xf32>, vector<2x32xf32> -> vector<2x32xf32>
    %173 = arith.addf %172, %15 : vector<2x32xf32>
    %c1_104 = arith.constant 1 : index
    %c0_105 = arith.constant 0 : index
    %c0_106 = arith.constant 0 : index
    %174 = vector.load %arg7[%c1_104, %c0_105, %c0_106] : memref<3x32x32xf32, #tpu.memory_space<vmem>>, vector<1x32x32xf32>
    %175 = vector.shape_cast %174 : vector<1x32x32xf32> to vector<32x32xf32>
    %cst_107 = arith.constant dense<0.000000e+00> : vector<2x32xf32>
    %176 = tpu.matmul %169, %175, %cst_107 {dimension_numbers = #tpu.dot_dimension_numbers<[1], [0], [0], [1], [0, 0, 1, 1], [], []>} : vector<2x32xf32>, vector<32x32xf32>, vector<2x32xf32> -> vector<2x32xf32>
    %177 = arith.addf %176, %19 : vector<2x32xf32>
    %c2_108 = arith.constant 2 : index
    %c0_109 = arith.constant 0 : index
    %c0_110 = arith.constant 0 : index
    %178 = vector.load %arg7[%c2_108, %c0_109, %c0_110] : memref<3x32x32xf32, #tpu.memory_space<vmem>>, vector<1x32x32xf32>
    %179 = vector.shape_cast %178 : vector<1x32x32xf32> to vector<32x32xf32>
    %cst_111 = arith.constant dense<0.000000e+00> : vector<2x32xf32>
    %180 = tpu.matmul %169, %179, %cst_111 {dimension_numbers = #tpu.dot_dimension_numbers<[1], [0], [0], [1], [0, 0, 1, 1], [], []>} : vector<2x32xf32>, vector<32x32xf32>, vector<2x32xf32> -> vector<2x32xf32>
    %181 = arith.addf %180, %23 : vector<2x32xf32>
    %c0_112 = arith.constant 0 : index
    %c0_113 = arith.constant 0 : index
    %c0_114 = arith.constant 0 : index
    %182 = vector.load %arg9[%c0_112, %c0_113, %c0_114] : memref<3x32x32xf32, #tpu.memory_space<vmem>>, vector<1x32x32xf32>
    %183 = vector.shape_cast %182 : vector<1x32x32xf32> to vector<32x32xf32>
    %cst_115 = arith.constant dense<0.000000e+00> : vector<2x32xf32>
    %184 = tpu.matmul %124, %183, %cst_115 {dimension_numbers = #tpu.dot_dimension_numbers<[1], [0], [0], [1], [0, 0, 1, 1], [], []>} : vector<2x32xf32>, vector<32x32xf32>, vector<2x32xf32> -> vector<2x32xf32>
    %185 = arith.addf %184, %27 : vector<2x32xf32>
    %c1_116 = arith.constant 1 : index
    %c0_117 = arith.constant 0 : index
    %c0_118 = arith.constant 0 : index
    %186 = vector.load %arg9[%c1_116, %c0_117, %c0_118] : memref<3x32x32xf32, #tpu.memory_space<vmem>>, vector<1x32x32xf32>
    %187 = vector.shape_cast %186 : vector<1x32x32xf32> to vector<32x32xf32>
    %cst_119 = arith.constant dense<0.000000e+00> : vector<2x32xf32>
    %188 = tpu.matmul %124, %187, %cst_119 {dimension_numbers = #tpu.dot_dimension_numbers<[1], [0], [0], [1], [0, 0, 1, 1], [], []>} : vector<2x32xf32>, vector<32x32xf32>, vector<2x32xf32> -> vector<2x32xf32>
    %189 = arith.addf %188, %31 : vector<2x32xf32>
    %c2_120 = arith.constant 2 : index
    %c0_121 = arith.constant 0 : index
    %c0_122 = arith.constant 0 : index
    %190 = vector.load %arg9[%c2_120, %c0_121, %c0_122] : memref<3x32x32xf32, #tpu.memory_space<vmem>>, vector<1x32x32xf32>
    %191 = vector.shape_cast %190 : vector<1x32x32xf32> to vector<32x32xf32>
    %cst_123 = arith.constant dense<0.000000e+00> : vector<2x32xf32>
    %192 = tpu.matmul %124, %191, %cst_123 {dimension_numbers = #tpu.dot_dimension_numbers<[1], [0], [0], [1], [0, 0, 1, 1], [], []>} : vector<2x32xf32>, vector<32x32xf32>, vector<2x32xf32> -> vector<2x32xf32>
    %193 = arith.addf %192, %35 : vector<2x32xf32>
    %194 = arith.addf %173, %185 : vector<2x32xf32>
    %195 = arith.negf %194 : vector<2x32xf32>
    %196 = math.exp %195 : vector<2x32xf32>
    %cst_124 = arith.constant 1.000000e+00 : f32
    %197 = vector.broadcast %cst_124 : f32 to vector<2x32xf32>
    %198 = arith.addf %197, %196 : vector<2x32xf32>
    %199 = arith.divf %197, %198 : vector<2x32xf32>
    %200 = arith.addf %177, %189 : vector<2x32xf32>
    %201 = arith.negf %200 : vector<2x32xf32>
    %202 = math.exp %201 : vector<2x32xf32>
    %cst_125 = arith.constant 1.000000e+00 : f32
    %203 = vector.broadcast %cst_125 : f32 to vector<2x32xf32>
    %204 = arith.addf %203, %202 : vector<2x32xf32>
    %205 = arith.divf %203, %204 : vector<2x32xf32>
    %206 = arith.mulf %199, %193 : vector<2x32xf32>
    %207 = arith.addf %181, %206 : vector<2x32xf32>
    %208 = math.tanh %207 : vector<2x32xf32>
    %cst_126 = arith.constant 1.000000e+00 : f32
    %209 = vector.broadcast %cst_126 : f32 to vector<2x32xf32>
    %210 = arith.subf %209, %205 : vector<2x32xf32>
    %211 = arith.mulf %210, %208 : vector<2x32xf32>
    %212 = arith.mulf %205, %124 : vector<2x32xf32>
    %213 = arith.addf %211, %212 : vector<2x32xf32>
    %214 = arith.index_cast %c1_i32 : i32 to index
    %c0_127 = arith.constant 0 : index
    %c0_128 = arith.constant 0 : index
    %215 = vector.load %arg11[%214, %c0_127, %c0_128] : memref<8x2x32xf32, #tpu.memory_space<vmem>>, vector<1x2x32xf32>
    %216 = vector.shape_cast %215 : vector<1x2x32xf32> to vector<2x32xf32>
    %217 = vector.shape_cast %213 : vector<2x32xf32> to vector<1x2x32xf32>
    tpu.vector_store %arg11[%214, %c0_127, %c0_128], %217 {strides = array<i32>} : memref<8x2x32xf32, #tpu.memory_space<vmem>>, vector<1x2x32xf32>,
    %c2_i32 = arith.constant 2 : i32
    %218 = arith.index_cast %c2_i32 : i32 to index
    %c0_129 = arith.constant 0 : index
    %c0_130 = arith.constant 0 : index
    %219 = vector.load %arg1[%218, %c0_129, %c0_130] : memref<8x2x32xf32, #tpu.memory_space<vmem>>, vector<1x2x32xf32>
    %220 = vector.shape_cast %219 : vector<1x2x32xf32> to vector<2x32xf32>
    %221 = arith.index_cast %c2_i32 : i32 to index
    %c0_131 = arith.constant 0 : index
    %c0_132 = arith.constant 0 : index
    %222 = vector.load %arg2[%221, %c0_131, %c0_132] : memref<8x2x32xf32, #tpu.memory_space<vmem>>, vector<1x2x32xf32>
    %223 = vector.shape_cast %222 : vector<1x2x32xf32> to vector<2x32xf32>
    %224 = arith.index_cast %c2_i32 : i32 to index
    %c0_133 = arith.constant 0 : index
    %c0_134 = arith.constant 0 : index
    %225 = vector.load %arg3[%224, %c0_133, %c0_134] : memref<8x2x32xf32, #tpu.memory_space<vmem>>, vector<1x2x32xf32>
    %226 = vector.shape_cast %225 : vector<1x2x32xf32> to vector<2x32xf32>
    %c0_135 = arith.constant 0 : index
    %c0_136 = arith.constant 0 : index
    %c0_137 = arith.constant 0 : index
    %227 = vector.load %arg5[%c0_135, %c0_136, %c0_137] : memref<3x32x32xf32, #tpu.memory_space<vmem>>, vector<1x32x32xf32>
    %228 = vector.shape_cast %227 : vector<1x32x32xf32> to vector<32x32xf32>
    %cst_138 = arith.constant dense<0.000000e+00> : vector<2x32xf32>
    %229 = tpu.matmul %169, %228, %cst_138 {dimension_numbers = #tpu.dot_dimension_numbers<[1], [0], [0], [1], [0, 0, 1, 1], [], []>} : vector<2x32xf32>, vector<32x32xf32>, vector<2x32xf32> -> vector<2x32xf32>
    %230 = arith.addf %229, %3 : vector<2x32xf32>
    %c1_139 = arith.constant 1 : index
    %c0_140 = arith.constant 0 : index
    %c0_141 = arith.constant 0 : index
    %231 = vector.load %arg5[%c1_139, %c0_140, %c0_141] : memref<3x32x32xf32, #tpu.memory_space<vmem>>, vector<1x32x32xf32>
    %232 = vector.shape_cast %231 : vector<1x32x32xf32> to vector<32x32xf32>
    %cst_142 = arith.constant dense<0.000000e+00> : vector<2x32xf32>
    %233 = tpu.matmul %169, %232, %cst_142 {dimension_numbers = #tpu.dot_dimension_numbers<[1], [0], [0], [1], [0, 0, 1, 1], [], []>} : vector<2x32xf32>, vector<32x32xf32>, vector<2x32xf32> -> vector<2x32xf32>
    %234 = arith.addf %233, %7 : vector<2x32xf32>
    %c2_143 = arith.constant 2 : index
    %c0_144 = arith.constant 0 : index
    %c0_145 = arith.constant 0 : index
    %235 = vector.load %arg5[%c2_143, %c0_144, %c0_145] : memref<3x32x32xf32, #tpu.memory_space<vmem>>, vector<1x32x32xf32>
    %236 = vector.shape_cast %235 : vector<1x32x32xf32> to vector<32x32xf32>
    %cst_146 = arith.constant dense<0.000000e+00> : vector<2x32xf32>
    %237 = tpu.matmul %169, %236, %cst_146 {dimension_numbers = #tpu.dot_dimension_numbers<[1], [0], [0], [1], [0, 0, 1, 1], [], []>} : vector<2x32xf32>, vector<32x32xf32>, vector<2x32xf32> -> vector<2x32xf32>
    %238 = arith.addf %237, %11 : vector<2x32xf32>
    %239 = arith.addf %220, %230 : vector<2x32xf32>
    %240 = arith.negf %239 : vector<2x32xf32>
    %241 = math.exp %240 : vector<2x32xf32>
    %cst_147 = arith.constant 1.000000e+00 : f32
    %242 = vector.broadcast %cst_147 : f32 to vector<2x32xf32>
    %243 = arith.addf %242, %241 : vector<2x32xf32>
    %244 = arith.divf %242, %243 : vector<2x32xf32>
    %245 = arith.addf %223, %234 : vector<2x32xf32>
    %246 = arith.negf %245 : vector<2x32xf32>
    %247 = math.exp %246 : vector<2x32xf32>
    %cst_148 = arith.constant 1.000000e+00 : f32
    %248 = vector.broadcast %cst_148 : f32 to vector<2x32xf32>
    %249 = arith.addf %248, %247 : vector<2x32xf32>
    %250 = arith.divf %248, %249 : vector<2x32xf32>
    %251 = arith.mulf %244, %238 : vector<2x32xf32>
    %252 = arith.addf %226, %251 : vector<2x32xf32>
    %253 = math.tanh %252 : vector<2x32xf32>
    %cst_149 = arith.constant 1.000000e+00 : f32
    %254 = vector.broadcast %cst_149 : f32 to vector<2x32xf32>
    %255 = arith.subf %254, %250 : vector<2x32xf32>
    %256 = arith.mulf %255, %253 : vector<2x32xf32>
    %257 = arith.mulf %250, %169 : vector<2x32xf32>
    %258 = arith.addf %256, %257 : vector<2x32xf32>
    %c0_150 = arith.constant 0 : index
    %c0_151 = arith.constant 0 : index
    %c0_152 = arith.constant 0 : index
    %259 = vector.load %arg7[%c0_150, %c0_151, %c0_152] : memref<3x32x32xf32, #tpu.memory_space<vmem>>, vector<1x32x32xf32>
    %260 = vector.shape_cast %259 : vector<1x32x32xf32> to vector<32x32xf32>
    %cst_153 = arith.constant dense<0.000000e+00> : vector<2x32xf32>
    %261 = tpu.matmul %258, %260, %cst_153 {dimension_numbers = #tpu.dot_dimension_numbers<[1], [0], [0], [1], [0, 0, 1, 1], [], []>} : vector<2x32xf32>, vector<32x32xf32>, vector<2x32xf32> -> vector<2x32xf32>
    %262 = arith.addf %261, %15 : vector<2x32xf32>
    %c1_154 = arith.constant 1 : index
    %c0_155 = arith.constant 0 : index
    %c0_156 = arith.constant 0 : index
    %263 = vector.load %arg7[%c1_154, %c0_155, %c0_156] : memref<3x32x32xf32, #tpu.memory_space<vmem>>, vector<1x32x32xf32>
    %264 = vector.shape_cast %263 : vector<1x32x32xf32> to vector<32x32xf32>
    %cst_157 = arith.constant dense<0.000000e+00> : vector<2x32xf32>
    %265 = tpu.matmul %258, %264, %cst_157 {dimension_numbers = #tpu.dot_dimension_numbers<[1], [0], [0], [1], [0, 0, 1, 1], [], []>} : vector<2x32xf32>, vector<32x32xf32>, vector<2x32xf32> -> vector<2x32xf32>
    %266 = arith.addf %265, %19 : vector<2x32xf32>
    %c2_158 = arith.constant 2 : index
    %c0_159 = arith.constant 0 : index
    %c0_160 = arith.constant 0 : index
    %267 = vector.load %arg7[%c2_158, %c0_159, %c0_160] : memref<3x32x32xf32, #tpu.memory_space<vmem>>, vector<1x32x32xf32>
    %268 = vector.shape_cast %267 : vector<1x32x32xf32> to vector<32x32xf32>
    %cst_161 = arith.constant dense<0.000000e+00> : vector<2x32xf32>
    %269 = tpu.matmul %258, %268, %cst_161 {dimension_numbers = #tpu.dot_dimension_numbers<[1], [0], [0], [1], [0, 0, 1, 1], [], []>} : vector<2x32xf32>, vector<32x32xf32>, vector<2x32xf32> -> vector<2x32xf32>
    %270 = arith.addf %269, %23 : vector<2x32xf32>
    %c0_162 = arith.constant 0 : index
    %c0_163 = arith.constant 0 : index
    %c0_164 = arith.constant 0 : index
    %271 = vector.load %arg9[%c0_162, %c0_163, %c0_164] : memref<3x32x32xf32, #tpu.memory_space<vmem>>, vector<1x32x32xf32>
    %272 = vector.shape_cast %271 : vector<1x32x32xf32> to vector<32x32xf32>
    %cst_165 = arith.constant dense<0.000000e+00> : vector<2x32xf32>
    %273 = tpu.matmul %213, %272, %cst_165 {dimension_numbers = #tpu.dot_dimension_numbers<[1], [0], [0], [1], [0, 0, 1, 1], [], []>} : vector<2x32xf32>, vector<32x32xf32>, vector<2x32xf32> -> vector<2x32xf32>
    %274 = arith.addf %273, %27 : vector<2x32xf32>
    %c1_166 = arith.constant 1 : index
    %c0_167 = arith.constant 0 : index
    %c0_168 = arith.constant 0 : index
    %275 = vector.load %arg9[%c1_166, %c0_167, %c0_168] : memref<3x32x32xf32, #tpu.memory_space<vmem>>, vector<1x32x32xf32>
    %276 = vector.shape_cast %275 : vector<1x32x32xf32> to vector<32x32xf32>
    %cst_169 = arith.constant dense<0.000000e+00> : vector<2x32xf32>
    %277 = tpu.matmul %213, %276, %cst_169 {dimension_numbers = #tpu.dot_dimension_numbers<[1], [0], [0], [1], [0, 0, 1, 1], [], []>} : vector<2x32xf32>, vector<32x32xf32>, vector<2x32xf32> -> vector<2x32xf32>
    %278 = arith.addf %277, %31 : vector<2x32xf32>
    %c2_170 = arith.constant 2 : index
    %c0_171 = arith.constant 0 : index
    %c0_172 = arith.constant 0 : index
    %279 = vector.load %arg9[%c2_170, %c0_171, %c0_172] : memref<3x32x32xf32, #tpu.memory_space<vmem>>, vector<1x32x32xf32>
    %280 = vector.shape_cast %279 : vector<1x32x32xf32> to vector<32x32xf32>
    %cst_173 = arith.constant dense<0.000000e+00> : vector<2x32xf32>
    %281 = tpu.matmul %213, %280, %cst_173 {dimension_numbers = #tpu.dot_dimension_numbers<[1], [0], [0], [1], [0, 0, 1, 1], [], []>} : vector<2x32xf32>, vector<32x32xf32>, vector<2x32xf32> -> vector<2x32xf32>
    %282 = arith.addf %281, %35 : vector<2x32xf32>
    %283 = arith.addf %262, %274 : vector<2x32xf32>
    %284 = arith.negf %283 : vector<2x32xf32>
    %285 = math.exp %284 : vector<2x32xf32>
    %cst_174 = arith.constant 1.000000e+00 : f32
    %286 = vector.broadcast %cst_174 : f32 to vector<2x32xf32>
    %287 = arith.addf %286, %285 : vector<2x32xf32>
    %288 = arith.divf %286, %287 : vector<2x32xf32>
    %289 = arith.addf %266, %278 : vector<2x32xf32>
    %290 = arith.negf %289 : vector<2x32xf32>
    %291 = math.exp %290 : vector<2x32xf32>
    %cst_175 = arith.constant 1.000000e+00 : f32
    %292 = vector.broadcast %cst_175 : f32 to vector<2x32xf32>
    %293 = arith.addf %292, %291 : vector<2x32xf32>
    %294 = arith.divf %292, %293 : vector<2x32xf32>
    %295 = arith.mulf %288, %282 : vector<2x32xf32>
    %296 = arith.addf %270, %295 : vector<2x32xf32>
    %297 = math.tanh %296 : vector<2x32xf32>
    %cst_176 = arith.constant 1.000000e+00 : f32
    %298 = vector.broadcast %cst_176 : f32 to vector<2x32xf32>
    %299 = arith.subf %298, %294 : vector<2x32xf32>
    %300 = arith.mulf %299, %297 : vector<2x32xf32>
    %301 = arith.mulf %294, %213 : vector<2x32xf32>
    %302 = arith.addf %300, %301 : vector<2x32xf32>
    %303 = arith.index_cast %c2_i32 : i32 to index
    %c0_177 = arith.constant 0 : index
    %c0_178 = arith.constant 0 : index
    %304 = vector.load %arg11[%303, %c0_177, %c0_178] : memref<8x2x32xf32, #tpu.memory_space<vmem>>, vector<1x2x32xf32>
    %305 = vector.shape_cast %304 : vector<1x2x32xf32> to vector<2x32xf32>
    %306 = vector.shape_cast %302 : vector<2x32xf32> to vector<1x2x32xf32>
    tpu.vector_store %arg11[%303, %c0_177, %c0_178], %306 {strides = array<i32>} : memref<8x2x32xf32, #tpu.memory_space<vmem>>, vector<1x2x32xf32>,
    %c3_i32 = arith.constant 3 : i32
    %307 = arith.index_cast %c3_i32 : i32 to index
    %c0_179 = arith.constant 0 : index
    %c0_180 = arith.constant 0 : index
    %308 = vector.load %arg1[%307, %c0_179, %c0_180] : memref<8x2x32xf32, #tpu.memory_space<vmem>>, vector<1x2x32xf32>
    %309 = vector.shape_cast %308 : vector<1x2x32xf32> to vector<2x32xf32>
    %310 = arith.index_cast %c3_i32 : i32 to index
    %c0_181 = arith.constant 0 : index
    %c0_182 = arith.constant 0 : index
    %311 = vector.load %arg2[%310, %c0_181, %c0_182] : memref<8x2x32xf32, #tpu.memory_space<vmem>>, vector<1x2x32xf32>
    %312 = vector.shape_cast %311 : vector<1x2x32xf32> to vector<2x32xf32>
    %313 = arith.index_cast %c3_i32 : i32 to index
    %c0_183 = arith.constant 0 : index
    %c0_184 = arith.constant 0 : index
    %314 = vector.load %arg3[%313, %c0_183, %c0_184] : memref<8x2x32xf32, #tpu.memory_space<vmem>>, vector<1x2x32xf32>
    %315 = vector.shape_cast %314 : vector<1x2x32xf32> to vector<2x32xf32>
    %c0_185 = arith.constant 0 : index
    %c0_186 = arith.constant 0 : index
    %c0_187 = arith.constant 0 : index
    %316 = vector.load %arg5[%c0_185, %c0_186, %c0_187] : memref<3x32x32xf32, #tpu.memory_space<vmem>>, vector<1x32x32xf32>
    %317 = vector.shape_cast %316 : vector<1x32x32xf32> to vector<32x32xf32>
    %cst_188 = arith.constant dense<0.000000e+00> : vector<2x32xf32>
    %318 = tpu.matmul %258, %317, %cst_188 {dimension_numbers = #tpu.dot_dimension_numbers<[1], [0], [0], [1], [0, 0, 1, 1], [], []>} : vector<2x32xf32>, vector<32x32xf32>, vector<2x32xf32> -> vector<2x32xf32>
    %319 = arith.addf %318, %3 : vector<2x32xf32>
    %c1_189 = arith.constant 1 : index
    %c0_190 = arith.constant 0 : index
    %c0_191 = arith.constant 0 : index
    %320 = vector.load %arg5[%c1_189, %c0_190, %c0_191] : memref<3x32x32xf32, #tpu.memory_space<vmem>>, vector<1x32x32xf32>
    %321 = vector.shape_cast %320 : vector<1x32x32xf32> to vector<32x32xf32>
    %cst_192 = arith.constant dense<0.000000e+00> : vector<2x32xf32>
    %322 = tpu.matmul %258, %321, %cst_192 {dimension_numbers = #tpu.dot_dimension_numbers<[1], [0], [0], [1], [0, 0, 1, 1], [], []>} : vector<2x32xf32>, vector<32x32xf32>, vector<2x32xf32> -> vector<2x32xf32>
    %323 = arith.addf %322, %7 : vector<2x32xf32>
    %c2_193 = arith.constant 2 : index
    %c0_194 = arith.constant 0 : index
    %c0_195 = arith.constant 0 : index
    %324 = vector.load %arg5[%c2_193, %c0_194, %c0_195] : memref<3x32x32xf32, #tpu.memory_space<vmem>>, vector<1x32x32xf32>
    %325 = vector.shape_cast %324 : vector<1x32x32xf32> to vector<32x32xf32>
    %cst_196 = arith.constant dense<0.000000e+00> : vector<2x32xf32>
    %326 = tpu.matmul %258, %325, %cst_196 {dimension_numbers = #tpu.dot_dimension_numbers<[1], [0], [0], [1], [0, 0, 1, 1], [], []>} : vector<2x32xf32>, vector<32x32xf32>, vector<2x32xf32> -> vector<2x32xf32>
    %327 = arith.addf %326, %11 : vector<2x32xf32>
    %328 = arith.addf %309, %319 : vector<2x32xf32>
    %329 = arith.negf %328 : vector<2x32xf32>
    %330 = math.exp %329 : vector<2x32xf32>
    %cst_197 = arith.constant 1.000000e+00 : f32
    %331 = vector.broadcast %cst_197 : f32 to vector<2x32xf32>
    %332 = arith.addf %331, %330 : vector<2x32xf32>
    %333 = arith.divf %331, %332 : vector<2x32xf32>
    %334 = arith.addf %312, %323 : vector<2x32xf32>
    %335 = arith.negf %334 : vector<2x32xf32>
    %336 = math.exp %335 : vector<2x32xf32>
    %cst_198 = arith.constant 1.000000e+00 : f32
    %337 = vector.broadcast %cst_198 : f32 to vector<2x32xf32>
    %338 = arith.addf %337, %336 : vector<2x32xf32>
    %339 = arith.divf %337, %338 : vector<2x32xf32>
    %340 = arith.mulf %333, %327 : vector<2x32xf32>
    %341 = arith.addf %315, %340 : vector<2x32xf32>
    %342 = math.tanh %341 : vector<2x32xf32>
    %cst_199 = arith.constant 1.000000e+00 : f32
    %343 = vector.broadcast %cst_199 : f32 to vector<2x32xf32>
    %344 = arith.subf %343, %339 : vector<2x32xf32>
    %345 = arith.mulf %344, %342 : vector<2x32xf32>
    %346 = arith.mulf %339, %258 : vector<2x32xf32>
    %347 = arith.addf %345, %346 : vector<2x32xf32>
    %c0_200 = arith.constant 0 : index
    %c0_201 = arith.constant 0 : index
    %c0_202 = arith.constant 0 : index
    %348 = vector.load %arg7[%c0_200, %c0_201, %c0_202] : memref<3x32x32xf32, #tpu.memory_space<vmem>>, vector<1x32x32xf32>
    %349 = vector.shape_cast %348 : vector<1x32x32xf32> to vector<32x32xf32>
    %cst_203 = arith.constant dense<0.000000e+00> : vector<2x32xf32>
    %350 = tpu.matmul %347, %349, %cst_203 {dimension_numbers = #tpu.dot_dimension_numbers<[1], [0], [0], [1], [0, 0, 1, 1], [], []>} : vector<2x32xf32>, vector<32x32xf32>, vector<2x32xf32> -> vector<2x32xf32>
    %351 = arith.addf %350, %15 : vector<2x32xf32>
    %c1_204 = arith.constant 1 : index
    %c0_205 = arith.constant 0 : index
    %c0_206 = arith.constant 0 : index
    %352 = vector.load %arg7[%c1_204, %c0_205, %c0_206] : memref<3x32x32xf32, #tpu.memory_space<vmem>>, vector<1x32x32xf32>
    %353 = vector.shape_cast %352 : vector<1x32x32xf32> to vector<32x32xf32>
    %cst_207 = arith.constant dense<0.000000e+00> : vector<2x32xf32>
    %354 = tpu.matmul %347, %353, %cst_207 {dimension_numbers = #tpu.dot_dimension_numbers<[1], [0], [0], [1], [0, 0, 1, 1], [], []>} : vector<2x32xf32>, vector<32x32xf32>, vector<2x32xf32> -> vector<2x32xf32>
    %355 = arith.addf %354, %19 : vector<2x32xf32>
    %c2_208 = arith.constant 2 : index
    %c0_209 = arith.constant 0 : index
    %c0_210 = arith.constant 0 : index
    %356 = vector.load %arg7[%c2_208, %c0_209, %c0_210] : memref<3x32x32xf32, #tpu.memory_space<vmem>>, vector<1x32x32xf32>
    %357 = vector.shape_cast %356 : vector<1x32x32xf32> to vector<32x32xf32>
    %cst_211 = arith.constant dense<0.000000e+00> : vector<2x32xf32>
    %358 = tpu.matmul %347, %357, %cst_211 {dimension_numbers = #tpu.dot_dimension_numbers<[1], [0], [0], [1], [0, 0, 1, 1], [], []>} : vector<2x32xf32>, vector<32x32xf32>, vector<2x32xf32> -> vector<2x32xf32>
    %359 = arith.addf %358, %23 : vector<2x32xf32>
    %c0_212 = arith.constant 0 : index
    %c0_213 = arith.constant 0 : index
    %c0_214 = arith.constant 0 : index
    %360 = vector.load %arg9[%c0_212, %c0_213, %c0_214] : memref<3x32x32xf32, #tpu.memory_space<vmem>>, vector<1x32x32xf32>
    %361 = vector.shape_cast %360 : vector<1x32x32xf32> to vector<32x32xf32>
    %cst_215 = arith.constant dense<0.000000e+00> : vector<2x32xf32>
    %362 = tpu.matmul %302, %361, %cst_215 {dimension_numbers = #tpu.dot_dimension_numbers<[1], [0], [0], [1], [0, 0, 1, 1], [], []>} : vector<2x32xf32>, vector<32x32xf32>, vector<2x32xf32> -> vector<2x32xf32>
    %363 = arith.addf %362, %27 : vector<2x32xf32>
    %c1_216 = arith.constant 1 : index
    %c0_217 = arith.constant 0 : index
    %c0_218 = arith.constant 0 : index
    %364 = vector.load %arg9[%c1_216, %c0_217, %c0_218] : memref<3x32x32xf32, #tpu.memory_space<vmem>>, vector<1x32x32xf32>
    %365 = vector.shape_cast %364 : vector<1x32x32xf32> to vector<32x32xf32>
    %cst_219 = arith.constant dense<0.000000e+00> : vector<2x32xf32>
    %366 = tpu.matmul %302, %365, %cst_219 {dimension_numbers = #tpu.dot_dimension_numbers<[1], [0], [0], [1], [0, 0, 1, 1], [], []>} : vector<2x32xf32>, vector<32x32xf32>, vector<2x32xf32> -> vector<2x32xf32>
    %367 = arith.addf %366, %31 : vector<2x32xf32>
    %c2_220 = arith.constant 2 : index
    %c0_221 = arith.constant 0 : index
    %c0_222 = arith.constant 0 : index
    %368 = vector.load %arg9[%c2_220, %c0_221, %c0_222] : memref<3x32x32xf32, #tpu.memory_space<vmem>>, vector<1x32x32xf32>
    %369 = vector.shape_cast %368 : vector<1x32x32xf32> to vector<32x32xf32>
    %cst_223 = arith.constant dense<0.000000e+00> : vector<2x32xf32>
    %370 = tpu.matmul %302, %369, %cst_223 {dimension_numbers = #tpu.dot_dimension_numbers<[1], [0], [0], [1], [0, 0, 1, 1], [], []>} : vector<2x32xf32>, vector<32x32xf32>, vector<2x32xf32> -> vector<2x32xf32>
    %371 = arith.addf %370, %35 : vector<2x32xf32>
    %372 = arith.addf %351, %363 : vector<2x32xf32>
    %373 = arith.negf %372 : vector<2x32xf32>
    %374 = math.exp %373 : vector<2x32xf32>
    %cst_224 = arith.constant 1.000000e+00 : f32
    %375 = vector.broadcast %cst_224 : f32 to vector<2x32xf32>
    %376 = arith.addf %375, %374 : vector<2x32xf32>
    %377 = arith.divf %375, %376 : vector<2x32xf32>
    %378 = arith.addf %355, %367 : vector<2x32xf32>
    %379 = arith.negf %378 : vector<2x32xf32>
    %380 = math.exp %379 : vector<2x32xf32>
    %cst_225 = arith.constant 1.000000e+00 : f32
    %381 = vector.broadcast %cst_225 : f32 to vector<2x32xf32>
    %382 = arith.addf %381, %380 : vector<2x32xf32>
    %383 = arith.divf %381, %382 : vector<2x32xf32>
    %384 = arith.mulf %377, %371 : vector<2x32xf32>
    %385 = arith.addf %359, %384 : vector<2x32xf32>
    %386 = math.tanh %385 : vector<2x32xf32>
    %cst_226 = arith.constant 1.000000e+00 : f32
    %387 = vector.broadcast %cst_226 : f32 to vector<2x32xf32>
    %388 = arith.subf %387, %383 : vector<2x32xf32>
    %389 = arith.mulf %388, %386 : vector<2x32xf32>
    %390 = arith.mulf %383, %302 : vector<2x32xf32>
    %391 = arith.addf %389, %390 : vector<2x32xf32>
    %392 = arith.index_cast %c3_i32 : i32 to index
    %c0_227 = arith.constant 0 : index
    %c0_228 = arith.constant 0 : index
    %393 = vector.load %arg11[%392, %c0_227, %c0_228] : memref<8x2x32xf32, #tpu.memory_space<vmem>>, vector<1x2x32xf32>
    %394 = vector.shape_cast %393 : vector<1x2x32xf32> to vector<2x32xf32>
    %395 = vector.shape_cast %391 : vector<2x32xf32> to vector<1x2x32xf32>
    tpu.vector_store %arg11[%392, %c0_227, %c0_228], %395 {strides = array<i32>} : memref<8x2x32xf32, #tpu.memory_space<vmem>>, vector<1x2x32xf32>,
    %c4_i32 = arith.constant 4 : i32
    %396 = arith.index_cast %c4_i32 : i32 to index
    %c0_229 = arith.constant 0 : index
    %c0_230 = arith.constant 0 : index
    %397 = vector.load %arg1[%396, %c0_229, %c0_230] : memref<8x2x32xf32, #tpu.memory_space<vmem>>, vector<1x2x32xf32>
    %398 = vector.shape_cast %397 : vector<1x2x32xf32> to vector<2x32xf32>
    %399 = arith.index_cast %c4_i32 : i32 to index
    %c0_231 = arith.constant 0 : index
    %c0_232 = arith.constant 0 : index
    %400 = vector.load %arg2[%399, %c0_231, %c0_232] : memref<8x2x32xf32, #tpu.memory_space<vmem>>, vector<1x2x32xf32>
    %401 = vector.shape_cast %400 : vector<1x2x32xf32> to vector<2x32xf32>
    %402 = arith.index_cast %c4_i32 : i32 to index
    %c0_233 = arith.constant 0 : index
    %c0_234 = arith.constant 0 : index
    %403 = vector.load %arg3[%402, %c0_233, %c0_234] : memref<8x2x32xf32, #tpu.memory_space<vmem>>, vector<1x2x32xf32>
    %404 = vector.shape_cast %403 : vector<1x2x32xf32> to vector<2x32xf32>
    %c0_235 = arith.constant 0 : index
    %c0_236 = arith.constant 0 : index
    %c0_237 = arith.constant 0 : index
    %405 = vector.load %arg5[%c0_235, %c0_236, %c0_237] : memref<3x32x32xf32, #tpu.memory_space<vmem>>, vector<1x32x32xf32>
    %406 = vector.shape_cast %405 : vector<1x32x32xf32> to vector<32x32xf32>
    %cst_238 = arith.constant dense<0.000000e+00> : vector<2x32xf32>
    %407 = tpu.matmul %347, %406, %cst_238 {dimension_numbers = #tpu.dot_dimension_numbers<[1], [0], [0], [1], [0, 0, 1, 1], [], []>} : vector<2x32xf32>, vector<32x32xf32>, vector<2x32xf32> -> vector<2x32xf32>
    %408 = arith.addf %407, %3 : vector<2x32xf32>
    %c1_239 = arith.constant 1 : index
    %c0_240 = arith.constant 0 : index
    %c0_241 = arith.constant 0 : index
    %409 = vector.load %arg5[%c1_239, %c0_240, %c0_241] : memref<3x32x32xf32, #tpu.memory_space<vmem>>, vector<1x32x32xf32>
    %410 = vector.shape_cast %409 : vector<1x32x32xf32> to vector<32x32xf32>
    %cst_242 = arith.constant dense<0.000000e+00> : vector<2x32xf32>
    %411 = tpu.matmul %347, %410, %cst_242 {dimension_numbers = #tpu.dot_dimension_numbers<[1], [0], [0], [1], [0, 0, 1, 1], [], []>} : vector<2x32xf32>, vector<32x32xf32>, vector<2x32xf32> -> vector<2x32xf32>
    %412 = arith.addf %411, %7 : vector<2x32xf32>
    %c2_243 = arith.constant 2 : index
    %c0_244 = arith.constant 0 : index
    %c0_245 = arith.constant 0 : index
    %413 = vector.load %arg5[%c2_243, %c0_244, %c0_245] : memref<3x32x32xf32, #tpu.memory_space<vmem>>, vector<1x32x32xf32>
    %414 = vector.shape_cast %413 : vector<1x32x32xf32> to vector<32x32xf32>
    %cst_246 = arith.constant dense<0.000000e+00> : vector<2x32xf32>
    %415 = tpu.matmul %347, %414, %cst_246 {dimension_numbers = #tpu.dot_dimension_numbers<[1], [0], [0], [1], [0, 0, 1, 1], [], []>} : vector<2x32xf32>, vector<32x32xf32>, vector<2x32xf32> -> vector<2x32xf32>
    %416 = arith.addf %415, %11 : vector<2x32xf32>
    %417 = arith.addf %398, %408 : vector<2x32xf32>
    %418 = arith.negf %417 : vector<2x32xf32>
    %419 = math.exp %418 : vector<2x32xf32>
    %cst_247 = arith.constant 1.000000e+00 : f32
    %420 = vector.broadcast %cst_247 : f32 to vector<2x32xf32>
    %421 = arith.addf %420, %419 : vector<2x32xf32>
    %422 = arith.divf %420, %421 : vector<2x32xf32>
    %423 = arith.addf %401, %412 : vector<2x32xf32>
    %424 = arith.negf %423 : vector<2x32xf32>
    %425 = math.exp %424 : vector<2x32xf32>
    %cst_248 = arith.constant 1.000000e+00 : f32
    %426 = vector.broadcast %cst_248 : f32 to vector<2x32xf32>
    %427 = arith.addf %426, %425 : vector<2x32xf32>
    %428 = arith.divf %426, %427 : vector<2x32xf32>
    %429 = arith.mulf %422, %416 : vector<2x32xf32>
    %430 = arith.addf %404, %429 : vector<2x32xf32>
    %431 = math.tanh %430 : vector<2x32xf32>
    %cst_249 = arith.constant 1.000000e+00 : f32
    %432 = vector.broadcast %cst_249 : f32 to vector<2x32xf32>
    %433 = arith.subf %432, %428 : vector<2x32xf32>
    %434 = arith.mulf %433, %431 : vector<2x32xf32>
    %435 = arith.mulf %428, %347 : vector<2x32xf32>
    %436 = arith.addf %434, %435 : vector<2x32xf32>
    %c0_250 = arith.constant 0 : index
    %c0_251 = arith.constant 0 : index
    %c0_252 = arith.constant 0 : index
    %437 = vector.load %arg7[%c0_250, %c0_251, %c0_252] : memref<3x32x32xf32, #tpu.memory_space<vmem>>, vector<1x32x32xf32>
    %438 = vector.shape_cast %437 : vector<1x32x32xf32> to vector<32x32xf32>
    %cst_253 = arith.constant dense<0.000000e+00> : vector<2x32xf32>
    %439 = tpu.matmul %436, %438, %cst_253 {dimension_numbers = #tpu.dot_dimension_numbers<[1], [0], [0], [1], [0, 0, 1, 1], [], []>} : vector<2x32xf32>, vector<32x32xf32>, vector<2x32xf32> -> vector<2x32xf32>
    %440 = arith.addf %439, %15 : vector<2x32xf32>
    %c1_254 = arith.constant 1 : index
    %c0_255 = arith.constant 0 : index
    %c0_256 = arith.constant 0 : index
    %441 = vector.load %arg7[%c1_254, %c0_255, %c0_256] : memref<3x32x32xf32, #tpu.memory_space<vmem>>, vector<1x32x32xf32>
    %442 = vector.shape_cast %441 : vector<1x32x32xf32> to vector<32x32xf32>
    %cst_257 = arith.constant dense<0.000000e+00> : vector<2x32xf32>
    %443 = tpu.matmul %436, %442, %cst_257 {dimension_numbers = #tpu.dot_dimension_numbers<[1], [0], [0], [1], [0, 0, 1, 1], [], []>} : vector<2x32xf32>, vector<32x32xf32>, vector<2x32xf32> -> vector<2x32xf32>
    %444 = arith.addf %443, %19 : vector<2x32xf32>
    %c2_258 = arith.constant 2 : index
    %c0_259 = arith.constant 0 : index
    %c0_260 = arith.constant 0 : index
    %445 = vector.load %arg7[%c2_258, %c0_259, %c0_260] : memref<3x32x32xf32, #tpu.memory_space<vmem>>, vector<1x32x32xf32>
    %446 = vector.shape_cast %445 : vector<1x32x32xf32> to vector<32x32xf32>
    %cst_261 = arith.constant dense<0.000000e+00> : vector<2x32xf32>
    %447 = tpu.matmul %436, %446, %cst_261 {dimension_numbers = #tpu.dot_dimension_numbers<[1], [0], [0], [1], [0, 0, 1, 1], [], []>} : vector<2x32xf32>, vector<32x32xf32>, vector<2x32xf32> -> vector<2x32xf32>
    %448 = arith.addf %447, %23 : vector<2x32xf32>
    %c0_262 = arith.constant 0 : index
    %c0_263 = arith.constant 0 : index
    %c0_264 = arith.constant 0 : index
    %449 = vector.load %arg9[%c0_262, %c0_263, %c0_264] : memref<3x32x32xf32, #tpu.memory_space<vmem>>, vector<1x32x32xf32>
    %450 = vector.shape_cast %449 : vector<1x32x32xf32> to vector<32x32xf32>
    %cst_265 = arith.constant dense<0.000000e+00> : vector<2x32xf32>
    %451 = tpu.matmul %391, %450, %cst_265 {dimension_numbers = #tpu.dot_dimension_numbers<[1], [0], [0], [1], [0, 0, 1, 1], [], []>} : vector<2x32xf32>, vector<32x32xf32>, vector<2x32xf32> -> vector<2x32xf32>
    %452 = arith.addf %451, %27 : vector<2x32xf32>
    %c1_266 = arith.constant 1 : index
    %c0_267 = arith.constant 0 : index
    %c0_268 = arith.constant 0 : index
    %453 = vector.load %arg9[%c1_266, %c0_267, %c0_268] : memref<3x32x32xf32, #tpu.memory_space<vmem>>, vector<1x32x32xf32>
    %454 = vector.shape_cast %453 : vector<1x32x32xf32> to vector<32x32xf32>
    %cst_269 = arith.constant dense<0.000000e+00> : vector<2x32xf32>
    %455 = tpu.matmul %391, %454, %cst_269 {dimension_numbers = #tpu.dot_dimension_numbers<[1], [0], [0], [1], [0, 0, 1, 1], [], []>} : vector<2x32xf32>, vector<32x32xf32>, vector<2x32xf32> -> vector<2x32xf32>
    %456 = arith.addf %455, %31 : vector<2x32xf32>
    %c2_270 = arith.constant 2 : index
    %c0_271 = arith.constant 0 : index
    %c0_272 = arith.constant 0 : index
    %457 = vector.load %arg9[%c2_270, %c0_271, %c0_272] : memref<3x32x32xf32, #tpu.memory_space<vmem>>, vector<1x32x32xf32>
    %458 = vector.shape_cast %457 : vector<1x32x32xf32> to vector<32x32xf32>
    %cst_273 = arith.constant dense<0.000000e+00> : vector<2x32xf32>
    %459 = tpu.matmul %391, %458, %cst_273 {dimension_numbers = #tpu.dot_dimension_numbers<[1], [0], [0], [1], [0, 0, 1, 1], [], []>} : vector<2x32xf32>, vector<32x32xf32>, vector<2x32xf32> -> vector<2x32xf32>
    %460 = arith.addf %459, %35 : vector<2x32xf32>
    %461 = arith.addf %440, %452 : vector<2x32xf32>
    %462 = arith.negf %461 : vector<2x32xf32>
    %463 = math.exp %462 : vector<2x32xf32>
    %cst_274 = arith.constant 1.000000e+00 : f32
    %464 = vector.broadcast %cst_274 : f32 to vector<2x32xf32>
    %465 = arith.addf %464, %463 : vector<2x32xf32>
    %466 = arith.divf %464, %465 : vector<2x32xf32>
    %467 = arith.addf %444, %456 : vector<2x32xf32>
    %468 = arith.negf %467 : vector<2x32xf32>
    %469 = math.exp %468 : vector<2x32xf32>
    %cst_275 = arith.constant 1.000000e+00 : f32
    %470 = vector.broadcast %cst_275 : f32 to vector<2x32xf32>
    %471 = arith.addf %470, %469 : vector<2x32xf32>
    %472 = arith.divf %470, %471 : vector<2x32xf32>
    %473 = arith.mulf %466, %460 : vector<2x32xf32>
    %474 = arith.addf %448, %473 : vector<2x32xf32>
    %475 = math.tanh %474 : vector<2x32xf32>
    %cst_276 = arith.constant 1.000000e+00 : f32
    %476 = vector.broadcast %cst_276 : f32 to vector<2x32xf32>
    %477 = arith.subf %476, %472 : vector<2x32xf32>
    %478 = arith.mulf %477, %475 : vector<2x32xf32>
    %479 = arith.mulf %472, %391 : vector<2x32xf32>
    %480 = arith.addf %478, %479 : vector<2x32xf32>
    %481 = arith.index_cast %c4_i32 : i32 to index
    %c0_277 = arith.constant 0 : index
    %c0_278 = arith.constant 0 : index
    %482 = vector.load %arg11[%481, %c0_277, %c0_278] : memref<8x2x32xf32, #tpu.memory_space<vmem>>, vector<1x2x32xf32>
    %483 = vector.shape_cast %482 : vector<1x2x32xf32> to vector<2x32xf32>
    %484 = vector.shape_cast %480 : vector<2x32xf32> to vector<1x2x32xf32>
    tpu.vector_store %arg11[%481, %c0_277, %c0_278], %484 {strides = array<i32>} : memref<8x2x32xf32, #tpu.memory_space<vmem>>, vector<1x2x32xf32>,
    %c5_i32 = arith.constant 5 : i32
    %485 = arith.index_cast %c5_i32 : i32 to index
    %c0_279 = arith.constant 0 : index
    %c0_280 = arith.constant 0 : index
    %486 = vector.load %arg1[%485, %c0_279, %c0_280] : memref<8x2x32xf32, #tpu.memory_space<vmem>>, vector<1x2x32xf32>
    %487 = vector.shape_cast %486 : vector<1x2x32xf32> to vector<2x32xf32>
    %488 = arith.index_cast %c5_i32 : i32 to index
    %c0_281 = arith.constant 0 : index
    %c0_282 = arith.constant 0 : index
    %489 = vector.load %arg2[%488, %c0_281, %c0_282] : memref<8x2x32xf32, #tpu.memory_space<vmem>>, vector<1x2x32xf32>
    %490 = vector.shape_cast %489 : vector<1x2x32xf32> to vector<2x32xf32>
    %491 = arith.index_cast %c5_i32 : i32 to index
    %c0_283 = arith.constant 0 : index
    %c0_284 = arith.constant 0 : index
    %492 = vector.load %arg3[%491, %c0_283, %c0_284] : memref<8x2x32xf32, #tpu.memory_space<vmem>>, vector<1x2x32xf32>
    %493 = vector.shape_cast %492 : vector<1x2x32xf32> to vector<2x32xf32>
    %c0_285 = arith.constant 0 : index
    %c0_286 = arith.constant 0 : index
    %c0_287 = arith.constant 0 : index
    %494 = vector.load %arg5[%c0_285, %c0_286, %c0_287] : memref<3x32x32xf32, #tpu.memory_space<vmem>>, vector<1x32x32xf32>
    %495 = vector.shape_cast %494 : vector<1x32x32xf32> to vector<32x32xf32>
    %cst_288 = arith.constant dense<0.000000e+00> : vector<2x32xf32>
    %496 = tpu.matmul %436, %495, %cst_288 {dimension_numbers = #tpu.dot_dimension_numbers<[1], [0], [0], [1], [0, 0, 1, 1], [], []>} : vector<2x32xf32>, vector<32x32xf32>, vector<2x32xf32> -> vector<2x32xf32>
    %497 = arith.addf %496, %3 : vector<2x32xf32>
    %c1_289 = arith.constant 1 : index
    %c0_290 = arith.constant 0 : index
    %c0_291 = arith.constant 0 : index
    %498 = vector.load %arg5[%c1_289, %c0_290, %c0_291] : memref<3x32x32xf32, #tpu.memory_space<vmem>>, vector<1x32x32xf32>
    %499 = vector.shape_cast %498 : vector<1x32x32xf32> to vector<32x32xf32>
    %cst_292 = arith.constant dense<0.000000e+00> : vector<2x32xf32>
    %500 = tpu.matmul %436, %499, %cst_292 {dimension_numbers = #tpu.dot_dimension_numbers<[1], [0], [0], [1], [0, 0, 1, 1], [], []>} : vector<2x32xf32>, vector<32x32xf32>, vector<2x32xf32> -> vector<2x32xf32>
    %501 = arith.addf %500, %7 : vector<2x32xf32>
    %c2_293 = arith.constant 2 : index
    %c0_294 = arith.constant 0 : index
    %c0_295 = arith.constant 0 : index
    %502 = vector.load %arg5[%c2_293, %c0_294, %c0_295] : memref<3x32x32xf32, #tpu.memory_space<vmem>>, vector<1x32x32xf32>
    %503 = vector.shape_cast %502 : vector<1x32x32xf32> to vector<32x32xf32>
    %cst_296 = arith.constant dense<0.000000e+00> : vector<2x32xf32>
    %504 = tpu.matmul %436, %503, %cst_296 {dimension_numbers = #tpu.dot_dimension_numbers<[1], [0], [0], [1], [0, 0, 1, 1], [], []>} : vector<2x32xf32>, vector<32x32xf32>, vector<2x32xf32> -> vector<2x32xf32>
    %505 = arith.addf %504, %11 : vector<2x32xf32>
    %506 = arith.addf %487, %497 : vector<2x32xf32>
    %507 = arith.negf %506 : vector<2x32xf32>
    %508 = math.exp %507 : vector<2x32xf32>
    %cst_297 = arith.constant 1.000000e+00 : f32
    %509 = vector.broadcast %cst_297 : f32 to vector<2x32xf32>
    %510 = arith.addf %509, %508 : vector<2x32xf32>
    %511 = arith.divf %509, %510 : vector<2x32xf32>
    %512 = arith.addf %490, %501 : vector<2x32xf32>
    %513 = arith.negf %512 : vector<2x32xf32>
    %514 = math.exp %513 : vector<2x32xf32>
    %cst_298 = arith.constant 1.000000e+00 : f32
    %515 = vector.broadcast %cst_298 : f32 to vector<2x32xf32>
    %516 = arith.addf %515, %514 : vector<2x32xf32>
    %517 = arith.divf %515, %516 : vector<2x32xf32>
    %518 = arith.mulf %511, %505 : vector<2x32xf32>
    %519 = arith.addf %493, %518 : vector<2x32xf32>
    %520 = math.tanh %519 : vector<2x32xf32>
    %cst_299 = arith.constant 1.000000e+00 : f32
    %521 = vector.broadcast %cst_299 : f32 to vector<2x32xf32>
    %522 = arith.subf %521, %517 : vector<2x32xf32>
    %523 = arith.mulf %522, %520 : vector<2x32xf32>
    %524 = arith.mulf %517, %436 : vector<2x32xf32>
    %525 = arith.addf %523, %524 : vector<2x32xf32>
    %c0_300 = arith.constant 0 : index
    %c0_301 = arith.constant 0 : index
    %c0_302 = arith.constant 0 : index
    %526 = vector.load %arg7[%c0_300, %c0_301, %c0_302] : memref<3x32x32xf32, #tpu.memory_space<vmem>>, vector<1x32x32xf32>
    %527 = vector.shape_cast %526 : vector<1x32x32xf32> to vector<32x32xf32>
    %cst_303 = arith.constant dense<0.000000e+00> : vector<2x32xf32>
    %528 = tpu.matmul %525, %527, %cst_303 {dimension_numbers = #tpu.dot_dimension_numbers<[1], [0], [0], [1], [0, 0, 1, 1], [], []>} : vector<2x32xf32>, vector<32x32xf32>, vector<2x32xf32> -> vector<2x32xf32>
    %529 = arith.addf %528, %15 : vector<2x32xf32>
    %c1_304 = arith.constant 1 : index
    %c0_305 = arith.constant 0 : index
    %c0_306 = arith.constant 0 : index
    %530 = vector.load %arg7[%c1_304, %c0_305, %c0_306] : memref<3x32x32xf32, #tpu.memory_space<vmem>>, vector<1x32x32xf32>
    %531 = vector.shape_cast %530 : vector<1x32x32xf32> to vector<32x32xf32>
    %cst_307 = arith.constant dense<0.000000e+00> : vector<2x32xf32>
    %532 = tpu.matmul %525, %531, %cst_307 {dimension_numbers = #tpu.dot_dimension_numbers<[1], [0], [0], [1], [0, 0, 1, 1], [], []>} : vector<2x32xf32>, vector<32x32xf32>, vector<2x32xf32> -> vector<2x32xf32>
    %533 = arith.addf %532, %19 : vector<2x32xf32>
    %c2_308 = arith.constant 2 : index
    %c0_309 = arith.constant 0 : index
    %c0_310 = arith.constant 0 : index
    %534 = vector.load %arg7[%c2_308, %c0_309, %c0_310] : memref<3x32x32xf32, #tpu.memory_space<vmem>>, vector<1x32x32xf32>
    %535 = vector.shape_cast %534 : vector<1x32x32xf32> to vector<32x32xf32>
    %cst_311 = arith.constant dense<0.000000e+00> : vector<2x32xf32>
    %536 = tpu.matmul %525, %535, %cst_311 {dimension_numbers = #tpu.dot_dimension_numbers<[1], [0], [0], [1], [0, 0, 1, 1], [], []>} : vector<2x32xf32>, vector<32x32xf32>, vector<2x32xf32> -> vector<2x32xf32>
    %537 = arith.addf %536, %23 : vector<2x32xf32>
    %c0_312 = arith.constant 0 : index
    %c0_313 = arith.constant 0 : index
    %c0_314 = arith.constant 0 : index
    %538 = vector.load %arg9[%c0_312, %c0_313, %c0_314] : memref<3x32x32xf32, #tpu.memory_space<vmem>>, vector<1x32x32xf32>
    %539 = vector.shape_cast %538 : vector<1x32x32xf32> to vector<32x32xf32>
    %cst_315 = arith.constant dense<0.000000e+00> : vector<2x32xf32>
    %540 = tpu.matmul %480, %539, %cst_315 {dimension_numbers = #tpu.dot_dimension_numbers<[1], [0], [0], [1], [0, 0, 1, 1], [], []>} : vector<2x32xf32>, vector<32x32xf32>, vector<2x32xf32> -> vector<2x32xf32>
    %541 = arith.addf %540, %27 : vector<2x32xf32>
    %c1_316 = arith.constant 1 : index
    %c0_317 = arith.constant 0 : index
    %c0_318 = arith.constant 0 : index
    %542 = vector.load %arg9[%c1_316, %c0_317, %c0_318] : memref<3x32x32xf32, #tpu.memory_space<vmem>>, vector<1x32x32xf32>
    %543 = vector.shape_cast %542 : vector<1x32x32xf32> to vector<32x32xf32>
    %cst_319 = arith.constant dense<0.000000e+00> : vector<2x32xf32>
    %544 = tpu.matmul %480, %543, %cst_319 {dimension_numbers = #tpu.dot_dimension_numbers<[1], [0], [0], [1], [0, 0, 1, 1], [], []>} : vector<2x32xf32>, vector<32x32xf32>, vector<2x32xf32> -> vector<2x32xf32>
    %545 = arith.addf %544, %31 : vector<2x32xf32>
    %c2_320 = arith.constant 2 : index
    %c0_321 = arith.constant 0 : index
    %c0_322 = arith.constant 0 : index
    %546 = vector.load %arg9[%c2_320, %c0_321, %c0_322] : memref<3x32x32xf32, #tpu.memory_space<vmem>>, vector<1x32x32xf32>
    %547 = vector.shape_cast %546 : vector<1x32x32xf32> to vector<32x32xf32>
    %cst_323 = arith.constant dense<0.000000e+00> : vector<2x32xf32>
    %548 = tpu.matmul %480, %547, %cst_323 {dimension_numbers = #tpu.dot_dimension_numbers<[1], [0], [0], [1], [0, 0, 1, 1], [], []>} : vector<2x32xf32>, vector<32x32xf32>, vector<2x32xf32> -> vector<2x32xf32>
    %549 = arith.addf %548, %35 : vector<2x32xf32>
    %550 = arith.addf %529, %541 : vector<2x32xf32>
    %551 = arith.negf %550 : vector<2x32xf32>
    %552 = math.exp %551 : vector<2x32xf32>
    %cst_324 = arith.constant 1.000000e+00 : f32
    %553 = vector.broadcast %cst_324 : f32 to vector<2x32xf32>
    %554 = arith.addf %553, %552 : vector<2x32xf32>
    %555 = arith.divf %553, %554 : vector<2x32xf32>
    %556 = arith.addf %533, %545 : vector<2x32xf32>
    %557 = arith.negf %556 : vector<2x32xf32>
    %558 = math.exp %557 : vector<2x32xf32>
    %cst_325 = arith.constant 1.000000e+00 : f32
    %559 = vector.broadcast %cst_325 : f32 to vector<2x32xf32>
    %560 = arith.addf %559, %558 : vector<2x32xf32>
    %561 = arith.divf %559, %560 : vector<2x32xf32>
    %562 = arith.mulf %555, %549 : vector<2x32xf32>
    %563 = arith.addf %537, %562 : vector<2x32xf32>
    %564 = math.tanh %563 : vector<2x32xf32>
    %cst_326 = arith.constant 1.000000e+00 : f32
    %565 = vector.broadcast %cst_326 : f32 to vector<2x32xf32>
    %566 = arith.subf %565, %561 : vector<2x32xf32>
    %567 = arith.mulf %566, %564 : vector<2x32xf32>
    %568 = arith.mulf %561, %480 : vector<2x32xf32>
    %569 = arith.addf %567, %568 : vector<2x32xf32>
    %570 = arith.index_cast %c5_i32 : i32 to index
    %c0_327 = arith.constant 0 : index
    %c0_328 = arith.constant 0 : index
    %571 = vector.load %arg11[%570, %c0_327, %c0_328] : memref<8x2x32xf32, #tpu.memory_space<vmem>>, vector<1x2x32xf32>
    %572 = vector.shape_cast %571 : vector<1x2x32xf32> to vector<2x32xf32>
    %573 = vector.shape_cast %569 : vector<2x32xf32> to vector<1x2x32xf32>
    tpu.vector_store %arg11[%570, %c0_327, %c0_328], %573 {strides = array<i32>} : memref<8x2x32xf32, #tpu.memory_space<vmem>>, vector<1x2x32xf32>,
    %c6_i32 = arith.constant 6 : i32
    %574 = arith.index_cast %c6_i32 : i32 to index
    %c0_329 = arith.constant 0 : index
    %c0_330 = arith.constant 0 : index
    %575 = vector.load %arg1[%574, %c0_329, %c0_330] : memref<8x2x32xf32, #tpu.memory_space<vmem>>, vector<1x2x32xf32>
    %576 = vector.shape_cast %575 : vector<1x2x32xf32> to vector<2x32xf32>
    %577 = arith.index_cast %c6_i32 : i32 to index
    %c0_331 = arith.constant 0 : index
    %c0_332 = arith.constant 0 : index
    %578 = vector.load %arg2[%577, %c0_331, %c0_332] : memref<8x2x32xf32, #tpu.memory_space<vmem>>, vector<1x2x32xf32>
    %579 = vector.shape_cast %578 : vector<1x2x32xf32> to vector<2x32xf32>
    %580 = arith.index_cast %c6_i32 : i32 to index
    %c0_333 = arith.constant 0 : index
    %c0_334 = arith.constant 0 : index
    %581 = vector.load %arg3[%580, %c0_333, %c0_334] : memref<8x2x32xf32, #tpu.memory_space<vmem>>, vector<1x2x32xf32>
    %582 = vector.shape_cast %581 : vector<1x2x32xf32> to vector<2x32xf32>
    %c0_335 = arith.constant 0 : index
    %c0_336 = arith.constant 0 : index
    %c0_337 = arith.constant 0 : index
    %583 = vector.load %arg5[%c0_335, %c0_336, %c0_337] : memref<3x32x32xf32, #tpu.memory_space<vmem>>, vector<1x32x32xf32>
    %584 = vector.shape_cast %583 : vector<1x32x32xf32> to vector<32x32xf32>
    %cst_338 = arith.constant dense<0.000000e+00> : vector<2x32xf32>
    %585 = tpu.matmul %525, %584, %cst_338 {dimension_numbers = #tpu.dot_dimension_numbers<[1], [0], [0], [1], [0, 0, 1, 1], [], []>} : vector<2x32xf32>, vector<32x32xf32>, vector<2x32xf32> -> vector<2x32xf32>
    %586 = arith.addf %585, %3 : vector<2x32xf32>
    %c1_339 = arith.constant 1 : index
    %c0_340 = arith.constant 0 : index
    %c0_341 = arith.constant 0 : index
    %587 = vector.load %arg5[%c1_339, %c0_340, %c0_341] : memref<3x32x32xf32, #tpu.memory_space<vmem>>, vector<1x32x32xf32>
    %588 = vector.shape_cast %587 : vector<1x32x32xf32> to vector<32x32xf32>
    %cst_342 = arith.constant dense<0.000000e+00> : vector<2x32xf32>
    %589 = tpu.matmul %525, %588, %cst_342 {dimension_numbers = #tpu.dot_dimension_numbers<[1], [0], [0], [1], [0, 0, 1, 1], [], []>} : vector<2x32xf32>, vector<32x32xf32>, vector<2x32xf32> -> vector<2x32xf32>
    %590 = arith.addf %589, %7 : vector<2x32xf32>
    %c2_343 = arith.constant 2 : index
    %c0_344 = arith.constant 0 : index
    %c0_345 = arith.constant 0 : index
    %591 = vector.load %arg5[%c2_343, %c0_344, %c0_345] : memref<3x32x32xf32, #tpu.memory_space<vmem>>, vector<1x32x32xf32>
    %592 = vector.shape_cast %591 : vector<1x32x32xf32> to vector<32x32xf32>
    %cst_346 = arith.constant dense<0.000000e+00> : vector<2x32xf32>
    %593 = tpu.matmul %525, %592, %cst_346 {dimension_numbers = #tpu.dot_dimension_numbers<[1], [0], [0], [1], [0, 0, 1, 1], [], []>} : vector<2x32xf32>, vector<32x32xf32>, vector<2x32xf32> -> vector<2x32xf32>
    %594 = arith.addf %593, %11 : vector<2x32xf32>
    %595 = arith.addf %576, %586 : vector<2x32xf32>
    %596 = arith.negf %595 : vector<2x32xf32>
    %597 = math.exp %596 : vector<2x32xf32>
    %cst_347 = arith.constant 1.000000e+00 : f32
    %598 = vector.broadcast %cst_347 : f32 to vector<2x32xf32>
    %599 = arith.addf %598, %597 : vector<2x32xf32>
    %600 = arith.divf %598, %599 : vector<2x32xf32>
    %601 = arith.addf %579, %590 : vector<2x32xf32>
    %602 = arith.negf %601 : vector<2x32xf32>
    %603 = math.exp %602 : vector<2x32xf32>
    %cst_348 = arith.constant 1.000000e+00 : f32
    %604 = vector.broadcast %cst_348 : f32 to vector<2x32xf32>
    %605 = arith.addf %604, %603 : vector<2x32xf32>
    %606 = arith.divf %604, %605 : vector<2x32xf32>
    %607 = arith.mulf %600, %594 : vector<2x32xf32>
    %608 = arith.addf %582, %607 : vector<2x32xf32>
    %609 = math.tanh %608 : vector<2x32xf32>
    %cst_349 = arith.constant 1.000000e+00 : f32
    %610 = vector.broadcast %cst_349 : f32 to vector<2x32xf32>
    %611 = arith.subf %610, %606 : vector<2x32xf32>
    %612 = arith.mulf %611, %609 : vector<2x32xf32>
    %613 = arith.mulf %606, %525 : vector<2x32xf32>
    %614 = arith.addf %612, %613 : vector<2x32xf32>
    %c0_350 = arith.constant 0 : index
    %c0_351 = arith.constant 0 : index
    %c0_352 = arith.constant 0 : index
    %615 = vector.load %arg7[%c0_350, %c0_351, %c0_352] : memref<3x32x32xf32, #tpu.memory_space<vmem>>, vector<1x32x32xf32>
    %616 = vector.shape_cast %615 : vector<1x32x32xf32> to vector<32x32xf32>
    %cst_353 = arith.constant dense<0.000000e+00> : vector<2x32xf32>
    %617 = tpu.matmul %614, %616, %cst_353 {dimension_numbers = #tpu.dot_dimension_numbers<[1], [0], [0], [1], [0, 0, 1, 1], [], []>} : vector<2x32xf32>, vector<32x32xf32>, vector<2x32xf32> -> vector<2x32xf32>
    %618 = arith.addf %617, %15 : vector<2x32xf32>
    %c1_354 = arith.constant 1 : index
    %c0_355 = arith.constant 0 : index
    %c0_356 = arith.constant 0 : index
    %619 = vector.load %arg7[%c1_354, %c0_355, %c0_356] : memref<3x32x32xf32, #tpu.memory_space<vmem>>, vector<1x32x32xf32>
    %620 = vector.shape_cast %619 : vector<1x32x32xf32> to vector<32x32xf32>
    %cst_357 = arith.constant dense<0.000000e+00> : vector<2x32xf32>
    %621 = tpu.matmul %614, %620, %cst_357 {dimension_numbers = #tpu.dot_dimension_numbers<[1], [0], [0], [1], [0, 0, 1, 1], [], []>} : vector<2x32xf32>, vector<32x32xf32>, vector<2x32xf32> -> vector<2x32xf32>
    %622 = arith.addf %621, %19 : vector<2x32xf32>
    %c2_358 = arith.constant 2 : index
    %c0_359 = arith.constant 0 : index
    %c0_360 = arith.constant 0 : index
    %623 = vector.load %arg7[%c2_358, %c0_359, %c0_360] : memref<3x32x32xf32, #tpu.memory_space<vmem>>, vector<1x32x32xf32>
    %624 = vector.shape_cast %623 : vector<1x32x32xf32> to vector<32x32xf32>
    %cst_361 = arith.constant dense<0.000000e+00> : vector<2x32xf32>
    %625 = tpu.matmul %614, %624, %cst_361 {dimension_numbers = #tpu.dot_dimension_numbers<[1], [0], [0], [1], [0, 0, 1, 1], [], []>} : vector<2x32xf32>, vector<32x32xf32>, vector<2x32xf32> -> vector<2x32xf32>
    %626 = arith.addf %625, %23 : vector<2x32xf32>
    %c0_362 = arith.constant 0 : index
    %c0_363 = arith.constant 0 : index
    %c0_364 = arith.constant 0 : index
    %627 = vector.load %arg9[%c0_362, %c0_363, %c0_364] : memref<3x32x32xf32, #tpu.memory_space<vmem>>, vector<1x32x32xf32>
    %628 = vector.shape_cast %627 : vector<1x32x32xf32> to vector<32x32xf32>
    %cst_365 = arith.constant dense<0.000000e+00> : vector<2x32xf32>
    %629 = tpu.matmul %569, %628, %cst_365 {dimension_numbers = #tpu.dot_dimension_numbers<[1], [0], [0], [1], [0, 0, 1, 1], [], []>} : vector<2x32xf32>, vector<32x32xf32>, vector<2x32xf32> -> vector<2x32xf32>
    %630 = arith.addf %629, %27 : vector<2x32xf32>
    %c1_366 = arith.constant 1 : index
    %c0_367 = arith.constant 0 : index
    %c0_368 = arith.constant 0 : index
    %631 = vector.load %arg9[%c1_366, %c0_367, %c0_368] : memref<3x32x32xf32, #tpu.memory_space<vmem>>, vector<1x32x32xf32>
    %632 = vector.shape_cast %631 : vector<1x32x32xf32> to vector<32x32xf32>
    %cst_369 = arith.constant dense<0.000000e+00> : vector<2x32xf32>
    %633 = tpu.matmul %569, %632, %cst_369 {dimension_numbers = #tpu.dot_dimension_numbers<[1], [0], [0], [1], [0, 0, 1, 1], [], []>} : vector<2x32xf32>, vector<32x32xf32>, vector<2x32xf32> -> vector<2x32xf32>
    %634 = arith.addf %633, %31 : vector<2x32xf32>
    %c2_370 = arith.constant 2 : index
    %c0_371 = arith.constant 0 : index
    %c0_372 = arith.constant 0 : index
    %635 = vector.load %arg9[%c2_370, %c0_371, %c0_372] : memref<3x32x32xf32, #tpu.memory_space<vmem>>, vector<1x32x32xf32>
    %636 = vector.shape_cast %635 : vector<1x32x32xf32> to vector<32x32xf32>
    %cst_373 = arith.constant dense<0.000000e+00> : vector<2x32xf32>
    %637 = tpu.matmul %569, %636, %cst_373 {dimension_numbers = #tpu.dot_dimension_numbers<[1], [0], [0], [1], [0, 0, 1, 1], [], []>} : vector<2x32xf32>, vector<32x32xf32>, vector<2x32xf32> -> vector<2x32xf32>
    %638 = arith.addf %637, %35 : vector<2x32xf32>
    %639 = arith.addf %618, %630 : vector<2x32xf32>
    %640 = arith.negf %639 : vector<2x32xf32>
    %641 = math.exp %640 : vector<2x32xf32>
    %cst_374 = arith.constant 1.000000e+00 : f32
    %642 = vector.broadcast %cst_374 : f32 to vector<2x32xf32>
    %643 = arith.addf %642, %641 : vector<2x32xf32>
    %644 = arith.divf %642, %643 : vector<2x32xf32>
    %645 = arith.addf %622, %634 : vector<2x32xf32>
    %646 = arith.negf %645 : vector<2x32xf32>
    %647 = math.exp %646 : vector<2x32xf32>
    %cst_375 = arith.constant 1.000000e+00 : f32
    %648 = vector.broadcast %cst_375 : f32 to vector<2x32xf32>
    %649 = arith.addf %648, %647 : vector<2x32xf32>
    %650 = arith.divf %648, %649 : vector<2x32xf32>
    %651 = arith.mulf %644, %638 : vector<2x32xf32>
    %652 = arith.addf %626, %651 : vector<2x32xf32>
    %653 = math.tanh %652 : vector<2x32xf32>
    %cst_376 = arith.constant 1.000000e+00 : f32
    %654 = vector.broadcast %cst_376 : f32 to vector<2x32xf32>
    %655 = arith.subf %654, %650 : vector<2x32xf32>
    %656 = arith.mulf %655, %653 : vector<2x32xf32>
    %657 = arith.mulf %650, %569 : vector<2x32xf32>
    %658 = arith.addf %656, %657 : vector<2x32xf32>
    %659 = arith.index_cast %c6_i32 : i32 to index
    %c0_377 = arith.constant 0 : index
    %c0_378 = arith.constant 0 : index
    %660 = vector.load %arg11[%659, %c0_377, %c0_378] : memref<8x2x32xf32, #tpu.memory_space<vmem>>, vector<1x2x32xf32>
    %661 = vector.shape_cast %660 : vector<1x2x32xf32> to vector<2x32xf32>
    %662 = vector.shape_cast %658 : vector<2x32xf32> to vector<1x2x32xf32>
    tpu.vector_store %arg11[%659, %c0_377, %c0_378], %662 {strides = array<i32>} : memref<8x2x32xf32, #tpu.memory_space<vmem>>, vector<1x2x32xf32>,
    %c7_i32 = arith.constant 7 : i32
    %663 = arith.index_cast %c7_i32 : i32 to index
    %c0_379 = arith.constant 0 : index
    %c0_380 = arith.constant 0 : index
    %664 = vector.load %arg1[%663, %c0_379, %c0_380] : memref<8x2x32xf32, #tpu.memory_space<vmem>>, vector<1x2x32xf32>
    %665 = vector.shape_cast %664 : vector<1x2x32xf32> to vector<2x32xf32>
    %666 = arith.index_cast %c7_i32 : i32 to index
    %c0_381 = arith.constant 0 : index
    %c0_382 = arith.constant 0 : index
    %667 = vector.load %arg2[%666, %c0_381, %c0_382] : memref<8x2x32xf32, #tpu.memory_space<vmem>>, vector<1x2x32xf32>
    %668 = vector.shape_cast %667 : vector<1x2x32xf32> to vector<2x32xf32>
    %669 = arith.index_cast %c7_i32 : i32 to index
    %c0_383 = arith.constant 0 : index
    %c0_384 = arith.constant 0 : index
    %670 = vector.load %arg3[%669, %c0_383, %c0_384] : memref<8x2x32xf32, #tpu.memory_space<vmem>>, vector<1x2x32xf32>
    %671 = vector.shape_cast %670 : vector<1x2x32xf32> to vector<2x32xf32>
    %c0_385 = arith.constant 0 : index
    %c0_386 = arith.constant 0 : index
    %c0_387 = arith.constant 0 : index
    %672 = vector.load %arg5[%c0_385, %c0_386, %c0_387] : memref<3x32x32xf32, #tpu.memory_space<vmem>>, vector<1x32x32xf32>
    %673 = vector.shape_cast %672 : vector<1x32x32xf32> to vector<32x32xf32>
    %cst_388 = arith.constant dense<0.000000e+00> : vector<2x32xf32>
    %674 = tpu.matmul %614, %673, %cst_388 {dimension_numbers = #tpu.dot_dimension_numbers<[1], [0], [0], [1], [0, 0, 1, 1], [], []>} : vector<2x32xf32>, vector<32x32xf32>, vector<2x32xf32> -> vector<2x32xf32>
    %675 = arith.addf %674, %3 : vector<2x32xf32>
    %c1_389 = arith.constant 1 : index
    %c0_390 = arith.constant 0 : index
    %c0_391 = arith.constant 0 : index
    %676 = vector.load %arg5[%c1_389, %c0_390, %c0_391] : memref<3x32x32xf32, #tpu.memory_space<vmem>>, vector<1x32x32xf32>
    %677 = vector.shape_cast %676 : vector<1x32x32xf32> to vector<32x32xf32>
    %cst_392 = arith.constant dense<0.000000e+00> : vector<2x32xf32>
    %678 = tpu.matmul %614, %677, %cst_392 {dimension_numbers = #tpu.dot_dimension_numbers<[1], [0], [0], [1], [0, 0, 1, 1], [], []>} : vector<2x32xf32>, vector<32x32xf32>, vector<2x32xf32> -> vector<2x32xf32>
    %679 = arith.addf %678, %7 : vector<2x32xf32>
    %c2_393 = arith.constant 2 : index
    %c0_394 = arith.constant 0 : index
    %c0_395 = arith.constant 0 : index
    %680 = vector.load %arg5[%c2_393, %c0_394, %c0_395] : memref<3x32x32xf32, #tpu.memory_space<vmem>>, vector<1x32x32xf32>
    %681 = vector.shape_cast %680 : vector<1x32x32xf32> to vector<32x32xf32>
    %cst_396 = arith.constant dense<0.000000e+00> : vector<2x32xf32>
    %682 = tpu.matmul %614, %681, %cst_396 {dimension_numbers = #tpu.dot_dimension_numbers<[1], [0], [0], [1], [0, 0, 1, 1], [], []>} : vector<2x32xf32>, vector<32x32xf32>, vector<2x32xf32> -> vector<2x32xf32>
    %683 = arith.addf %682, %11 : vector<2x32xf32>
    %684 = arith.addf %665, %675 : vector<2x32xf32>
    %685 = arith.negf %684 : vector<2x32xf32>
    %686 = math.exp %685 : vector<2x32xf32>
    %cst_397 = arith.constant 1.000000e+00 : f32
    %687 = vector.broadcast %cst_397 : f32 to vector<2x32xf32>
    %688 = arith.addf %687, %686 : vector<2x32xf32>
    %689 = arith.divf %687, %688 : vector<2x32xf32>
    %690 = arith.addf %668, %679 : vector<2x32xf32>
    %691 = arith.negf %690 : vector<2x32xf32>
    %692 = math.exp %691 : vector<2x32xf32>
    %cst_398 = arith.constant 1.000000e+00 : f32
    %693 = vector.broadcast %cst_398 : f32 to vector<2x32xf32>
    %694 = arith.addf %693, %692 : vector<2x32xf32>
    %695 = arith.divf %693, %694 : vector<2x32xf32>
    %696 = arith.mulf %689, %683 : vector<2x32xf32>
    %697 = arith.addf %671, %696 : vector<2x32xf32>
    %698 = math.tanh %697 : vector<2x32xf32>
    %cst_399 = arith.constant 1.000000e+00 : f32
    %699 = vector.broadcast %cst_399 : f32 to vector<2x32xf32>
    %700 = arith.subf %699, %695 : vector<2x32xf32>
    %701 = arith.mulf %700, %698 : vector<2x32xf32>
    %702 = arith.mulf %695, %614 : vector<2x32xf32>
    %703 = arith.addf %701, %702 : vector<2x32xf32>
    %c0_400 = arith.constant 0 : index
    %c0_401 = arith.constant 0 : index
    %c0_402 = arith.constant 0 : index
    %704 = vector.load %arg7[%c0_400, %c0_401, %c0_402] : memref<3x32x32xf32, #tpu.memory_space<vmem>>, vector<1x32x32xf32>
    %705 = vector.shape_cast %704 : vector<1x32x32xf32> to vector<32x32xf32>
    %cst_403 = arith.constant dense<0.000000e+00> : vector<2x32xf32>
    %706 = tpu.matmul %703, %705, %cst_403 {dimension_numbers = #tpu.dot_dimension_numbers<[1], [0], [0], [1], [0, 0, 1, 1], [], []>} : vector<2x32xf32>, vector<32x32xf32>, vector<2x32xf32> -> vector<2x32xf32>
    %707 = arith.addf %706, %15 : vector<2x32xf32>
    %c1_404 = arith.constant 1 : index
    %c0_405 = arith.constant 0 : index
    %c0_406 = arith.constant 0 : index
    %708 = vector.load %arg7[%c1_404, %c0_405, %c0_406] : memref<3x32x32xf32, #tpu.memory_space<vmem>>, vector<1x32x32xf32>
    %709 = vector.shape_cast %708 : vector<1x32x32xf32> to vector<32x32xf32>
    %cst_407 = arith.constant dense<0.000000e+00> : vector<2x32xf32>
    %710 = tpu.matmul %703, %709, %cst_407 {dimension_numbers = #tpu.dot_dimension_numbers<[1], [0], [0], [1], [0, 0, 1, 1], [], []>} : vector<2x32xf32>, vector<32x32xf32>, vector<2x32xf32> -> vector<2x32xf32>
    %711 = arith.addf %710, %19 : vector<2x32xf32>
    %c2_408 = arith.constant 2 : index
    %c0_409 = arith.constant 0 : index
    %c0_410 = arith.constant 0 : index
    %712 = vector.load %arg7[%c2_408, %c0_409, %c0_410] : memref<3x32x32xf32, #tpu.memory_space<vmem>>, vector<1x32x32xf32>
    %713 = vector.shape_cast %712 : vector<1x32x32xf32> to vector<32x32xf32>
    %cst_411 = arith.constant dense<0.000000e+00> : vector<2x32xf32>
    %714 = tpu.matmul %703, %713, %cst_411 {dimension_numbers = #tpu.dot_dimension_numbers<[1], [0], [0], [1], [0, 0, 1, 1], [], []>} : vector<2x32xf32>, vector<32x32xf32>, vector<2x32xf32> -> vector<2x32xf32>
    %715 = arith.addf %714, %23 : vector<2x32xf32>
    %c0_412 = arith.constant 0 : index
    %c0_413 = arith.constant 0 : index
    %c0_414 = arith.constant 0 : index
    %716 = vector.load %arg9[%c0_412, %c0_413, %c0_414] : memref<3x32x32xf32, #tpu.memory_space<vmem>>, vector<1x32x32xf32>
    %717 = vector.shape_cast %716 : vector<1x32x32xf32> to vector<32x32xf32>
    %cst_415 = arith.constant dense<0.000000e+00> : vector<2x32xf32>
    %718 = tpu.matmul %658, %717, %cst_415 {dimension_numbers = #tpu.dot_dimension_numbers<[1], [0], [0], [1], [0, 0, 1, 1], [], []>} : vector<2x32xf32>, vector<32x32xf32>, vector<2x32xf32> -> vector<2x32xf32>
    %719 = arith.addf %718, %27 : vector<2x32xf32>
    %c1_416 = arith.constant 1 : index
    %c0_417 = arith.constant 0 : index
    %c0_418 = arith.constant 0 : index
    %720 = vector.load %arg9[%c1_416, %c0_417, %c0_418] : memref<3x32x32xf32, #tpu.memory_space<vmem>>, vector<1x32x32xf32>
    %721 = vector.shape_cast %720 : vector<1x32x32xf32> to vector<32x32xf32>
    %cst_419 = arith.constant dense<0.000000e+00> : vector<2x32xf32>
    %722 = tpu.matmul %658, %721, %cst_419 {dimension_numbers = #tpu.dot_dimension_numbers<[1], [0], [0], [1], [0, 0, 1, 1], [], []>} : vector<2x32xf32>, vector<32x32xf32>, vector<2x32xf32> -> vector<2x32xf32>
    %723 = arith.addf %722, %31 : vector<2x32xf32>
    %c2_420 = arith.constant 2 : index
    %c0_421 = arith.constant 0 : index
    %c0_422 = arith.constant 0 : index
    %724 = vector.load %arg9[%c2_420, %c0_421, %c0_422] : memref<3x32x32xf32, #tpu.memory_space<vmem>>, vector<1x32x32xf32>
    %725 = vector.shape_cast %724 : vector<1x32x32xf32> to vector<32x32xf32>
    %cst_423 = arith.constant dense<0.000000e+00> : vector<2x32xf32>
    %726 = tpu.matmul %658, %725, %cst_423 {dimension_numbers = #tpu.dot_dimension_numbers<[1], [0], [0], [1], [0, 0, 1, 1], [], []>} : vector<2x32xf32>, vector<32x32xf32>, vector<2x32xf32> -> vector<2x32xf32>
    %727 = arith.addf %726, %35 : vector<2x32xf32>
    %728 = arith.addf %707, %719 : vector<2x32xf32>
    %729 = arith.negf %728 : vector<2x32xf32>
    %730 = math.exp %729 : vector<2x32xf32>
    %cst_424 = arith.constant 1.000000e+00 : f32
    %731 = vector.broadcast %cst_424 : f32 to vector<2x32xf32>
    %732 = arith.addf %731, %730 : vector<2x32xf32>
    %733 = arith.divf %731, %732 : vector<2x32xf32>
    %734 = arith.addf %711, %723 : vector<2x32xf32>
    %735 = arith.negf %734 : vector<2x32xf32>
    %736 = math.exp %735 : vector<2x32xf32>
    %cst_425 = arith.constant 1.000000e+00 : f32
    %737 = vector.broadcast %cst_425 : f32 to vector<2x32xf32>
    %738 = arith.addf %737, %736 : vector<2x32xf32>
    %739 = arith.divf %737, %738 : vector<2x32xf32>
    %740 = arith.mulf %733, %727 : vector<2x32xf32>
    %741 = arith.addf %715, %740 : vector<2x32xf32>
    %742 = math.tanh %741 : vector<2x32xf32>
    %cst_426 = arith.constant 1.000000e+00 : f32
    %743 = vector.broadcast %cst_426 : f32 to vector<2x32xf32>
    %744 = arith.subf %743, %739 : vector<2x32xf32>
    %745 = arith.mulf %744, %742 : vector<2x32xf32>
    %746 = arith.mulf %739, %658 : vector<2x32xf32>
    %747 = arith.addf %745, %746 : vector<2x32xf32>
    %748 = arith.index_cast %c7_i32 : i32 to index
    %c0_427 = arith.constant 0 : index
    %c0_428 = arith.constant 0 : index
    %749 = vector.load %arg11[%748, %c0_427, %c0_428] : memref<8x2x32xf32, #tpu.memory_space<vmem>>, vector<1x2x32xf32>
    %750 = vector.shape_cast %749 : vector<1x2x32xf32> to vector<2x32xf32>
    %751 = vector.shape_cast %747 : vector<2x32xf32> to vector<1x2x32xf32>
    tpu.vector_store %arg11[%748, %c0_427, %c0_428], %751 {strides = array<i32>} : memref<8x2x32xf32, #tpu.memory_space<vmem>>, vector<1x2x32xf32>,
    %c8_i32 = arith.constant 8 : i32
    %c0_429 = arith.constant 0 : index
    %c0_430 = arith.constant 0 : index
    %c0_431 = arith.constant 0 : index
    %752 = vector.load %arg12[%c0_429, %c0_430, %c0_431] : memref<2x2x32xf32, #tpu.memory_space<vmem>>, vector<1x2x32xf32>
    %753 = vector.shape_cast %752 : vector<1x2x32xf32> to vector<2x32xf32>
    %754 = vector.shape_cast %703 : vector<2x32xf32> to vector<1x2x32xf32>
    tpu.vector_store %arg12[%c0_429, %c0_430, %c0_431], %754 {strides = array<i32>} : memref<2x2x32xf32, #tpu.memory_space<vmem>>, vector<1x2x32xf32>,
    %c1_432 = arith.constant 1 : index
    %c0_433 = arith.constant 0 : index
    %c0_434 = arith.constant 0 : index
    %755 = vector.load %arg12[%c1_432, %c0_433, %c0_434] : memref<2x2x32xf32, #tpu.memory_space<vmem>>, vector<1x2x32xf32>
    %756 = vector.shape_cast %755 : vector<1x2x32xf32> to vector<2x32xf32>
    %757 = vector.shape_cast %747 : vector<2x32xf32> to vector<1x2x32xf32>
    tpu.vector_store %arg12[%c1_432, %c0_433, %c0_434], %757 {strides = array<i32>} : memref<2x2x32xf32, #tpu.memory_space<vmem>>, vector<1x2x32xf32>,
    return
  }
  func.func @transform_0(%arg0: i32) -> (i32, i32, i32) {
    %c0_i32 = arith.constant 0 : i32
    %c0_i32_0 = arith.constant 0 : i32
    %c0_i32_1 = arith.constant 0 : i32
    %c0_i32_2 = arith.constant 0 : i32
    return %c0_i32, %c0_i32_0, %c0_i32_1 : i32, i32, i32
  }
  func.func @transform_1(%arg0: i32) -> (i32, i32, i32) {
    %c0_i32 = arith.constant 0 : i32
    %c0_i32_0 = arith.constant 0 : i32
    %c0_i32_1 = arith.constant 0 : i32
    %c0_i32_2 = arith.constant 0 : i32
    return %c0_i32, %c0_i32_0, %c0_i32_1 : i32, i32, i32
  }
  func.func @transform_2(%arg0: i32) -> (i32, i32, i32) {
    %c0_i32 = arith.constant 0 : i32
    %c0_i32_0 = arith.constant 0 : i32
    %c0_i32_1 = arith.constant 0 : i32
    %c0_i32_2 = arith.constant 0 : i32
    return %c0_i32, %c0_i32_0, %c0_i32_1 : i32, i32, i32
  }
  func.func @transform_3(%arg0: i32) -> (i32, i32, i32) {
    %c0_i32 = arith.constant 0 : i32
    %c0_i32_0 = arith.constant 0 : i32
    %c0_i32_1 = arith.constant 0 : i32
    %c0_i32_2 = arith.constant 0 : i32
    return %c0_i32, %c0_i32_0, %c0_i32_1 : i32, i32, i32
  }
  func.func @transform_4(%arg0: i32) -> (i32, i32, i32) {
    %c0_i32 = arith.constant 0 : i32
    %c0_i32_0 = arith.constant 0 : i32
    %c0_i32_1 = arith.constant 0 : i32
    %c0_i32_2 = arith.constant 0 : i32
    return %c0_i32, %c0_i32_0, %c0_i32_1 : i32, i32, i32
  }
  func.func @transform_5(%arg0: i32) -> (i32, i32, i32) {
    %c0_i32 = arith.constant 0 : i32
    %c0_i32_0 = arith.constant 0 : i32
    %c0_i32_1 = arith.constant 0 : i32
    %c0_i32_2 = arith.constant 0 : i32
    return %c0_i32, %c0_i32_0, %c0_i32_1 : i32, i32, i32
  }
  func.func @transform_6(%arg0: i32) -> (i32, i32, i32) {
    %c0_i32 = arith.constant 0 : i32
    %c0_i32_0 = arith.constant 0 : i32
    %c0_i32_1 = arith.constant 0 : i32
    %c0_i32_2 = arith.constant 0 : i32
    return %c0_i32, %c0_i32_0, %c0_i32_1 : i32, i32, i32
  }
  func.func @transform_7(%arg0: i32) -> (i32, i32, i32) {
    %c0_i32 = arith.constant 0 : i32
    %c0_i32_0 = arith.constant 0 : i32
    %c0_i32_1 = arith.constant 0 : i32
    %c0_i32_2 = arith.constant 0 : i32
    return %c0_i32, %c0_i32_0, %c0_i32_1 : i32, i32, i32
  }
  func.func @transform_8(%arg0: i32) -> (i32, i32, i32) {
    %c0_i32 = arith.constant 0 : i32
    %c0_i32_0 = arith.constant 0 : i32
    %c0_i32_1 = arith.constant 0 : i32
    %c0_i32_2 = arith.constant 0 : i32
    return %c0_i32, %c0_i32_0, %c0_i32_1 : i32, i32, i32
  }
  func.func @transform_9(%arg0: i32) -> (i32, i32, i32) {
    %c0_i32 = arith.constant 0 : i32
    %c0_i32_0 = arith.constant 0 : i32
    %c0_i32_1 = arith.constant 0 : i32
    %c0_i32_2 = arith.constant 0 : i32
    return %c0_i32, %c0_i32_0, %c0_i32_1 : i32, i32, i32
  }
  func.func @transform_10(%arg0: i32) -> (i32, i32, i32) {
    %c0_i32 = arith.constant 0 : i32
    %c0_i32_0 = arith.constant 0 : i32
    %c0_i32_1 = arith.constant 0 : i32
    %c0_i32_2 = arith.constant 0 : i32
    return %c0_i32, %c0_i32_0, %c0_i32_1 : i32, i32, i32
  }
  func.func @transform_11(%arg0: i32) -> (i32, i32, i32) {
    %c0_i32 = arith.constant 0 : i32
    %c0_i32_0 = arith.constant 0 : i32
    %c0_i32_1 = arith.constant 0 : i32
    %c0_i32_2 = arith.constant 0 : i32
    return %c0_i32, %c0_i32_0, %c0_i32_1 : i32, i32, i32
  }
}

</mosaic_0001>

<bundles_post_ra>
// kernel: decoder_rnn_forward.1
= control target key start
LH: loop header
LB: loop body
LE: loop exit
PB: predicated region body
PF: predicated region fallthrough
CT: control target
= control target key end

     0   :  { %v9468_v1 = vmov 0.0   ;;  %vm7614_vm0 = vmmov 0   ;;  %s9456_s0 = inlined_call_operand.vmem [shape: f32[8,2,32], index: 0, kind: input, shape index: {}]   ;;  %s9457_s1 = inlined_call_operand.vmem [shape: f32[8,2,32], index: 1, kind: input, shape index: {}]   ;;  %s9458_s2 = inlined_call_operand.vmem [shape: f32[8,2,32], index: 2, kind: input, shape index: {}]   ;;  %s9459_s3 = inlined_call_operand.vmem [shape: f32[2,2,32], index: 3, kind: input, shape index: {}]   ;;  %s9460_s4 = inlined_call_operand.vmem [shape: f32[3,32,32], index: 4, kind: input, shape index: {}]   ;;  %s9461_s5 = inlined_call_operand.vmem [shape: f32[3,1,32], index: 5, kind: input, shape index: {}]   ;;  %s9462_s6 = inlined_call_operand.vmem [shape: f32[3,32,32], index: 6, kind: input, shape index: {}]   ;;  %s9463_s7 = inlined_call_operand.vmem [shape: f32[3,1,32], index: 7, kind: input, shape index: {}]   ;;  %s9464_s8 = inlined_call_operand.vmem [shape: f32[3,32,32], index: 8, kind: input, shape index: {}]   ;;  %s9465_s9 = inlined_call_operand.vmem [shape: f32[3,1,32], index: 9, kind: input, shape index: {}]   ;;  %s9466_s10 = inlined_call_operand.vmem [shape: f32[8,2,32], index: 10, kind: output, shape index: {0}]   ;;  %s9467_s11 = inlined_call_operand.hbm [shape: f32[2,2,32], index: 11, kind: output, shape index: {1}]  }
   0x1   :  { %v7681_v0 = vld [vmem:[%s9460_s4 + $0x18] sm:$0xff]  ;;  %6616 = vmatprep.subr.mxu0 %v9468_v1  ;;  %v7687_v2 = vld [vmem:[%s9460_s4 + $0x10] sm:$0xff]  ;;  %6624 = vmatprep.mubr.msk.f32.mxu0 %vm7614_vm0, %v9468_v1  ;;  %v7707_v5 = vld [vmem:[%s9460_s4 + $0x8] sm:$0xff] }
   0x2   :  { %v7694_v3 = vld [vmem:[%s9460_s4 + $0x38] sm:$0xff]  ;;  %6617 = vmatpush3.msra.mxu0 %v7681_v0  ;;  %6627 = vmatprep.subr.mxu1 %v9468_v1  ;;  %v7701_v4 = vld [vmem:[%s9460_s4 + $0x30] sm:$0xff]  ;;  %v7715_v6 = vld [vmem:[%s9460_s4 + $0x28] sm:$0xff] }
   0x3   :  { %6618 = vmatprep.subr.mxu0 %v9468_v1  ;;  %6628 = vmatpush3.msra.mxu1 %v7694_v3  ;;  %v7721_v7 = vld [vmem:[%s9460_s4] sm:$0xff] }
   0x4   :  { %6619 = vmatpush3.msra.mxu0 %v7687_v2  ;;  %6629 = vmatprep.subr.mxu1 %v9468_v1 }
   0x5   :  { %6620 = vmatprep.subr.mxu0 %v9468_v1  ;;  %6630 = vmatpush3.msra.mxu1 %v7701_v4 }
   0x6   :  { %17 = vsyncpa [#allocation3], 0  ;;  %6621 = vmatpush3.msra.mxu0 %v7707_v5  ;;  %v7728_v8 = vld [vmem:[%s9459_s3] sm:$0x3]  ;;  %vm117_vm1 = vcmask 261120   ;;  %6631 = vmatprep.subr.mxu1 %v9468_v1  ;;  %v7743_v10 = vld [vmem:[%s9460_s4 + $0x58] sm:$0xff] }
   0x7   :  { %v7734_v9 = vld [vmem:[%s9460_s4 + $0x20] sm:$0xff]  ;;  %6622 = vmatprep.subr.mxu0 %v9468_v1  ;;  %6632 = vmatpush3.msra.mxu1 %v7715_v6  ;;  %v7754_v11 = vld [vmem:[%s9460_s4 + $0x50] sm:$0xff]  ;;  %v7763_v12 = vld [vmem:[%s9460_s4 + $0x48] sm:$0xff]  ;;  %vm837_vm2 = vcmask 254976  }
   0x8   :  { %6623 = vmatpush3.msra.mxu0 %v7721_v7  ;;  %6633 = vmatprep.subr.mxu1 %v9468_v1  ;;  %v7773_v13 = vld [vmem:[%s9460_s4 + $0x40] sm:$0xff]  ;;  %v7788_v14 = vld [vmem:[%s9462_s6 + $0x18] sm:$0xff]  ;;  %v7802_v16 = vld [vmem:[%s9462_s6 + $0x10] sm:$0xff] }
   0x9   :  { %6625 = vmatmul.mubr.msk.f32.vlgmr.msra.gmra.mxu0 %vm117_vm1, %v7728_v8  ;;  %6634 = vmatpush3.msra.mxu1 %v7734_v9  ;;  %v7793_v15 = vld [vmem:[%s9462_s6 + $0x38] sm:$0xff]  ;;  %v7807_v17 = vld [vmem:[%s9462_s6 + $0x30] sm:$0xff]  ;;  %v7816_v18 = vld [vmem:[%s9462_s6 + $0x8] sm:$0xff] }
   0xa   :  { %6635 = vmatprep.mubr.msk.f32.mxu1 %vm7614_vm0, %v9468_v1  ;;  %6638 = vmatprep.subr.mxu0 %v9468_v1  ;;  %v7821_v19 = vld [vmem:[%s9462_s6 + $0x28] sm:$0xff]  ;;  %v7830_v20 = vld [vmem:[%s9462_s6] sm:$0xff]  ;;  %v7874_v54 = vld [vmem:[%s9462_s6 + $0x58] sm:$0xff] }
   0xb   :  { %6636 = vmatmul.mubr.msk.f32.vlgmr.msra.gmra.mxu1 %vm117_vm1, %v7728_v8  ;;  %6639 = vmatpush3.msra.mxu0 %v7743_v10  ;;  %v7835_v21 = vld [vmem:[%s9462_s6 + $0x20] sm:$0xff]  ;;  %v7879_v55 = vld [vmem:[%s9464_s8 + $0x18] sm:$0xff]  ;;  %v7888_v56 = vld [vmem:[%s9462_s6 + $0x50] sm:$0xff] }
   0xc   :  { %6640 = vmatprep.subr.mxu0 %v9468_v1  ;;  %6646 = vmatprep.mubr.msk.f32.mxu0 %vm7614_vm0, %v9468_v1  ;;  %v7844_v22 = vld [vmem:[%s9461_s5] ss:$0 sm:$0xff]  ;;  %v7852_v25 = vld [vmem:[%s9461_s5 + $0x1] ss:$0 sm:$0xff]  ;;  %v7862_v41 = vld [vmem:[%s9461_s5 + $0x2] ss:$0 sm:$0xff] }
   0xd   :  { %6641 = vmatpush3.msra.mxu0 %v7754_v11  ;;  %6649 = vmatprep.subr.mxu1 %v9468_v1  ;;  %9477 = vst [vmem:[#allocation5_spill] sm:$0xff] %v7844_v22  ;;  %v110_v23 = vld [vmem:[%s9456_s0] sm:$0x3]  ;;  %9478 = vst [vmem:[#allocation6_spill] sm:$0xff] %v7852_v25  ;;  %v7893_v57 = vld [vmem:[%s9464_s8 + $0x10] sm:$0xff] }
   0xe   :  { %6642 = vmatprep.subr.mxu0 %v9468_v1  ;;  %6657 = vmatprep.mubr.msk.f32.mxu1 %vm7614_vm0, %v9468_v1  ;;  %v111_v31 = vld [vmem:[%s9457_s1] sm:$0x3]  ;;  %v7902_v58 = vld [vmem:[%s9462_s6 + $0x48] sm:$0xff]  ;;  %v7930_v62 = vld [vmem:[%s9459_s3 + $0x2] sm:$0x3] }
   0xf   :  { %6643 = vmatpush3.msra.mxu0 %v7763_v12  ;;  %6650 = vmatpush3.msra.mxu1 %v7788_v14  ;;  %v112_v45 = vld [vmem:[%s9458_s2] sm:$0x3]  ;;  %v7907_v59 = vld [vmem:[%s9464_s8 + $0x8] sm:$0xff]  ;;  %v7941_v63 = vld [vmem:[%s9464_s8 + $0x38] sm:$0xff] }
  0x10   :  { %6644 = vmatprep.subr.mxu0 %v9468_v1  ;;  %6651 = vmatprep.subr.mxu1 %v9468_v1  ;;  %v7916_v60 = vld [vmem:[%s9462_s6 + $0x40] sm:$0xff] }
  0x11   :  { %6645 = vmatpush3.msra.mxu0 %v7773_v13  ;;  %6652 = vmatpush3.msra.mxu1 %v7802_v16  ;;  %v7923_v61 = vld [vmem:[%s9464_s8] sm:$0xff] }
  0x12   :  { %6647 = vmatmul.mubr.msk.f32.vlgmr.msra.gmra.mxu0 %vm117_vm1, %v7728_v8  ;;  %6660 = vmatprep.subr.mxu0 %v9468_v1 }
  0x13   :  { %6668 = vmatprep.mubr.msk.f32.mxu0 %vm7614_vm0, %v9468_v1  ;;  %6661 = vmatpush3.msra.mxu0 %v7793_v15 }
  0x14   :  { %6662 = vmatprep.subr.mxu0 %v9468_v1  ;;  %6653 = vmatprep.subr.mxu1 %v9468_v1 }
  0x15   :  { %6663 = vmatpush3.msra.mxu0 %v7807_v17  ;;  %6654 = vmatpush3.msra.mxu1 %v7816_v18 }
  0x16   :  { %6664 = vmatprep.subr.mxu0 %v9468_v1  ;;  %6655 = vmatprep.subr.mxu1 %v9468_v1 }
  0x17   :  { %6665 = vmatpush3.msra.mxu0 %v7821_v19  ;;  %6656 = vmatpush3.msra.mxu1 %v7830_v20 }
  0x18   :  { %6666 = vmatprep.subr.mxu0 %v9468_v1  ;;  %6671 = vmatprep.subr.mxu1 %v9468_v1 }
  0x19   :  { %6667 = vmatpush3.msra.mxu0 %v7835_v21 }
  0x1a   :  { %6682 = vmatprep.subr.mxu0 %v9468_v1 }
  0xc9   :  { %v187_v24 = vpop.f32.mrf.mxu0 }
  0xca   :  { %v188_v26 = vadd.f32 %v7844_v22, %v187_v24  ;;  %v7962_v24 = vld [vmem:[%s9464_s8 + $0x50] sm:$0xff] }
  0xcb   :  { %v6626_v27 = vpop.f32.mrf.mxu0  ;;  %v262_v28 = vpop.f32.mrf.mxu1 }
  0xcc   :  { %v341_v29 = vadd.f32 %v188_v26, %v110_v23  ;;  %v263_v30 = vadd.f32 %v7852_v25, %v262_v28  ;;  %v7957_v23 = vld [vmem:[%s9464_s8 + $0x30] sm:$0xff]  ;;  %v7971_v26 = vld [vmem:[%s9464_s8 + $0x28] sm:$0xff]  ;;  %v7985_v28 = vld [vmem:[%s9464_s8 + $0x20] sm:$0xff] }
  0xcd   :  { %v6637_v32 = vpop.f32.mrf.mxu1  ;;  %v7976_v27 = vld [vmem:[%s9464_s8 + $0x48] sm:$0xff] }
  0xce   :  { %v5943_v33 = vmul.f32 -1.442695, %v341_v29  ;;  %v348_v34 = vadd.f32 %v263_v30, %v111_v31  ;;  %v7992_v29 = vld [vmem:[%s9464_s8 + $0x40] sm:$0xff] }
  0xd0   :  { %7413 = vpow2.f32 %v5943_v33  ;;  %v5944_v36 = vmul.f32 -1.442695, %v348_v34  ;;  %v8067_v34 = vld [vmem:[%s9463_s7] ss:$0 sm:$0xff] }
  0xd2   :  { %v337_v35 = vpop.f32.mrf.mxu0  ;;  %7415 = vpow2.f32 %v5944_v36 }
  0xd3   :  { %v338_v43 = vadd.f32 %v7862_v41, %v337_v35  ;;  %v8072_v35 = vld [vmem:[%s9465_s9] ss:$0 sm:$0xff] }
  0xd4   :  { %v6648_v37 = vpop.f32.mrf.mxu0 }
  0xdd   :  { %v7414_v38 = vpop.eup %7413 }
  0xde   :  { %v345_v39 = vadd.f32 1.0, %v7414_v38 }
  0xdf   :  { %v7416_v40 = vpop.eup %7415 }
  0xe0   :  { %7417 = vrcp.f32 %v345_v39  ;;  %v352_v42 = vadd.f32 1.0, %v7416_v40 }
  0xe2   :  { %7419 = vrcp.f32 %v352_v42 }
  0xed   :  { %v7418_v44 = vpop.eup %7417 }
  0xee   :  { %v355_v46 = vmul.f32 %v7418_v44, %v338_v43 }
  0xef   :  { %v7420_v48 = vpop.eup %7419 }
  0xf0   :  { %v356_v47 = vadd.f32 %v355_v46, %v112_v45  ;;  %v358_v49 = vsub.f32 1.0, %v7420_v48  ;;  %v360_v51 = vmul.f32 %v7420_v48, %v7728_v8  ;;  %v7946_v8 = vld [vmem:[%s9464_s8 + $0x58] sm:$0xff]  ;;  %v8079_v45 = vld [vmem:[%s9463_s7 + $0x1] ss:$0 sm:$0xff] }
  0xf1   :  { %v8084_v46 = vld [vmem:[%s9465_s9 + $0x1] ss:$0 sm:$0xff] }
  0xf2   :  { %7421 = vtanh.f32 %v356_v47 }
  0xff   :  { %v7422_v50 = vpop.eup %7421 }
 0x100   :  { %v359_v52 = vmul.f32 %v7422_v50, %v358_v49 }
 0x102   :  { %v7869_v53 = vadd.f32 %v360_v51, %v359_v52 }
 0x104   :  { %6658 = vmatmul.mubr.msk.f32.vlgmr.msra.gmra.mxu1 %vm117_vm1, %v7869_v53  ;;  %6669 = vmatmul.mubr.msk.f32.vlgmr.msra.gmra.mxu0 %vm117_vm1, %v7869_v53 }
 0x105   :  { %6672 = vmatpush3.msra.mxu1 %v7874_v54  ;;  %6683 = vmatpush3.msra.mxu0 %v7879_v55 }
 0x106   :  { %6673 = vmatprep.subr.mxu1 %v9468_v1  ;;  %6684 = vmatprep.subr.mxu0 %v9468_v1 }
 0x107   :  { %6674 = vmatpush3.msra.mxu1 %v7888_v56  ;;  %6685 = vmatpush3.msra.mxu0 %v7893_v57 }
 0x108   :  { %6675 = vmatprep.subr.mxu1 %v9468_v1  ;;  %6686 = vmatprep.subr.mxu0 %v9468_v1 }
 0x109   :  { %6676 = vmatpush3.msra.mxu1 %v7902_v58  ;;  %6687 = vmatpush3.msra.mxu0 %v7907_v59 }
 0x10a   :  { %6677 = vmatprep.subr.mxu1 %v9468_v1  ;;  %6688 = vmatprep.subr.mxu0 %v9468_v1 }
 0x10b   :  { %6678 = vmatpush3.msra.mxu1 %v7916_v60  ;;  %6679 = vmatprep.mubr.msk.f32.mxu1 %vm7614_vm0, %v9468_v1 }
 0x10c   :  { %6689 = vmatpush3.msra.mxu0 %v7923_v61  ;;  %6690 = vmatprep.mubr.msk.f32.mxu0 %vm7614_vm0, %v9468_v1 }
 0x10d   :  { %6680 = vmatmul.mubr.msk.f32.vlgmr.msra.gmra.mxu1 %vm117_vm1, %v7869_v53  ;;  %6691 = vmatmul.mubr.msk.f32.vlgmr.msra.gmra.mxu0 %vm117_vm1, %v7930_v62 }
 0x10e   :  { %6693 = vmatprep.subr.mxu1 %v9468_v1  ;;  %6704 = vmatprep.subr.mxu0 %v9468_v1 }
 0x10f   :  { %6694 = vmatpush3.msra.mxu1 %v7941_v63  ;;  %6705 = vmatpush3.msra.mxu0 %v7946_v8 }
 0x110   :  { %6695 = vmatprep.subr.mxu1 %v9468_v1  ;;  %6706 = vmatprep.subr.mxu0 %v9468_v1 }
 0x111   :  { %6696 = vmatpush3.msra.mxu1 %v7957_v23  ;;  %6707 = vmatpush3.msra.mxu0 %v7962_v24 }
 0x112   :  { %6697 = vmatprep.subr.mxu1 %v9468_v1  ;;  %6708 = vmatprep.subr.mxu0 %v9468_v1 }
 0x113   :  { %6698 = vmatpush3.msra.mxu1 %v7971_v26  ;;  %6709 = vmatpush3.msra.mxu0 %v7976_v27 }
 0x114   :  { %6699 = vmatprep.subr.mxu1 %v9468_v1  ;;  %6710 = vmatprep.subr.mxu0 %v9468_v1 }
 0x115   :  { %6700 = vmatpush3.msra.mxu1 %v7985_v28  ;;  %6701 = vmatprep.mubr.msk.f32.mxu1 %vm7614_vm0, %v9468_v1 }
 0x116   :  { %6711 = vmatpush3.msra.mxu0 %v7992_v29  ;;  %6702 = vmatmul.mubr.msk.f32.vlgmr.msra.gmra.mxu1 %vm117_vm1, %v7930_v62 }
 0x117   :  { %6712 = vmatprep.mubr.msk.f32.mxu0 %vm7614_vm0, %v9468_v1  ;;  %6715 = vmatprep.subr.mxu1 %v9468_v1 }
 0x118   :  { %6726 = vmatprep.subr.mxu0 %v9468_v1  ;;  %6713 = vmatmul.mubr.msk.f32.vlgmr.msra.gmra.mxu0 %vm117_vm1, %v7930_v62 }
 0x119   :  { %6716 = vmatpush3.msra.mxu1 %v7681_v0  ;;  %6727 = vmatpush3.msra.mxu0 %v7694_v3 }
 0x11a   :  { %6717 = vmatprep.subr.mxu1 %v9468_v1  ;;  %6728 = vmatprep.subr.mxu0 %v9468_v1 }
 0x11b   :  { %6718 = vmatpush3.msra.mxu1 %v7687_v2  ;;  %6729 = vmatpush3.msra.mxu0 %v7701_v4 }
 0x11c   :  { %6719 = vmatprep.subr.mxu1 %v9468_v1  ;;  %6730 = vmatprep.subr.mxu0 %v9468_v1 }
 0x11d   :  { %6720 = vmatpush3.msra.mxu1 %v7707_v5  ;;  %6731 = vmatpush3.msra.mxu0 %v7715_v6 }
 0x11e   :  { %6721 = vmatprep.subr.mxu1 %v9468_v1  ;;  %6732 = vmatprep.subr.mxu0 %v9468_v1 }
 0x11f   :  { %6722 = vmatpush3.msra.mxu1 %v7721_v7  ;;  %6723 = vmatprep.mubr.msk.f32.mxu1 %vm7614_vm0, %v9468_v1 }
 0x120   :  { %6733 = vmatpush3.msra.mxu0 %v7734_v9  ;;  %6734 = vmatprep.mubr.msk.f32.mxu0 %vm7614_vm0, %v9468_v1 }
 0x121   :  { %6724 = vmatmul.mubr.msk.f32.vlgmr.msra.gmra.mxu1 %vm117_vm1, %v7869_v53  ;;  %6735 = vmatmul.mubr.msk.f32.vlgmr.msra.gmra.mxu0 %vm117_vm1, %v7869_v53 }
 0x122   :  { %6737 = vmatprep.subr.mxu1 %v9468_v1  ;;  %6745 = vmatprep.mubr.msk.f32.mxu1 %vm7614_vm0, %v9468_v1 }
 0x123   :  { %6738 = vmatpush3.msra.mxu1 %v7743_v10  ;;  %6748 = vmatprep.subr.mxu0 %v9468_v1 }
 0x124   :  { %6739 = vmatprep.subr.mxu1 %v9468_v1  ;;  %6749 = vmatpush3.msra.mxu0 %v7788_v14 }
 0x125   :  { %6740 = vmatpush3.msra.mxu1 %v7754_v11  ;;  %6750 = vmatprep.subr.mxu0 %v9468_v1 }
 0x126   :  { %6741 = vmatprep.subr.mxu1 %v9468_v1  ;;  %6751 = vmatpush3.msra.mxu0 %v7802_v16 }
 0x127   :  { %6742 = vmatpush3.msra.mxu1 %v7763_v12  ;;  %6752 = vmatprep.subr.mxu0 %v9468_v1 }
 0x128   :  { %6743 = vmatprep.subr.mxu1 %v9468_v1  ;;  %6753 = vmatpush3.msra.mxu0 %v7816_v18 }
 0x129   :  { %6744 = vmatpush3.msra.mxu1 %v7773_v13  ;;  %6754 = vmatprep.subr.mxu0 %v9468_v1 }
 0x12a   :  { %6746 = vmatmul.mubr.msk.f32.vlgmr.msra.gmra.mxu1 %vm117_vm1, %v7869_v53  ;;  %6759 = vmatprep.subr.mxu1 %v9468_v1 }
 0x12b   :  { %6760 = vmatpush3.msra.mxu1 %v7793_v15  ;;  %6755 = vmatpush3.msra.mxu0 %v7830_v20 }
 0x12c   :  { %6761 = vmatprep.subr.mxu1 %v9468_v1  ;;  %6756 = vmatprep.mubr.msk.f32.mxu0 %vm7614_vm0, %v9468_v1 }
 0x12d   :  { %6762 = vmatpush3.msra.mxu1 %v7807_v17  ;;  %6767 = vmatprep.mubr.msk.f32.mxu1 %vm7614_vm0, %v9468_v1 }
 0x12e   :  { %6763 = vmatprep.subr.mxu1 %v9468_v1  ;;  %6770 = vmatprep.subr.mxu0 %v9468_v1 }
 0x12f   :  { %6764 = vmatpush3.msra.mxu1 %v7821_v19 }
 0x130   :  { %6765 = vmatprep.subr.mxu1 %v9468_v1 }
 0x131   :  { %6766 = vmatpush3.msra.mxu1 %v7835_v21 }
 0x132   :  { %6781 = vmatprep.subr.mxu1 %v9468_v1 }
 0x1c4   :  { %v435_v30 = vpop.f32.mrf.mxu1  ;;  %v510_v31 = vpop.f32.mrf.mxu0 }
 0x1c5   :  { %v436_v38 = vadd.f32 %v8067_v34, %v435_v30  ;;  %v511_v48 = vadd.f32 %v8079_v45, %v510_v31 }
 0x1c6   :  { %v6659_v32 = vpop.f32.mrf.mxu1  ;;  %v6670_v33 = vpop.f32.mrf.mxu0 }
 0x1cd   :  { %v585_v36 = vpop.f32.mrf.mxu1  ;;  %v662_v37 = vpop.f32.mrf.mxu0 }
 0x1ce   :  { %v663_v39 = vadd.f32 %v8072_v35, %v662_v37  ;;  %v5969_v37 = vld [vmem:[%s9456_s0 + $0x2] sm:$0x3] }
 0x1cf   :  { %v6681_v40 = vpop.f32.mrf.mxu1  ;;  %v6692_v42 = vpop.f32.mrf.mxu0 }
 0x1d0   :  { %v816_v43 = vadd.f32 %v663_v39, %v436_v38 }
 0x1d2   :  { %v5967_v44 = vmul.f32 -1.442695, %v816_v43 }
 0x1d4   :  { %7423 = vpow2.f32 %v5967_v44 }
 0x1d6   :  { %v737_v47 = vpop.f32.mrf.mxu1 }
 0x1d7   :  { %v738_v49 = vadd.f32 %v8084_v46, %v737_v47 }
 0x1d8   :  { %v6703_v50 = vpop.f32.mrf.mxu1  ;;  %v812_v51 = vpop.f32.mrf.mxu0 }
 0x1d9   :  { %v823_v52 = vadd.f32 %v738_v49, %v511_v48  ;;  %v5970_v49 = vld [vmem:[%s9457_s1 + $0x2] sm:$0x3] }
 0x1da   :  { %v6714_v30 = vpop.f32.mrf.mxu0 }
 0x1db   :  { %v5968_v32 = vmul.f32 -1.442695, %v823_v52 }
 0x1dd   :  { %7425 = vpow2.f32 %v5968_v32 }
 0x1e1   :  { %v7424_v33 = vpop.eup %7423  ;;  %v915_v38 = vpop.f32.mrf.mxu1 }
 0x1e2   :  { %v989_v39 = vpop.f32.mrf.mxu0  ;;  %v820_v40 = vadd.f32 1.0, %v7424_v33  ;;  %v916_v42 = vadd.f32 %v7844_v22, %v915_v38  ;;  %v8099_v33 = vld [vmem:[%s9465_s9 + $0x2] ss:$0 sm:$0xff] }
 0x1e3   :  { %v6725_v43 = vpop.f32.mrf.mxu1  ;;  %v990_v47 = vadd.f32 %v7852_v25, %v989_v39  ;;  %v813_v39 = vadd.f32 %v8099_v33, %v812_v51 }
 0x1e4   :  { %v6736_v31 = vpop.f32.mrf.mxu0  ;;  %7427 = vrcp.f32 %v820_v40  ;;  %v1067_v44 = vadd.f32 %v5969_v37, %v916_v42  ;;  %v8104_v37 = vld [vmem:[%s9463_s7 + $0x2] ss:$0 sm:$0xff] }
 0x1e5   :  { %v1074_v50 = vadd.f32 %v5970_v49, %v990_v47  ;;  %v586_v43 = vadd.f32 %v8104_v37, %v585_v36  ;;  %v5971_v36 = vld [vmem:[%s9458_s2 + $0x2] sm:$0x3] }
 0x1e6   :  { %v5983_v48 = vmul.f32 -1.442695, %v1067_v44 }
 0x1e7   :  { %v5984_v38 = vmul.f32 -1.442695, %v1074_v50 }
 0x1e8   :  { %7429 = vpow2.f32 %v5983_v48 }
 0x1e9   :  { %7431 = vpow2.f32 %v5984_v38 }
 0x1ea   :  { %v1063_v52 = vpop.f32.mrf.mxu1  ;;  %v7426_v30 = vpop.eup %7425 }
 0x1eb   :  { %v827_v40 = vadd.f32 1.0, %v7426_v30  ;;  %v1064_v25 = vadd.f32 %v7862_v41, %v1063_v52 }
 0x1ec   :  { %v6747_v32 = vpop.f32.mrf.mxu1 }
 0x1ed   :  { %7433 = vrcp.f32 %v827_v40 }
 0x1f1   :  { %v7428_v42 = vpop.eup %7427 }
 0x1f2   :  { %v830_v31 = vmul.f32 %v7428_v42, %v813_v39 }
 0x1f4   :  { %v831_v44 = vadd.f32 %v830_v31, %v586_v43 }
 0x1f5   :  { %v7430_v47 = vpop.eup %7429 }
 0x1f6   :  { %7435 = vtanh.f32 %v831_v44  ;;  %v1071_v48 = vadd.f32 1.0, %v7430_v47  ;;  %v7432_v49 = vpop.eup %7431 }
 0x1f7   :  { %v1078_v30 = vadd.f32 1.0, %v7432_v49 }
 0x1f8   :  { %7437 = vrcp.f32 %v1071_v48 }
 0x1f9   :  { %7439 = vrcp.f32 %v1078_v30 }
 0x1fa   :  { %v7434_v50 = vpop.eup %7433 }
 0x1fb   :  { %v833_v32 = vsub.f32 1.0, %v7434_v50  ;;  %v835_v51 = vmul.f32 %v7434_v50, %v7930_v62  ;;  %v9480_v50 = vld [vmem:[#allocation5_spill] sm:$0xff] }
 0x203   :  { %v7436_v1 = vpop.eup %7435 }
 0x204   :  { %v834_v22 = vmul.f32 %v7436_v1, %v833_v32 }
 0x205   :  { %v7438_v38 = vpop.eup %7437 }
 0x206   :  { %v1081_v40 = vmul.f32 %v7438_v38, %v1064_v25  ;;  %v8113_v39 = vadd.f32 %v835_v51, %v834_v22  ;;  %v7440_v1 = vpop.eup %7439  ;;  %v9479_v22 = vmov 0.0  }
 0x207   :  { %v1084_v62 = vsub.f32 1.0, %v7440_v1  ;;  %v1086_v43 = vmul.f32 %v7440_v1, %v7869_v53  ;;  %v6010_v53 = vld [vmem:[%s9456_s0 + $0x4] sm:$0x3] }
 0x208   :  { %v1082_v42 = vadd.f32 %v5971_v36, %v1081_v40  ;;  %838 = vst.msk [vmem:[%s9466_s10] sm:$0x3] %vm837_vm2, %v8113_v39  ;;  %v9481_v36 = vld [vmem:[#allocation6_spill] sm:$0xff]  ;;  %v6011_v1 = vld [vmem:[%s9457_s1 + $0x4] sm:$0x3] }
 0x20a   :  { %7441 = vtanh.f32 %v1082_v42 }
 0x217   :  { %v7442_v52 = vpop.eup %7441 }
 0x218   :  { %v1085_v31 = vmul.f32 %v7442_v52, %v1084_v62 }
 0x21a   :  { %v8121_v44 = vadd.f32 %v1086_v43, %v1085_v31 }
 0x21c   :  { %6757 = vmatmul.mubr.msk.f32.vlgmr.msra.gmra.mxu0 %vm117_vm1, %v8121_v44  ;;  %6768 = vmatmul.mubr.msk.f32.vlgmr.msra.gmra.mxu1 %vm117_vm1, %v8121_v44 }
 0x21d   :  { %6771 = vmatpush3.msra.mxu0 %v7874_v54  ;;  %6782 = vmatpush3.msra.mxu1 %v7879_v55 }
 0x21e   :  { %6772 = vmatprep.subr.mxu0 %v9479_v22  ;;  %6783 = vmatprep.subr.mxu1 %v9479_v22 }
 0x21f   :  { %6773 = vmatpush3.msra.mxu0 %v7888_v56  ;;  %6784 = vmatpush3.msra.mxu1 %v7893_v57 }
 0x220   :  { %6774 = vmatprep.subr.mxu0 %v9479_v22  ;;  %6785 = vmatprep.subr.mxu1 %v9479_v22 }
 0x221   :  { %6775 = vmatpush3.msra.mxu0 %v7902_v58  ;;  %6786 = vmatpush3.msra.mxu1 %v7907_v59 }
 0x222   :  { %6776 = vmatprep.subr.mxu0 %v9479_v22  ;;  %6787 = vmatprep.subr.mxu1 %v9479_v22 }
 0x223   :  { %6777 = vmatpush3.msra.mxu0 %v7916_v60  ;;  %6778 = vmatprep.mubr.msk.f32.mxu0 %vm7614_vm0, %v9479_v22 }
 0x224   :  { %6788 = vmatpush3.msra.mxu1 %v7923_v61  ;;  %6789 = vmatprep.mubr.msk.f32.mxu1 %vm7614_vm0, %v9479_v22 }
 0x225   :  { %6779 = vmatmul.mubr.msk.f32.vlgmr.msra.gmra.mxu0 %vm117_vm1, %v8121_v44  ;;  %6790 = vmatmul.mubr.msk.f32.vlgmr.msra.gmra.mxu1 %vm117_vm1, %v8113_v39 }
 0x226   :  { %6792 = vmatprep.subr.mxu0 %v9479_v22  ;;  %6803 = vmatprep.subr.mxu1 %v9479_v22 }
 0x227   :  { %6793 = vmatpush3.msra.mxu0 %v7941_v63  ;;  %6804 = vmatpush3.msra.mxu1 %v7946_v8 }
 0x228   :  { %6794 = vmatprep.subr.mxu0 %v9479_v22  ;;  %6805 = vmatprep.subr.mxu1 %v9479_v22 }
 0x229   :  { %6795 = vmatpush3.msra.mxu0 %v7957_v23  ;;  %6806 = vmatpush3.msra.mxu1 %v7962_v24 }
 0x22a   :  { %6796 = vmatprep.subr.mxu0 %v9479_v22  ;;  %6807 = vmatprep.subr.mxu1 %v9479_v22 }
 0x22b   :  { %6797 = vmatpush3.msra.mxu0 %v7971_v26  ;;  %6808 = vmatpush3.msra.mxu1 %v7976_v27 }
 0x22c   :  { %6798 = vmatprep.subr.mxu0 %v9479_v22  ;;  %6809 = vmatprep.subr.mxu1 %v9479_v22 }
 0x22d   :  { %6799 = vmatpush3.msra.mxu0 %v7985_v28  ;;  %6800 = vmatprep.mubr.msk.f32.mxu0 %vm7614_vm0, %v9479_v22 }
 0x22e   :  { %6810 = vmatpush3.msra.mxu1 %v7992_v29  ;;  %6811 = vmatprep.mubr.msk.f32.mxu1 %vm7614_vm0, %v9479_v22 }
 0x22f   :  { %6801 = vmatmul.mubr.msk.f32.vlgmr.msra.gmra.mxu0 %vm117_vm1, %v8113_v39  ;;  %6812 = vmatmul.mubr.msk.f32.vlgmr.msra.gmra.mxu1 %vm117_vm1, %v8113_v39 }
 0x230   :  { %6814 = vmatprep.subr.mxu0 %v9479_v22  ;;  %6825 = vmatprep.subr.mxu1 %v9479_v22 }
 0x231   :  { %6815 = vmatpush3.msra.mxu0 %v7681_v0  ;;  %6826 = vmatpush3.msra.mxu1 %v7694_v3 }
 0x232   :  { %6816 = vmatprep.subr.mxu0 %v9479_v22  ;;  %6827 = vmatprep.subr.mxu1 %v9479_v22 }
 0x233   :  { %6817 = vmatpush3.msra.mxu0 %v7687_v2  ;;  %6828 = vmatpush3.msra.mxu1 %v7701_v4 }
 0x234   :  { %6818 = vmatprep.subr.mxu0 %v9479_v22  ;;  %6829 = vmatprep.subr.mxu1 %v9479_v22 }
 0x235   :  { %6819 = vmatpush3.msra.mxu0 %v7707_v5  ;;  %6830 = vmatpush3.msra.mxu1 %v7715_v6 }
 0x236   :  { %6820 = vmatprep.subr.mxu0 %v9479_v22  ;;  %6831 = vmatprep.subr.mxu1 %v9479_v22 }
 0x237   :  { %6821 = vmatpush3.msra.mxu0 %v7721_v7  ;;  %6822 = vmatprep.mubr.msk.f32.mxu0 %vm7614_vm0, %v9479_v22 }
 0x238   :  { %6832 = vmatpush3.msra.mxu1 %v7734_v9  ;;  %6833 = vmatprep.mubr.msk.f32.mxu1 %vm7614_vm0, %v9479_v22 }
 0x239   :  { %6823 = vmatmul.mubr.msk.f32.vlgmr.msra.gmra.mxu0 %vm117_vm1, %v8121_v44  ;;  %6834 = vmatmul.mubr.msk.f32.vlgmr.msra.gmra.mxu1 %vm117_vm1, %v8121_v44 }
 0x23a   :  { %6836 = vmatprep.subr.mxu0 %v9479_v22  ;;  %6844 = vmatprep.mubr.msk.f32.mxu0 %vm7614_vm0, %v9479_v22 }
 0x23b   :  { %6837 = vmatpush3.msra.mxu0 %v7743_v10  ;;  %6847 = vmatprep.subr.mxu1 %v9479_v22 }
 0x23c   :  { %6838 = vmatprep.subr.mxu0 %v9479_v22  ;;  %6848 = vmatpush3.msra.mxu1 %v7788_v14 }
 0x23d   :  { %6839 = vmatpush3.msra.mxu0 %v7754_v11  ;;  %6849 = vmatprep.subr.mxu1 %v9479_v22 }
 0x23e   :  { %6840 = vmatprep.subr.mxu0 %v9479_v22  ;;  %6850 = vmatpush3.msra.mxu1 %v7802_v16 }
 0x23f   :  { %6841 = vmatpush3.msra.mxu0 %v7763_v12  ;;  %6851 = vmatprep.subr.mxu1 %v9479_v22 }
 0x240   :  { %6842 = vmatprep.subr.mxu0 %v9479_v22  ;;  %6852 = vmatpush3.msra.mxu1 %v7816_v18 }
 0x241   :  { %6843 = vmatpush3.msra.mxu0 %v7773_v13  ;;  %6853 = vmatprep.subr.mxu1 %v9479_v22 }
 0x242   :  { %6845 = vmatmul.mubr.msk.f32.vlgmr.msra.gmra.mxu0 %vm117_vm1, %v8121_v44  ;;  %6858 = vmatprep.subr.mxu0 %v9479_v22 }
 0x243   :  { %6859 = vmatpush3.msra.mxu0 %v7793_v15  ;;  %6854 = vmatpush3.msra.mxu1 %v7830_v20 }
 0x244   :  { %6860 = vmatprep.subr.mxu0 %v9479_v22  ;;  %6855 = vmatprep.mubr.msk.f32.mxu1 %vm7614_vm0, %v9479_v22 }
 0x245   :  { %6861 = vmatpush3.msra.mxu0 %v7807_v17  ;;  %6866 = vmatprep.mubr.msk.f32.mxu0 %vm7614_vm0, %v9479_v22 }
 0x246   :  { %6862 = vmatprep.subr.mxu0 %v9479_v22  ;;  %6869 = vmatprep.subr.mxu1 %v9479_v22 }
 0x247   :  { %6863 = vmatpush3.msra.mxu0 %v7821_v19 }
 0x248   :  { %6864 = vmatprep.subr.mxu0 %v9479_v22 }
 0x249   :  { %6865 = vmatpush3.msra.mxu0 %v7835_v21 }
 0x24a   :  { %6880 = vmatprep.subr.mxu0 %v9479_v22 }
 0x2dc   :  { %v1161_v0 = vpop.f32.mrf.mxu0  ;;  %v1235_v2 = vpop.f32.mrf.mxu1 }
 0x2dd   :  { %v1162_v7 = vadd.f32 %v8067_v34, %v1161_v0  ;;  %v1236_v16 = vadd.f32 %v8079_v45, %v1235_v2 }
 0x2de   :  { %v6758_v3 = vpop.f32.mrf.mxu0  ;;  %v6769_v4 = vpop.f32.mrf.mxu1 }
 0x2e5   :  { %v1309_v5 = vpop.f32.mrf.mxu0  ;;  %v1386_v6 = vpop.f32.mrf.mxu1 }
 0x2e6   :  { %v1387_v9 = vadd.f32 %v8072_v35, %v1386_v6  ;;  %v1310_v6 = vadd.f32 %v8104_v37, %v1309_v5  ;;  %v6012_v5 = vld [vmem:[%s9458_s2 + $0x4] sm:$0x3] }
 0x2e7   :  { %v6780_v10 = vpop.f32.mrf.mxu0  ;;  %v6791_v11 = vpop.f32.mrf.mxu1 }
 0x2e8   :  { %v1538_v12 = vadd.f32 %v1387_v9, %v1162_v7 }
 0x2ea   :  { %v6007_v13 = vmul.f32 -1.442695, %v1538_v12 }
 0x2ec   :  { %7443 = vpow2.f32 %v6007_v13 }
 0x2ef   :  { %v1460_v14 = vpop.f32.mrf.mxu0  ;;  %v1534_v15 = vpop.f32.mrf.mxu1 }
 0x2f0   :  { %v1461_v17 = vadd.f32 %v8084_v46, %v1460_v14  ;;  %v1535_v3 = vadd.f32 %v8099_v33, %v1534_v15 }
 0x2f1   :  { %v6802_v18 = vpop.f32.mrf.mxu0  ;;  %v6813_v19 = vpop.f32.mrf.mxu1 }
 0x2f2   :  { %v1545_v20 = vadd.f32 %v1461_v17, %v1236_v16 }
 0x2f4   :  { %v6008_v21 = vmul.f32 -1.442695, %v1545_v20 }
 0x2f6   :  { %7445 = vpow2.f32 %v6008_v21 }
 0x2f9   :  { %v7444_v25 = vpop.eup %7443  ;;  %v1637_v47 = vpop.f32.mrf.mxu0 }
 0x2fa   :  { %v1711_v48 = vpop.f32.mrf.mxu1  ;;  %v1542_v49 = vadd.f32 1.0, %v7444_v25  ;;  %v1638_v30 = vadd.f32 %v9480_v50, %v1637_v47 }
 0x2fb   :  { %v6824_v32 = vpop.f32.mrf.mxu0  ;;  %v1712_v40 = vadd.f32 %v9481_v36, %v1711_v48 }
 0x2fc   :  { %v6835_v51 = vpop.f32.mrf.mxu1  ;;  %7447 = vrcp.f32 %v1542_v49  ;;  %v1789_v38 = vadd.f32 %v6010_v53, %v1638_v30  ;;  %v8448_v30 = vld [vmem:[%s9462_s6 + $0x28] sm:$0xff]  ;;  %v8457_v32 = vld [vmem:[%s9462_s6] sm:$0xff] }
 0x2fd   :  { %v1796_v62 = vadd.f32 %v6011_v1, %v1712_v40  ;;  %v8462_v51 = vld [vmem:[%s9462_s6 + $0x20] sm:$0xff] }
 0x2fe   :  { %v6024_v42 = vmul.f32 -1.442695, %v1789_v38 }
 0x2ff   :  { %v6025_v0 = vmul.f32 -1.442695, %v1796_v62 }
 0x300   :  { %7449 = vpow2.f32 %v6024_v42 }
 0x301   :  { %7451 = vpow2.f32 %v6025_v0 }
 0x302   :  { %v1785_v52 = vpop.f32.mrf.mxu0 }
 0x303   :  { %v7446_v43 = vpop.eup %7445  ;;  %v1786_v18 = vadd.f32 %v7862_v41, %v1785_v52 }
 0x304   :  { %v6846_v31 = vpop.f32.mrf.mxu0  ;;  %v1549_v2 = vadd.f32 1.0, %v7446_v43 }
 0x306   :  { %7453 = vrcp.f32 %v1549_v2 }
 0x309   :  { %v7448_v4 = vpop.eup %7447 }
 0x30a   :  { %v1552_v7 = vmul.f32 %v7448_v4, %v1535_v3 }
 0x30c   :  { %v1553_v9 = vadd.f32 %v1552_v7, %v1310_v6 }
 0x30d   :  { %v7450_v10 = vpop.eup %7449 }
 0x30e   :  { %7455 = vtanh.f32 %v1553_v9  ;;  %v1793_v11 = vadd.f32 1.0, %v7450_v10  ;;  %v7452_v12 = vpop.eup %7451 }
 0x30f   :  { %v1800_v14 = vadd.f32 1.0, %v7452_v12 }
 0x310   :  { %7457 = vrcp.f32 %v1793_v11 }
 0x311   :  { %7459 = vrcp.f32 %v1800_v14 }
 0x313   :  { %v7454_v13 = vpop.eup %7453 }
 0x314   :  { %v1555_v16 = vsub.f32 1.0, %v7454_v13  ;;  %v1557_v15 = vmul.f32 %v7454_v13, %v8113_v39 }
 0x31b   :  { %v7456_v17 = vpop.eup %7455 }
 0x31c   :  { %v1556_v19 = vmul.f32 %v7456_v17, %v1555_v16 }
 0x31d   :  { %v7458_v20 = vpop.eup %7457 }
 0x31e   :  { %v1803_v21 = vmul.f32 %v7458_v20, %v1786_v18  ;;  %v8250_v25 = vadd.f32 %v1557_v15, %v1556_v19  ;;  %v7460_v41 = vpop.eup %7459  ;;  %v8478_v18 = vld [vmem:[%s9461_s5] ss:$0 sm:$0xff]  ;;  %v8484_v20 = vld [vmem:[%s9461_s5 + $0x1] ss:$0 sm:$0xff] }
 0x31f   :  { %v1806_v47 = vsub.f32 1.0, %v7460_v41  ;;  %v1808_v48 = vmul.f32 %v7460_v41, %v8121_v44  ;;  %v8443_v44 = vld [vmem:[%s9462_s6 + $0x8] sm:$0xff]  ;;  %9482 = vst [vmem:[#allocation5_spill] sm:$0xff] %v8484_v20 }
 0x320   :  { %v1804_v53 = vadd.f32 %v6012_v5, %v1803_v21  ;;  %6009 = vst.msk [vmem:[%s9466_s10 + $0x2] sm:$0x3] %vm837_vm2, %v8250_v25 }
 0x322   :  { %7461 = vtanh.f32 %v1804_v53  ;;  %v6052_v53 = vld [vmem:[%s9457_s1 + $0x6] sm:$0x3] }
 0x32f   :  { %v7462_v39 = vpop.eup %7461 }
 0x330   :  { %v1807_v49 = vmul.f32 %v7462_v39, %v1806_v47 }
 0x332   :  { %v8258_v50 = vadd.f32 %v1808_v48, %v1807_v49 }
 0x334   :  { %6856 = vmatmul.mubr.msk.f32.vlgmr.msra.gmra.mxu1 %vm117_vm1, %v8258_v50  ;;  %6867 = vmatmul.mubr.msk.f32.vlgmr.msra.gmra.mxu0 %vm117_vm1, %v8258_v50 }
 0x335   :  { %6870 = vmatpush3.msra.mxu1 %v7874_v54  ;;  %6881 = vmatpush3.msra.mxu0 %v7879_v55  ;;  %v8309_v54 = vld [vmem:[%s9460_s4 + $0x18] sm:$0xff] }
 0x336   :  { %6871 = vmatprep.subr.mxu1 %v9479_v22  ;;  %6882 = vmatprep.subr.mxu0 %v9479_v22  ;;  %v8314_v55 = vld [vmem:[%s9460_s4 + $0x38] sm:$0xff] }
 0x337   :  { %6872 = vmatpush3.msra.mxu1 %v7888_v56  ;;  %6883 = vmatpush3.msra.mxu0 %v7893_v57  ;;  %v8325_v56 = vld [vmem:[%s9460_s4 + $0x10] sm:$0xff] }
 0x338   :  { %6873 = vmatprep.subr.mxu1 %v9479_v22  ;;  %6884 = vmatprep.subr.mxu0 %v9479_v22  ;;  %v8330_v57 = vld [vmem:[%s9460_s4 + $0x30] sm:$0xff] }
 0x339   :  { %6874 = vmatpush3.msra.mxu1 %v7902_v58  ;;  %6885 = vmatpush3.msra.mxu0 %v7907_v59  ;;  %v8339_v58 = vld [vmem:[%s9460_s4 + $0x8] sm:$0xff] }
 0x33a   :  { %6875 = vmatprep.subr.mxu1 %v9479_v22  ;;  %6886 = vmatprep.subr.mxu0 %v9479_v22  ;;  %v8344_v59 = vld [vmem:[%s9460_s4 + $0x28] sm:$0xff] }
 0x33b   :  { %6876 = vmatpush3.msra.mxu1 %v7916_v60  ;;  %6877 = vmatprep.mubr.msk.f32.mxu1 %vm7614_vm0, %v9479_v22  ;;  %v8353_v60 = vld [vmem:[%s9460_s4] sm:$0xff] }
 0x33c   :  { %6887 = vmatpush3.msra.mxu0 %v7923_v61  ;;  %6888 = vmatprep.mubr.msk.f32.mxu0 %vm7614_vm0, %v9479_v22  ;;  %v8360_v61 = vld [vmem:[%s9460_s4 + $0x20] sm:$0xff] }
 0x33d   :  { %6878 = vmatmul.mubr.msk.f32.vlgmr.msra.gmra.mxu1 %vm117_vm1, %v8258_v50  ;;  %6889 = vmatmul.mubr.msk.f32.vlgmr.msra.gmra.mxu0 %vm117_vm1, %v8250_v25 }
 0x33e   :  { %6891 = vmatprep.subr.mxu1 %v9479_v22  ;;  %6902 = vmatprep.subr.mxu0 %v9479_v22 }
 0x33f   :  { %6892 = vmatpush3.msra.mxu1 %v7941_v63  ;;  %6903 = vmatpush3.msra.mxu0 %v7946_v8  ;;  %v8373_v63 = vld [vmem:[%s9460_s4 + $0x58] sm:$0xff]  ;;  %v8383_v8 = vld [vmem:[%s9460_s4 + $0x50] sm:$0xff] }
 0x340   :  { %6893 = vmatprep.subr.mxu1 %v9479_v22  ;;  %6904 = vmatprep.subr.mxu0 %v9479_v22 }
 0x341   :  { %6894 = vmatpush3.msra.mxu1 %v7957_v23  ;;  %6905 = vmatpush3.msra.mxu0 %v7962_v24  ;;  %v8393_v23 = vld [vmem:[%s9460_s4 + $0x48] sm:$0xff]  ;;  %v8402_v24 = vld [vmem:[%s9460_s4 + $0x40] sm:$0xff] }
 0x342   :  { %6895 = vmatprep.subr.mxu1 %v9479_v22  ;;  %6906 = vmatprep.subr.mxu0 %v9479_v22 }
 0x343   :  { %6896 = vmatpush3.msra.mxu1 %v7971_v26  ;;  %6907 = vmatpush3.msra.mxu0 %v7976_v27  ;;  %v8415_v26 = vld [vmem:[%s9462_s6 + $0x18] sm:$0xff] }
 0x344   :  { %6897 = vmatprep.subr.mxu1 %v9479_v22  ;;  %6908 = vmatprep.subr.mxu0 %v9479_v22  ;;  %v8420_v27 = vld [vmem:[%s9462_s6 + $0x38] sm:$0xff] }
 0x345   :  { %6898 = vmatpush3.msra.mxu1 %v7985_v28  ;;  %6899 = vmatprep.mubr.msk.f32.mxu1 %vm7614_vm0, %v9479_v22  ;;  %v8429_v28 = vld [vmem:[%s9462_s6 + $0x10] sm:$0xff] }
 0x346   :  { %6909 = vmatpush3.msra.mxu0 %v7992_v29  ;;  %6910 = vmatprep.mubr.msk.f32.mxu0 %vm7614_vm0, %v9479_v22  ;;  %v8434_v29 = vld [vmem:[%s9462_s6 + $0x30] sm:$0xff] }
 0x347   :  { %6900 = vmatmul.mubr.msk.f32.vlgmr.msra.gmra.mxu1 %vm117_vm1, %v8250_v25  ;;  %6911 = vmatmul.mubr.msk.f32.vlgmr.msra.gmra.mxu0 %vm117_vm1, %v8250_v25 }
 0x348   :  { %6913 = vmatprep.subr.mxu1 %v9479_v22  ;;  %6924 = vmatprep.subr.mxu0 %v9479_v22 }
 0x349   :  { %6914 = vmatpush3.msra.mxu1 %v8309_v54  ;;  %6925 = vmatpush3.msra.mxu0 %v8314_v55 }
 0x34a   :  { %6915 = vmatprep.subr.mxu1 %v9479_v22  ;;  %6926 = vmatprep.subr.mxu0 %v9479_v22 }
 0x34b   :  { %6916 = vmatpush3.msra.mxu1 %v8325_v56  ;;  %6927 = vmatpush3.msra.mxu0 %v8330_v57 }
 0x34c   :  { %6917 = vmatprep.subr.mxu1 %v9479_v22  ;;  %6928 = vmatprep.subr.mxu0 %v9479_v22 }
 0x34d   :  { %6918 = vmatpush3.msra.mxu1 %v8339_v58  ;;  %6929 = vmatpush3.msra.mxu0 %v8344_v59 }
 0x34e   :  { %6919 = vmatprep.subr.mxu1 %v9479_v22  ;;  %6930 = vmatprep.subr.mxu0 %v9479_v22 }
 0x34f   :  { %6920 = vmatpush3.msra.mxu1 %v8353_v60  ;;  %6921 = vmatprep.mubr.msk.f32.mxu1 %vm7614_vm0, %v9479_v22 }
 0x350   :  { %6931 = vmatpush3.msra.mxu0 %v8360_v61  ;;  %6932 = vmatprep.mubr.msk.f32.mxu0 %vm7614_vm0, %v9479_v22 }
 0x351   :  { %6922 = vmatmul.mubr.msk.f32.vlgmr.msra.gmra.mxu1 %vm117_vm1, %v8258_v50  ;;  %6933 = vmatmul.mubr.msk.f32.vlgmr.msra.gmra.mxu0 %vm117_vm1, %v8258_v50 }
 0x352   :  { %6935 = vmatprep.subr.mxu1 %v9479_v22  ;;  %6943 = vmatprep.mubr.msk.f32.mxu1 %vm7614_vm0, %v9479_v22 }
 0x353   :  { %6936 = vmatpush3.msra.mxu1 %v8373_v63  ;;  %6946 = vmatprep.subr.mxu0 %v9479_v22 }
 0x354   :  { %6937 = vmatprep.subr.mxu1 %v9479_v22  ;;  %6954 = vmatprep.mubr.msk.f32.mxu0 %vm7614_vm0, %v9479_v22 }
 0x355   :  { %6938 = vmatpush3.msra.mxu1 %v8383_v8  ;;  %6947 = vmatpush3.msra.mxu0 %v8415_v26 }
 0x356   :  { %6939 = vmatprep.subr.mxu1 %v9479_v22  ;;  %6948 = vmatprep.subr.mxu0 %v9479_v22 }
 0x357   :  { %6940 = vmatpush3.msra.mxu1 %v8393_v23  ;;  %6949 = vmatpush3.msra.mxu0 %v8429_v28 }
 0x358   :  { %6941 = vmatprep.subr.mxu1 %v9479_v22  ;;  %6950 = vmatprep.subr.mxu0 %v9479_v22 }
 0x359   :  { %6942 = vmatpush3.msra.mxu1 %v8402_v24  ;;  %6951 = vmatpush3.msra.mxu0 %v8443_v44 }
 0x35a   :  { %6944 = vmatmul.mubr.msk.f32.vlgmr.msra.gmra.mxu1 %vm117_vm1, %v8258_v50  ;;  %6957 = vmatprep.subr.mxu1 %v9479_v22 }
 0x35b   :  { %6965 = vmatprep.mubr.msk.f32.mxu1 %vm7614_vm0, %v9479_v22  ;;  %6958 = vmatpush3.msra.mxu1 %v8420_v27 }
 0x35c   :  { %6959 = vmatprep.subr.mxu1 %v9479_v22  ;;  %6952 = vmatprep.subr.mxu0 %v9479_v22 }
 0x35d   :  { %6960 = vmatpush3.msra.mxu1 %v8434_v29  ;;  %6953 = vmatpush3.msra.mxu0 %v8457_v32 }
 0x35e   :  { %6961 = vmatprep.subr.mxu1 %v9479_v22  ;;  %6968 = vmatprep.subr.mxu0 %v9479_v22 }
 0x35f   :  { %6962 = vmatpush3.msra.mxu1 %v8448_v30 }
 0x360   :  { %6963 = vmatprep.subr.mxu1 %v9479_v22 }
 0x361   :  { %6964 = vmatpush3.msra.mxu1 %v8462_v51 }
 0x362   :  { %6979 = vmatprep.subr.mxu1 %v9479_v22 }
 0x3f4   :  { %v1883_v38 = vpop.f32.mrf.mxu1  ;;  %v1957_v36 = vpop.f32.mrf.mxu0 }
 0x3f5   :  { %v1884_v52 = vadd.f32 %v8067_v34, %v1883_v38  ;;  %v1958_v7 = vadd.f32 %v8079_v45, %v1957_v36  ;;  %v6051_v34 = vld [vmem:[%s9456_s0 + $0x6] sm:$0x3] }
 0x3f6   :  { %v6857_v40 = vpop.f32.mrf.mxu1  ;;  %v6868_v42 = vpop.f32.mrf.mxu0 }
 0x3fd   :  { %v2031_v1 = vpop.f32.mrf.mxu1  ;;  %v2108_v62 = vpop.f32.mrf.mxu0 }
 0x3fe   :  { %v2109_v43 = vadd.f32 %v8072_v35, %v2108_v62  ;;  %v2032_v42 = vadd.f32 %v8104_v37, %v2031_v1 }
 0x3ff   :  { %v6879_v31 = vpop.f32.mrf.mxu1  ;;  %v6890_v0 = vpop.f32.mrf.mxu0 }
 0x400   :  { %v2260_v2 = vadd.f32 %v2109_v43, %v1884_v52 }
 0x402   :  { %v6048_v3 = vmul.f32 -1.442695, %v2260_v2 }
 0x404   :  { %7463 = vpow2.f32 %v6048_v3 }
 0x407   :  { %v2182_v4 = vpop.f32.mrf.mxu1  ;;  %v2256_v6 = vpop.f32.mrf.mxu0 }
 0x408   :  { %v2183_v9 = vadd.f32 %v8084_v46, %v2182_v4  ;;  %v2257_v36 = vadd.f32 %v8099_v33, %v2256_v6  ;;  %v8495_v33 = vld [vmem:[%s9461_s5 + $0x2] ss:$0 sm:$0xff] }
 0x409   :  { %v6901_v10 = vpop.f32.mrf.mxu1  ;;  %v6912_v11 = vpop.f32.mrf.mxu0 }
 0x40a   :  { %v2267_v12 = vadd.f32 %v2183_v9, %v1958_v7  ;;  %v6053_v10 = vld [vmem:[%s9458_s2 + $0x6] sm:$0x3] }
 0x40c   :  { %v6049_v13 = vmul.f32 -1.442695, %v2267_v12 }
 0x40e   :  { %7465 = vpow2.f32 %v6049_v13 }
 0x411   :  { %v7464_v14 = vpop.eup %7463  ;;  %v2359_v35 = vpop.f32.mrf.mxu1 }
 0x412   :  { %v2433_v16 = vpop.f32.mrf.mxu0  ;;  %v2264_v17 = vadd.f32 1.0, %v7464_v14  ;;  %v2360_v45 = vadd.f32 %v8478_v18, %v2359_v35 }
 0x413   :  { %v6923_v46 = vpop.f32.mrf.mxu1  ;;  %v2434_v5 = vadd.f32 %v8484_v20, %v2433_v16 }
 0x414   :  { %v6934_v19 = vpop.f32.mrf.mxu0  ;;  %7467 = vrcp.f32 %v2264_v17  ;;  %v2511_v15 = vadd.f32 %v6051_v34, %v2360_v45  ;;  %v8515_v45 = vld [vmem:[%s9462_s6 + $0x58] sm:$0xff] }
 0x415   :  { %v2518_v41 = vadd.f32 %v6052_v53, %v2434_v5  ;;  %v8520_v46 = vld [vmem:[%s9464_s8 + $0x18] sm:$0xff]  ;;  %v8534_v19 = vld [vmem:[%s9464_s8 + $0x10] sm:$0xff]  ;;  %v8548_v5 = vld [vmem:[%s9464_s8 + $0x8] sm:$0xff] }
 0x416   :  { %v6065_v21 = vmul.f32 -1.442695, %v2511_v15  ;;  %v8543_v15 = vld [vmem:[%s9462_s6 + $0x48] sm:$0xff]  ;;  %v8564_v53 = vld [vmem:[%s9464_s8] sm:$0xff] }
 0x417   :  { %v6066_v49 = vmul.f32 -1.442695, %v2518_v41  ;;  %v8577_v41 = vld [vmem:[%s9464_s8 + $0x38] sm:$0xff] }
 0x418   :  { %7469 = vpow2.f32 %v6065_v21  ;;  %v8557_v21 = vld [vmem:[%s9462_s6 + $0x40] sm:$0xff] }
 0x419   :  { %7471 = vpow2.f32 %v6066_v49  ;;  %v8607_v49 = vld [vmem:[%s9464_s8 + $0x28] sm:$0xff] }
 0x41a   :  { %v2507_v47 = vpop.f32.mrf.mxu1 }
 0x41b   :  { %v7466_v39 = vpop.eup %7465  ;;  %v2508_v6 = vadd.f32 %v8495_v33, %v2507_v47  ;;  %v8582_v47 = vld [vmem:[%s9464_s8 + $0x58] sm:$0xff] }
 0x41c   :  { %v6945_v48 = vpop.f32.mrf.mxu1  ;;  %v2271_v38 = vadd.f32 1.0, %v7466_v39  ;;  %v8593_v39 = vld [vmem:[%s9464_s8 + $0x30] sm:$0xff] }
 0x41d   :  { %v8598_v48 = vld [vmem:[%s9464_s8 + $0x50] sm:$0xff] }
 0x41e   :  { %7473 = vrcp.f32 %v2271_v38  ;;  %v8612_v38 = vld [vmem:[%s9464_s8 + $0x48] sm:$0xff] }
 0x421   :  { %v7468_v40 = vpop.eup %7467 }
 0x422   :  { %v2274_v62 = vmul.f32 %v7468_v40, %v2257_v36  ;;  %v8621_v36 = vld [vmem:[%s9464_s8 + $0x20] sm:$0xff] }
 0x423   :  { %v8628_v40 = vld [vmem:[%s9464_s8 + $0x40] sm:$0xff] }
 0x424   :  { %v2275_v52 = vadd.f32 %v2274_v62, %v2032_v42 }
 0x425   :  { %v7470_v43 = vpop.eup %7469 }
 0x426   :  { %7475 = vtanh.f32 %v2275_v52  ;;  %v2515_v31 = vadd.f32 1.0, %v7470_v43  ;;  %v7472_v0 = vpop.eup %7471 }
 0x427   :  { %v2522_v3 = vadd.f32 1.0, %v7472_v0 }
 0x428   :  { %7477 = vrcp.f32 %v2515_v31 }
 0x429   :  { %7479 = vrcp.f32 %v2522_v3 }
 0x42b   :  { %v7474_v2 = vpop.eup %7473 }
 0x42c   :  { %v2277_v4 = vsub.f32 1.0, %v7474_v2  ;;  %v2279_v1 = vmul.f32 %v7474_v2, %v8250_v25  ;;  %v8703_v2 = vld [vmem:[%s9463_s7] ss:$0 sm:$0xff] }
 0x433   :  { %v7476_v7 = vpop.eup %7475 }
 0x434   :  { %v2278_v37 = vmul.f32 %v7476_v7, %v2277_v4  ;;  %v8709_v4 = vld [vmem:[%s9465_s9] ss:$0 sm:$0xff] }
 0x435   :  { %v7478_v9 = vpop.eup %7477 }
 0x436   :  { %v2525_v11 = vmul.f32 %v7478_v9, %v2508_v6  ;;  %v8502_v12 = vadd.f32 %v2279_v1, %v2278_v37  ;;  %v7480_v14 = vpop.eup %7479 }
 0x437   :  { %v2528_v34 = vsub.f32 1.0, %v7480_v14  ;;  %v2530_v35 = vmul.f32 %v7480_v14, %v8258_v50  ;;  %v8529_v50 = vld [vmem:[%s9462_s6 + $0x50] sm:$0xff] }
 0x438   :  { %v2526_v13 = vadd.f32 %v6053_v10, %v2525_v11  ;;  %6050 = vst.msk [vmem:[%s9466_s10 + $0x4] sm:$0x3] %vm837_vm2, %v8502_v12 }
 0x43a   :  { %7481 = vtanh.f32 %v2526_v13  ;;  %v8715_v13 = vld [vmem:[%s9463_s7 + $0x1] ss:$0 sm:$0xff] }
 0x447   :  { %v7482_v25 = vpop.eup %7481 }
 0x448   :  { %v2529_v16 = vmul.f32 %v7482_v25, %v2528_v34  ;;  %v8721_v34 = vld [vmem:[%s9465_s9 + $0x1] ss:$0 sm:$0xff] }
 0x449   :  { %9483 = vst [vmem:[#allocation6_spill] sm:$0xff] %v8721_v34 }
 0x44a   :  { %v8510_v17 = vadd.f32 %v2530_v35, %v2529_v16 }
 0x44c   :  { %6955 = vmatmul.mubr.msk.f32.vlgmr.msra.gmra.mxu0 %vm117_vm1, %v8510_v17  ;;  %6966 = vmatmul.mubr.msk.f32.vlgmr.msra.gmra.mxu1 %vm117_vm1, %v8510_v17 }
 0x44d   :  { %6969 = vmatpush3.msra.mxu0 %v8515_v45  ;;  %6980 = vmatpush3.msra.mxu1 %v8520_v46 }
 0x44e   :  { %6970 = vmatprep.subr.mxu0 %v9479_v22  ;;  %6981 = vmatprep.subr.mxu1 %v9479_v22 }
 0x44f   :  { %6971 = vmatpush3.msra.mxu0 %v8529_v50  ;;  %6982 = vmatpush3.msra.mxu1 %v8534_v19 }
 0x450   :  { %6972 = vmatprep.subr.mxu0 %v9479_v22  ;;  %6983 = vmatprep.subr.mxu1 %v9479_v22 }
 0x451   :  { %6973 = vmatpush3.msra.mxu0 %v8543_v15  ;;  %6984 = vmatpush3.msra.mxu1 %v8548_v5 }
 0x452   :  { %6974 = vmatprep.subr.mxu0 %v9479_v22  ;;  %6985 = vmatprep.subr.mxu1 %v9479_v22 }
 0x453   :  { %6975 = vmatpush3.msra.mxu0 %v8557_v21  ;;  %6976 = vmatprep.mubr.msk.f32.mxu0 %vm7614_vm0, %v9479_v22 }
 0x454   :  { %6986 = vmatpush3.msra.mxu1 %v8564_v53  ;;  %6987 = vmatprep.mubr.msk.f32.mxu1 %vm7614_vm0, %v9479_v22 }
 0x455   :  { %6977 = vmatmul.mubr.msk.f32.vlgmr.msra.gmra.mxu0 %vm117_vm1, %v8510_v17  ;;  %6988 = vmatmul.mubr.msk.f32.vlgmr.msra.gmra.mxu1 %vm117_vm1, %v8502_v12 }
 0x456   :  { %6990 = vmatprep.subr.mxu0 %v9479_v22  ;;  %7001 = vmatprep.subr.mxu1 %v9479_v22 }
 0x457   :  { %6991 = vmatpush3.msra.mxu0 %v8577_v41  ;;  %7002 = vmatpush3.msra.mxu1 %v8582_v47 }
 0x458   :  { %6992 = vmatprep.subr.mxu0 %v9479_v22  ;;  %7003 = vmatprep.subr.mxu1 %v9479_v22 }
 0x459   :  { %6993 = vmatpush3.msra.mxu0 %v8593_v39  ;;  %7004 = vmatpush3.msra.mxu1 %v8598_v48 }
 0x45a   :  { %6994 = vmatprep.subr.mxu0 %v9479_v22  ;;  %7005 = vmatprep.subr.mxu1 %v9479_v22 }
 0x45b   :  { %6995 = vmatpush3.msra.mxu0 %v8607_v49  ;;  %7006 = vmatpush3.msra.mxu1 %v8612_v38 }
 0x45c   :  { %6996 = vmatprep.subr.mxu0 %v9479_v22  ;;  %7007 = vmatprep.subr.mxu1 %v9479_v22 }
 0x45d   :  { %6997 = vmatpush3.msra.mxu0 %v8621_v36  ;;  %6998 = vmatprep.mubr.msk.f32.mxu0 %vm7614_vm0, %v9479_v22 }
 0x45e   :  { %7008 = vmatpush3.msra.mxu1 %v8628_v40  ;;  %7009 = vmatprep.mubr.msk.f32.mxu1 %vm7614_vm0, %v9479_v22 }
 0x45f   :  { %6999 = vmatmul.mubr.msk.f32.vlgmr.msra.gmra.mxu0 %vm117_vm1, %v8502_v12  ;;  %7010 = vmatmul.mubr.msk.f32.vlgmr.msra.gmra.mxu1 %vm117_vm1, %v8502_v12 }
 0x460   :  { %7012 = vmatprep.subr.mxu0 %v9479_v22  ;;  %7023 = vmatprep.subr.mxu1 %v9479_v22 }
 0x461   :  { %7013 = vmatpush3.msra.mxu0 %v8309_v54  ;;  %7024 = vmatpush3.msra.mxu1 %v8314_v55 }
 0x462   :  { %7014 = vmatprep.subr.mxu0 %v9479_v22  ;;  %7025 = vmatprep.subr.mxu1 %v9479_v22 }
 0x463   :  { %7015 = vmatpush3.msra.mxu0 %v8325_v56  ;;  %7026 = vmatpush3.msra.mxu1 %v8330_v57 }
 0x464   :  { %7016 = vmatprep.subr.mxu0 %v9479_v22  ;;  %7027 = vmatprep.subr.mxu1 %v9479_v22 }
 0x465   :  { %7017 = vmatpush3.msra.mxu0 %v8339_v58  ;;  %7028 = vmatpush3.msra.mxu1 %v8344_v59 }
 0x466   :  { %7018 = vmatprep.subr.mxu0 %v9479_v22  ;;  %7029 = vmatprep.subr.mxu1 %v9479_v22 }
 0x467   :  { %7019 = vmatpush3.msra.mxu0 %v8353_v60  ;;  %7020 = vmatprep.mubr.msk.f32.mxu0 %vm7614_vm0, %v9479_v22 }
 0x468   :  { %7030 = vmatpush3.msra.mxu1 %v8360_v61  ;;  %7031 = vmatprep.mubr.msk.f32.mxu1 %vm7614_vm0, %v9479_v22 }
 0x469   :  { %7021 = vmatmul.mubr.msk.f32.vlgmr.msra.gmra.mxu0 %vm117_vm1, %v8510_v17  ;;  %7032 = vmatmul.mubr.msk.f32.vlgmr.msra.gmra.mxu1 %vm117_vm1, %v8510_v17 }
 0x46a   :  { %7034 = vmatprep.subr.mxu0 %v9479_v22  ;;  %7042 = vmatprep.mubr.msk.f32.mxu0 %vm7614_vm0, %v9479_v22 }
 0x46b   :  { %7035 = vmatpush3.msra.mxu0 %v8373_v63  ;;  %7045 = vmatprep.subr.mxu1 %v9479_v22 }
 0x46c   :  { %7036 = vmatprep.subr.mxu0 %v9479_v22  ;;  %7046 = vmatpush3.msra.mxu1 %v8415_v26 }
 0x46d   :  { %7037 = vmatpush3.msra.mxu0 %v8383_v8  ;;  %7047 = vmatprep.subr.mxu1 %v9479_v22 }
 0x46e   :  { %7038 = vmatprep.subr.mxu0 %v9479_v22  ;;  %7048 = vmatpush3.msra.mxu1 %v8429_v28 }
 0x46f   :  { %7039 = vmatpush3.msra.mxu0 %v8393_v23  ;;  %7049 = vmatprep.subr.mxu1 %v9479_v22 }
 0x470   :  { %7040 = vmatprep.subr.mxu0 %v9479_v22  ;;  %7050 = vmatpush3.msra.mxu1 %v8443_v44 }
 0x471   :  { %7041 = vmatpush3.msra.mxu0 %v8402_v24  ;;  %7051 = vmatprep.subr.mxu1 %v9479_v22 }
 0x472   :  { %7043 = vmatmul.mubr.msk.f32.vlgmr.msra.gmra.mxu0 %vm117_vm1, %v8510_v17  ;;  %7056 = vmatprep.subr.mxu0 %v9479_v22 }
 0x473   :  { %7057 = vmatpush3.msra.mxu0 %v8420_v27  ;;  %7052 = vmatpush3.msra.mxu1 %v8457_v32 }
 0x474   :  { %7058 = vmatprep.subr.mxu0 %v9479_v22  ;;  %7053 = vmatprep.mubr.msk.f32.mxu1 %vm7614_vm0, %v9479_v22 }
 0x475   :  { %7059 = vmatpush3.msra.mxu0 %v8434_v29  ;;  %7064 = vmatprep.mubr.msk.f32.mxu0 %vm7614_vm0, %v9479_v22 }
 0x476   :  { %7060 = vmatprep.subr.mxu0 %v9479_v22  ;;  %7067 = vmatprep.subr.mxu1 %v9479_v22 }
 0x477   :  { %7061 = vmatpush3.msra.mxu0 %v8448_v30 }
 0x478   :  { %7062 = vmatprep.subr.mxu0 %v9479_v22 }
 0x479   :  { %7063 = vmatpush3.msra.mxu0 %v8462_v51 }
 0x47a   :  { %7078 = vmatprep.subr.mxu0 %v9479_v22 }
 0x50c   :  { %v2605_v42 = vpop.f32.mrf.mxu0  ;;  %v2679_v62 = vpop.f32.mrf.mxu1 }
 0x50d   :  { %v2606_v3 = vadd.f32 %v8703_v2, %v2605_v42  ;;  %v2680_v14 = vadd.f32 %v8715_v13, %v2679_v62 }
 0x50e   :  { %v6956_v52 = vpop.f32.mrf.mxu0  ;;  %v6967_v43 = vpop.f32.mrf.mxu1 }
 0x515   :  { %v2753_v31 = vpop.f32.mrf.mxu0  ;;  %v2830_v0 = vpop.f32.mrf.mxu1 }
 0x516   :  { %v2831_v7 = vadd.f32 %v8709_v4, %v2830_v0  ;;  %v6092_v0 = vld [vmem:[%s9456_s0 + $0x8] sm:$0x3] }
 0x517   :  { %v6978_v6 = vpop.f32.mrf.mxu0  ;;  %v6989_v37 = vpop.f32.mrf.mxu1 }
 0x518   :  { %v2982_v1 = vadd.f32 %v2831_v7, %v2606_v3 }
 0x51a   :  { %v6089_v9 = vmul.f32 -1.442695, %v2982_v1 }
 0x51c   :  { %7483 = vpow2.f32 %v6089_v9 }
 0x51f   :  { %v2904_v10 = vpop.f32.mrf.mxu0  ;;  %v2978_v11 = vpop.f32.mrf.mxu1 }
 0x520   :  { %v2905_v25 = vadd.f32 %v8721_v34, %v2904_v10 }
 0x521   :  { %v7000_v35 = vpop.f32.mrf.mxu0  ;;  %v7011_v16 = vpop.f32.mrf.mxu1 }
 0x522   :  { %v2989_v42 = vadd.f32 %v2905_v25, %v2680_v14  ;;  %v6093_v14 = vld [vmem:[%s9457_s1 + $0x8] sm:$0x3] }
 0x524   :  { %v6090_v52 = vmul.f32 -1.442695, %v2989_v42 }
 0x526   :  { %7485 = vpow2.f32 %v6090_v52 }
 0x529   :  { %v7484_v43 = vpop.eup %7483  ;;  %v3081_v3 = vpop.f32.mrf.mxu0 }
 0x52a   :  { %v3155_v7 = vpop.f32.mrf.mxu1  ;;  %v2986_v62 = vadd.f32 1.0, %v7484_v43  ;;  %v3082_v6 = vadd.f32 %v8478_v18, %v3081_v3  ;;  %v8735_v3 = vld [vmem:[%s9465_s9 + $0x2] ss:$0 sm:$0xff] }
 0x52b   :  { %v7022_v37 = vpop.f32.mrf.mxu0  ;;  %v3156_v10 = vadd.f32 %v8484_v20, %v3155_v7  ;;  %9484 = vst [vmem:[#allocation7_spill] sm:$0xff] %v8735_v3 }
 0x52c   :  { %v7033_v1 = vpop.f32.mrf.mxu1  ;;  %7487 = vrcp.f32 %v2986_v62  ;;  %v3233_v9 = vadd.f32 %v6092_v0, %v3082_v6  ;;  %v2979_v0 = vadd.f32 %v8735_v3, %v2978_v11  ;;  %v8741_v62 = vld [vmem:[%s9463_s7 + $0x2] ss:$0 sm:$0xff] }
 0x52d   :  { %v3240_v25 = vadd.f32 %v6093_v14, %v3156_v10  ;;  %v2754_v6 = vadd.f32 %v8741_v62, %v2753_v31  ;;  %v6094_v31 = vld [vmem:[%s9458_s2 + $0x8] sm:$0x3] }
 0x52e   :  { %v6106_v35 = vmul.f32 -1.442695, %v3233_v9 }
 0x52f   :  { %v6107_v34 = vmul.f32 -1.442695, %v3240_v25 }
 0x530   :  { %7489 = vpow2.f32 %v6106_v35 }
 0x531   :  { %7491 = vpow2.f32 %v6107_v34 }
 0x532   :  { %v3229_v16 = vpop.f32.mrf.mxu0 }
 0x533   :  { %v7486_v42 = vpop.eup %7485  ;;  %v3230_v34 = vadd.f32 %v8495_v33, %v3229_v16 }
 0x534   :  { %v7044_v52 = vpop.f32.mrf.mxu0  ;;  %v2993_v43 = vadd.f32 1.0, %v7486_v42 }
 0x536   :  { %7493 = vrcp.f32 %v2993_v43 }
 0x539   :  { %v7488_v7 = vpop.eup %7487 }
 0x53a   :  { %v2996_v37 = vmul.f32 %v7488_v7, %v2979_v0 }
 0x53c   :  { %v2997_v1 = vadd.f32 %v2996_v37, %v2754_v6 }
 0x53d   :  { %v7490_v9 = vpop.eup %7489 }
 0x53e   :  { %7495 = vtanh.f32 %v2997_v1  ;;  %v3237_v10 = vadd.f32 1.0, %v7490_v9  ;;  %v7492_v35 = vpop.eup %7491 }
 0x53f   :  { %v3244_v25 = vadd.f32 1.0, %v7492_v35 }
 0x540   :  { %7497 = vrcp.f32 %v3237_v10 }
 0x541   :  { %7499 = vrcp.f32 %v3244_v25 }
 0x543   :  { %v7494_v14 = vpop.eup %7493 }
 0x544   :  { %v2999_v11 = vsub.f32 1.0, %v7494_v14  ;;  %v3001_v3 = vmul.f32 %v7494_v14, %v8502_v12 }
 0x54b   :  { %v7496_v42 = vpop.eup %7495 }
 0x54c   :  { %v3000_v52 = vmul.f32 %v7496_v42, %v2999_v11 }
 0x54d   :  { %v7498_v20 = vpop.eup %7497 }
 0x54e   :  { %v3247_v43 = vmul.f32 %v7498_v20, %v3230_v34  ;;  %v8749_v0 = vadd.f32 %v3001_v3, %v3000_v52  ;;  %v7500_v16 = vpop.eup %7499  ;;  %v6133_v3 = vld [vmem:[%s9456_s0 + $0xa] sm:$0x3] }
 0x54f   :  { %v3250_v6 = vsub.f32 1.0, %v7500_v16  ;;  %v3252_v37 = vmul.f32 %v7500_v16, %v8510_v17  ;;  %v9486_v52 = vld [vmem:[#allocation5_spill] sm:$0xff] }
 0x550   :  { %v3248_v7 = vadd.f32 %v6094_v31, %v3247_v43  ;;  %6091 = vst.msk [vmem:[%s9466_s10 + $0x6] sm:$0x3] %vm837_vm2, %v8749_v0 }
 0x552   :  { %7501 = vtanh.f32 %v3248_v7  ;;  %v6134_v7 = vld [vmem:[%s9457_s1 + $0xa] sm:$0x3] }
 0x55f   :  { %v7502_v12 = vpop.eup %7501 }
 0x560   :  { %v3251_v1 = vmul.f32 %v7502_v12, %v3250_v6 }
 0x562   :  { %v8757_v9 = vadd.f32 %v3252_v37, %v3251_v1 }
 0x564   :  { %7054 = vmatmul.mubr.msk.f32.vlgmr.msra.gmra.mxu1 %vm117_vm1, %v8757_v9  ;;  %7065 = vmatmul.mubr.msk.f32.vlgmr.msra.gmra.mxu0 %vm117_vm1, %v8757_v9 }
 0x565   :  { %7068 = vmatpush3.msra.mxu1 %v8515_v45  ;;  %7079 = vmatpush3.msra.mxu0 %v8520_v46 }
 0x566   :  { %7069 = vmatprep.subr.mxu1 %v9479_v22  ;;  %7080 = vmatprep.subr.mxu0 %v9479_v22 }
 0x567   :  { %7070 = vmatpush3.msra.mxu1 %v8529_v50  ;;  %7081 = vmatpush3.msra.mxu0 %v8534_v19 }
 0x568   :  { %7071 = vmatprep.subr.mxu1 %v9479_v22  ;;  %7082 = vmatprep.subr.mxu0 %v9479_v22 }
 0x569   :  { %7072 = vmatpush3.msra.mxu1 %v8543_v15  ;;  %7083 = vmatpush3.msra.mxu0 %v8548_v5 }
 0x56a   :  { %7073 = vmatprep.subr.mxu1 %v9479_v22  ;;  %7084 = vmatprep.subr.mxu0 %v9479_v22 }
 0x56b   :  { %7074 = vmatpush3.msra.mxu1 %v8557_v21  ;;  %7075 = vmatprep.mubr.msk.f32.mxu1 %vm7614_vm0, %v9479_v22 }
 0x56c   :  { %7085 = vmatpush3.msra.mxu0 %v8564_v53  ;;  %7086 = vmatprep.mubr.msk.f32.mxu0 %vm7614_vm0, %v9479_v22 }
 0x56d   :  { %7076 = vmatmul.mubr.msk.f32.vlgmr.msra.gmra.mxu1 %vm117_vm1, %v8757_v9  ;;  %7087 = vmatmul.mubr.msk.f32.vlgmr.msra.gmra.mxu0 %vm117_vm1, %v8749_v0 }
 0x56e   :  { %7089 = vmatprep.subr.mxu1 %v9479_v22  ;;  %7100 = vmatprep.subr.mxu0 %v9479_v22 }
 0x56f   :  { %7090 = vmatpush3.msra.mxu1 %v8577_v41  ;;  %7101 = vmatpush3.msra.mxu0 %v8582_v47 }
 0x570   :  { %7091 = vmatprep.subr.mxu1 %v9479_v22  ;;  %7102 = vmatprep.subr.mxu0 %v9479_v22 }
 0x571   :  { %7092 = vmatpush3.msra.mxu1 %v8593_v39  ;;  %7103 = vmatpush3.msra.mxu0 %v8598_v48 }
 0x572   :  { %7093 = vmatprep.subr.mxu1 %v9479_v22  ;;  %7104 = vmatprep.subr.mxu0 %v9479_v22 }
 0x573   :  { %7094 = vmatpush3.msra.mxu1 %v8607_v49  ;;  %7105 = vmatpush3.msra.mxu0 %v8612_v38 }
 0x574   :  { %7095 = vmatprep.subr.mxu1 %v9479_v22  ;;  %7106 = vmatprep.subr.mxu0 %v9479_v22 }
 0x575   :  { %7096 = vmatpush3.msra.mxu1 %v8621_v36  ;;  %7097 = vmatprep.mubr.msk.f32.mxu1 %vm7614_vm0, %v9479_v22 }
 0x576   :  { %7107 = vmatpush3.msra.mxu0 %v8628_v40  ;;  %7108 = vmatprep.mubr.msk.f32.mxu0 %vm7614_vm0, %v9479_v22 }
 0x577   :  { %7098 = vmatmul.mubr.msk.f32.vlgmr.msra.gmra.mxu1 %vm117_vm1, %v8749_v0  ;;  %7109 = vmatmul.mubr.msk.f32.vlgmr.msra.gmra.mxu0 %vm117_vm1, %v8749_v0 }
 0x578   :  { %7111 = vmatprep.subr.mxu1 %v9479_v22  ;;  %7122 = vmatprep.subr.mxu0 %v9479_v22 }
 0x579   :  { %7112 = vmatpush3.msra.mxu1 %v8309_v54  ;;  %7123 = vmatpush3.msra.mxu0 %v8314_v55 }
 0x57a   :  { %7113 = vmatprep.subr.mxu1 %v9479_v22  ;;  %7124 = vmatprep.subr.mxu0 %v9479_v22 }
 0x57b   :  { %7114 = vmatpush3.msra.mxu1 %v8325_v56  ;;  %7125 = vmatpush3.msra.mxu0 %v8330_v57 }
 0x57c   :  { %7115 = vmatprep.subr.mxu1 %v9479_v22  ;;  %7126 = vmatprep.subr.mxu0 %v9479_v22 }
 0x57d   :  { %7116 = vmatpush3.msra.mxu1 %v8339_v58  ;;  %7127 = vmatpush3.msra.mxu0 %v8344_v59 }
 0x57e   :  { %7117 = vmatprep.subr.mxu1 %v9479_v22  ;;  %7128 = vmatprep.subr.mxu0 %v9479_v22 }
 0x57f   :  { %7118 = vmatpush3.msra.mxu1 %v8353_v60  ;;  %7119 = vmatprep.mubr.msk.f32.mxu1 %vm7614_vm0, %v9479_v22 }
 0x580   :  { %7129 = vmatpush3.msra.mxu0 %v8360_v61  ;;  %7130 = vmatprep.mubr.msk.f32.mxu0 %vm7614_vm0, %v9479_v22 }
 0x581   :  { %7120 = vmatmul.mubr.msk.f32.vlgmr.msra.gmra.mxu1 %vm117_vm1, %v8757_v9  ;;  %7131 = vmatmul.mubr.msk.f32.vlgmr.msra.gmra.mxu0 %vm117_vm1, %v8757_v9 }
 0x582   :  { %7133 = vmatprep.subr.mxu1 %v9479_v22  ;;  %7141 = vmatprep.mubr.msk.f32.mxu1 %vm7614_vm0, %v9479_v22 }
 0x583   :  { %7134 = vmatpush3.msra.mxu1 %v8373_v63  ;;  %7144 = vmatprep.subr.mxu0 %v9479_v22 }
 0x584   :  { %7135 = vmatprep.subr.mxu1 %v9479_v22  ;;  %7145 = vmatpush3.msra.mxu0 %v8415_v26 }
 0x585   :  { %7136 = vmatpush3.msra.mxu1 %v8383_v8  ;;  %7146 = vmatprep.subr.mxu0 %v9479_v22 }
 0x586   :  { %7137 = vmatprep.subr.mxu1 %v9479_v22  ;;  %7147 = vmatpush3.msra.mxu0 %v8429_v28 }
 0x587   :  { %7138 = vmatpush3.msra.mxu1 %v8393_v23  ;;  %7148 = vmatprep.subr.mxu0 %v9479_v22 }
 0x588   :  { %7139 = vmatprep.subr.mxu1 %v9479_v22  ;;  %7149 = vmatpush3.msra.mxu0 %v8443_v44 }
 0x589   :  { %7140 = vmatpush3.msra.mxu1 %v8402_v24  ;;  %7150 = vmatprep.subr.mxu0 %v9479_v22 }
 0x58a   :  { %7142 = vmatmul.mubr.msk.f32.vlgmr.msra.gmra.mxu1 %vm117_vm1, %v8757_v9  ;;  %7155 = vmatprep.subr.mxu1 %v9479_v22 }
 0x58b   :  { %7156 = vmatpush3.msra.mxu1 %v8420_v27  ;;  %7151 = vmatpush3.msra.mxu0 %v8457_v32 }
 0x58c   :  { %7157 = vmatprep.subr.mxu1 %v9479_v22  ;;  %7152 = vmatprep.mubr.msk.f32.mxu0 %vm7614_vm0, %v9479_v22 }
 0x58d   :  { %7158 = vmatpush3.msra.mxu1 %v8434_v29  ;;  %7163 = vmatprep.mubr.msk.f32.mxu1 %vm7614_vm0, %v9479_v22  ;;  %v9485_v29 = vld [vmem:[#allocation6_spill] sm:$0xff] }
 0x58e   :  { %7159 = vmatprep.subr.mxu1 %v9479_v22  ;;  %7166 = vmatprep.subr.mxu0 %v9479_v22 }
 0x58f   :  { %7160 = vmatpush3.msra.mxu1 %v8448_v30 }
 0x590   :  { %7161 = vmatprep.subr.mxu1 %v9479_v22 }
 0x591   :  { %7162 = vmatpush3.msra.mxu1 %v8462_v51 }
 0x592   :  { %7177 = vmatprep.subr.mxu1 %v9479_v22 }
 0x624   :  { %v3327_v54 = vpop.f32.mrf.mxu1  ;;  %v3401_v55 = vpop.f32.mrf.mxu0 }
 0x625   :  { %v3328_v60 = vadd.f32 %v8703_v2, %v3327_v54  ;;  %v3402_v28 = vadd.f32 %v8715_v13, %v3401_v55  ;;  %v9487_v55 = vld [vmem:[#allocation7_spill] sm:$0xff] }
 0x626   :  { %v7055_v56 = vpop.f32.mrf.mxu1  ;;  %v7066_v57 = vpop.f32.mrf.mxu0 }
 0x62d   :  { %v3475_v58 = vpop.f32.mrf.mxu1  ;;  %v3552_v59 = vpop.f32.mrf.mxu0 }
 0x62e   :  { %v3553_v61 = vadd.f32 %v8709_v4, %v3552_v59  ;;  %v3476_v57 = vadd.f32 %v8741_v62, %v3475_v58  ;;  %v6135_v58 = vld [vmem:[%s9458_s2 + $0xa] sm:$0x3] }
 0x62f   :  { %v7077_v63 = vpop.f32.mrf.mxu1  ;;  %v7088_v8 = vpop.f32.mrf.mxu0 }
 0x630   :  { %v3704_v23 = vadd.f32 %v3553_v61, %v3328_v60 }
 0x632   :  { %v6130_v24 = vmul.f32 -1.442695, %v3704_v23 }
 0x634   :  { %7503 = vpow2.f32 %v6130_v24 }
 0x637   :  { %v3626_v26 = vpop.f32.mrf.mxu1  ;;  %v3700_v27 = vpop.f32.mrf.mxu0 }
 0x638   :  { %v3627_v44 = vadd.f32 %v9485_v29, %v3626_v26 }
 0x639   :  { %v7099_v30 = vpop.f32.mrf.mxu1  ;;  %v7110_v32 = vpop.f32.mrf.mxu0 }
 0x63a   :  { %v3711_v51 = vadd.f32 %v3627_v44, %v3402_v28 }
 0x63c   :  { %v6131_v20 = vmul.f32 -1.442695, %v3711_v51 }
 0x63e   :  { %7505 = vpow2.f32 %v6131_v20 }
 0x641   :  { %v7504_v17 = vpop.eup %7503  ;;  %v3803_v10 = vpop.f32.mrf.mxu1 }
 0x642   :  { %v3877_v35 = vpop.f32.mrf.mxu0  ;;  %v3708_v14 = vadd.f32 1.0, %v7504_v17  ;;  %v3804_v25 = vadd.f32 %v8478_v18, %v3803_v10  ;;  %v3701_v18 = vadd.f32 %v9487_v55, %v3700_v27 }
 0x643   :  { %v7121_v11 = vpop.f32.mrf.mxu1  ;;  %v3878_v31 = vadd.f32 %v9486_v52, %v3877_v35 }
 0x644   :  { %v7132_v42 = vpop.f32.mrf.mxu0  ;;  %7507 = vrcp.f32 %v3708_v14  ;;  %v3955_v34 = vadd.f32 %v6133_v3, %v3804_v25  ;;  %v9084_v25 = vld [vmem:[%s9462_s6 + $0x28] sm:$0xff]  ;;  %v9093_v11 = vld [vmem:[%s9462_s6] sm:$0xff] }
 0x645   :  { %v3962_v16 = vadd.f32 %v6134_v7, %v3878_v31  ;;  %v9098_v42 = vld [vmem:[%s9462_s6 + $0x20] sm:$0xff] }
 0x646   :  { %v6147_v43 = vmul.f32 -1.442695, %v3955_v34 }
 0x647   :  { %v6148_v1 = vmul.f32 -1.442695, %v3962_v16 }
 0x648   :  { %7509 = vpow2.f32 %v6147_v43 }
 0x649   :  { %7511 = vpow2.f32 %v6148_v1 }
 0x64a   :  { %v3951_v6 = vpop.f32.mrf.mxu1 }
 0x64b   :  { %v7506_v12 = vpop.eup %7505  ;;  %v3952_v44 = vadd.f32 %v8495_v33, %v3951_v6 }
 0x64c   :  { %v7143_v37 = vpop.f32.mrf.mxu1  ;;  %v3715_v54 = vadd.f32 1.0, %v7506_v12 }
 0x64e   :  { %7513 = vrcp.f32 %v3715_v54 }
 0x651   :  { %v7508_v56 = vpop.eup %7507 }
 0x652   :  { %v3718_v59 = vmul.f32 %v7508_v56, %v3701_v18 }
 0x654   :  { %v3719_v60 = vadd.f32 %v3718_v59, %v3476_v57 }
 0x655   :  { %v7510_v61 = vpop.eup %7509 }
 0x656   :  { %7515 = vtanh.f32 %v3719_v60  ;;  %v3959_v63 = vadd.f32 1.0, %v7510_v61  ;;  %v7512_v8 = vpop.eup %7511 }
 0x657   :  { %v3966_v24 = vadd.f32 1.0, %v7512_v8 }
 0x658   :  { %7517 = vrcp.f32 %v3959_v63 }
 0x659   :  { %7519 = vrcp.f32 %v3966_v24 }
 0x65b   :  { %v7514_v23 = vpop.eup %7513 }
 0x65c   :  { %v3721_v26 = vsub.f32 1.0, %v7514_v23  ;;  %v3723_v27 = vmul.f32 %v7514_v23, %v8749_v0 }
 0x663   :  { %v7516_v28 = vpop.eup %7515 }
 0x664   :  { %v3722_v30 = vmul.f32 %v7516_v28, %v3721_v26 }
 0x665   :  { %v7518_v32 = vpop.eup %7517 }
 0x666   :  { %v3969_v51 = vmul.f32 %v7518_v32, %v3952_v44  ;;  %v8886_v20 = vadd.f32 %v3723_v27, %v3722_v30  ;;  %v7520_v33 = vpop.eup %7519  ;;  %v9114_v44 = vld [vmem:[%s9461_s5] ss:$0 sm:$0xff]  ;;  %v9120_v32 = vld [vmem:[%s9461_s5 + $0x1] ss:$0 sm:$0xff] }
 0x667   :  { %v3972_v3 = vsub.f32 1.0, %v7520_v33  ;;  %v3974_v10 = vmul.f32 %v7520_v33, %v8757_v9  ;;  %v9079_v9 = vld [vmem:[%s9462_s6 + $0x8] sm:$0xff] }
 0x668   :  { %v3970_v17 = vadd.f32 %v6135_v58, %v3969_v51  ;;  %6132 = vst.msk [vmem:[%s9466_s10 + $0x8] sm:$0x3] %vm837_vm2, %v8886_v20 }
 0x66a   :  { %7521 = vtanh.f32 %v3970_v17  ;;  %v6175_v17 = vld [vmem:[%s9457_s1 + $0xc] sm:$0x3] }
 0x677   :  { %v7522_v0 = vpop.eup %7521 }
 0x678   :  { %v3973_v35 = vmul.f32 %v7522_v0, %v3972_v3 }
 0x67a   :  { %v8894_v14 = vadd.f32 %v3974_v10, %v3973_v35 }
 0x67c   :  { %7153 = vmatmul.mubr.msk.f32.vlgmr.msra.gmra.mxu0 %vm117_vm1, %v8894_v14  ;;  %7164 = vmatmul.mubr.msk.f32.vlgmr.msra.gmra.mxu1 %vm117_vm1, %v8894_v14 }
 0x67d   :  { %7167 = vmatpush3.msra.mxu0 %v8515_v45  ;;  %7178 = vmatpush3.msra.mxu1 %v8520_v46  ;;  %v8945_v45 = vld [vmem:[%s9460_s4 + $0x18] sm:$0xff] }
 0x67e   :  { %7168 = vmatprep.subr.mxu0 %v9479_v22  ;;  %7179 = vmatprep.subr.mxu1 %v9479_v22  ;;  %v8950_v46 = vld [vmem:[%s9460_s4 + $0x38] sm:$0xff] }
 0x67f   :  { %7169 = vmatpush3.msra.mxu0 %v8529_v50  ;;  %7180 = vmatpush3.msra.mxu1 %v8534_v19  ;;  %v8961_v50 = vld [vmem:[%s9460_s4 + $0x10] sm:$0xff] }
 0x680   :  { %7170 = vmatprep.subr.mxu0 %v9479_v22  ;;  %7181 = vmatprep.subr.mxu1 %v9479_v22  ;;  %v8966_v19 = vld [vmem:[%s9460_s4 + $0x30] sm:$0xff] }
 0x681   :  { %7171 = vmatpush3.msra.mxu0 %v8543_v15  ;;  %7182 = vmatpush3.msra.mxu1 %v8548_v5  ;;  %v8975_v15 = vld [vmem:[%s9460_s4 + $0x8] sm:$0xff] }
 0x682   :  { %7172 = vmatprep.subr.mxu0 %v9479_v22  ;;  %7183 = vmatprep.subr.mxu1 %v9479_v22  ;;  %v8980_v5 = vld [vmem:[%s9460_s4 + $0x28] sm:$0xff] }
 0x683   :  { %7173 = vmatpush3.msra.mxu0 %v8557_v21  ;;  %7174 = vmatprep.mubr.msk.f32.mxu0 %vm7614_vm0, %v9479_v22  ;;  %v8989_v21 = vld [vmem:[%s9460_s4] sm:$0xff] }
 0x684   :  { %7184 = vmatpush3.msra.mxu1 %v8564_v53  ;;  %7185 = vmatprep.mubr.msk.f32.mxu1 %vm7614_vm0, %v9479_v22  ;;  %v8996_v53 = vld [vmem:[%s9460_s4 + $0x20] sm:$0xff] }
 0x685   :  { %7175 = vmatmul.mubr.msk.f32.vlgmr.msra.gmra.mxu0 %vm117_vm1, %v8894_v14  ;;  %7186 = vmatmul.mubr.msk.f32.vlgmr.msra.gmra.mxu1 %vm117_vm1, %v8886_v20 }
 0x686   :  { %7188 = vmatprep.subr.mxu0 %v9479_v22  ;;  %7199 = vmatprep.subr.mxu1 %v9479_v22 }
 0x687   :  { %7189 = vmatpush3.msra.mxu0 %v8577_v41  ;;  %7200 = vmatpush3.msra.mxu1 %v8582_v47  ;;  %v9009_v41 = vld [vmem:[%s9460_s4 + $0x58] sm:$0xff]  ;;  %v9019_v47 = vld [vmem:[%s9460_s4 + $0x50] sm:$0xff] }
 0x688   :  { %7190 = vmatprep.subr.mxu0 %v9479_v22  ;;  %7201 = vmatprep.subr.mxu1 %v9479_v22 }
 0x689   :  { %7191 = vmatpush3.msra.mxu0 %v8593_v39  ;;  %7202 = vmatpush3.msra.mxu1 %v8598_v48  ;;  %v9029_v39 = vld [vmem:[%s9460_s4 + $0x48] sm:$0xff]  ;;  %v9038_v48 = vld [vmem:[%s9460_s4 + $0x40] sm:$0xff] }
 0x68a   :  { %7192 = vmatprep.subr.mxu0 %v9479_v22  ;;  %7203 = vmatprep.subr.mxu1 %v9479_v22 }
 0x68b   :  { %7193 = vmatpush3.msra.mxu0 %v8607_v49  ;;  %7204 = vmatpush3.msra.mxu1 %v8612_v38  ;;  %v9051_v49 = vld [vmem:[%s9462_s6 + $0x18] sm:$0xff] }
 0x68c   :  { %7194 = vmatprep.subr.mxu0 %v9479_v22  ;;  %7205 = vmatprep.subr.mxu1 %v9479_v22  ;;  %v9056_v38 = vld [vmem:[%s9462_s6 + $0x38] sm:$0xff] }
 0x68d   :  { %7195 = vmatpush3.msra.mxu0 %v8621_v36  ;;  %7196 = vmatprep.mubr.msk.f32.mxu0 %vm7614_vm0, %v9479_v22  ;;  %v9065_v36 = vld [vmem:[%s9462_s6 + $0x10] sm:$0xff] }
 0x68e   :  { %7206 = vmatpush3.msra.mxu1 %v8628_v40  ;;  %7207 = vmatprep.mubr.msk.f32.mxu1 %vm7614_vm0, %v9479_v22  ;;  %v9070_v40 = vld [vmem:[%s9462_s6 + $0x30] sm:$0xff] }
 0x68f   :  { %7197 = vmatmul.mubr.msk.f32.vlgmr.msra.gmra.mxu0 %vm117_vm1, %v8886_v20  ;;  %7208 = vmatmul.mubr.msk.f32.vlgmr.msra.gmra.mxu1 %vm117_vm1, %v8886_v20 }
 0x690   :  { %7210 = vmatprep.subr.mxu0 %v9479_v22  ;;  %7221 = vmatprep.subr.mxu1 %v9479_v22 }
 0x691   :  { %7211 = vmatpush3.msra.mxu0 %v8945_v45  ;;  %7222 = vmatpush3.msra.mxu1 %v8950_v46 }
 0x692   :  { %7212 = vmatprep.subr.mxu0 %v9479_v22  ;;  %7223 = vmatprep.subr.mxu1 %v9479_v22 }
 0x693   :  { %7213 = vmatpush3.msra.mxu0 %v8961_v50  ;;  %7224 = vmatpush3.msra.mxu1 %v8966_v19 }
 0x694   :  { %7214 = vmatprep.subr.mxu0 %v9479_v22  ;;  %7225 = vmatprep.subr.mxu1 %v9479_v22 }
 0x695   :  { %7215 = vmatpush3.msra.mxu0 %v8975_v15  ;;  %7226 = vmatpush3.msra.mxu1 %v8980_v5 }
 0x696   :  { %7216 = vmatprep.subr.mxu0 %v9479_v22  ;;  %7227 = vmatprep.subr.mxu1 %v9479_v22 }
 0x697   :  { %7217 = vmatpush3.msra.mxu0 %v8989_v21  ;;  %7218 = vmatprep.mubr.msk.f32.mxu0 %vm7614_vm0, %v9479_v22 }
 0x698   :  { %7228 = vmatpush3.msra.mxu1 %v8996_v53  ;;  %7229 = vmatprep.mubr.msk.f32.mxu1 %vm7614_vm0, %v9479_v22 }
 0x699   :  { %7219 = vmatmul.mubr.msk.f32.vlgmr.msra.gmra.mxu0 %vm117_vm1, %v8894_v14  ;;  %7230 = vmatmul.mubr.msk.f32.vlgmr.msra.gmra.mxu1 %vm117_vm1, %v8894_v14 }
 0x69a   :  { %7232 = vmatprep.subr.mxu0 %v9479_v22  ;;  %7240 = vmatprep.mubr.msk.f32.mxu0 %vm7614_vm0, %v9479_v22 }
 0x69b   :  { %7233 = vmatpush3.msra.mxu0 %v9009_v41  ;;  %7243 = vmatprep.subr.mxu1 %v9479_v22 }
 0x69c   :  { %7234 = vmatprep.subr.mxu0 %v9479_v22  ;;  %7251 = vmatprep.mubr.msk.f32.mxu1 %vm7614_vm0, %v9479_v22 }
 0x69d   :  { %7235 = vmatpush3.msra.mxu0 %v9019_v47  ;;  %7244 = vmatpush3.msra.mxu1 %v9051_v49 }
 0x69e   :  { %7236 = vmatprep.subr.mxu0 %v9479_v22  ;;  %7245 = vmatprep.subr.mxu1 %v9479_v22 }
 0x69f   :  { %7237 = vmatpush3.msra.mxu0 %v9029_v39  ;;  %7246 = vmatpush3.msra.mxu1 %v9065_v36 }
 0x6a0   :  { %7238 = vmatprep.subr.mxu0 %v9479_v22  ;;  %7247 = vmatprep.subr.mxu1 %v9479_v22 }
 0x6a1   :  { %7239 = vmatpush3.msra.mxu0 %v9038_v48  ;;  %7248 = vmatpush3.msra.mxu1 %v9079_v9 }
 0x6a2   :  { %7241 = vmatmul.mubr.msk.f32.vlgmr.msra.gmra.mxu0 %vm117_vm1, %v8894_v14  ;;  %7254 = vmatprep.subr.mxu0 %v9479_v22 }
 0x6a3   :  { %7262 = vmatprep.mubr.msk.f32.mxu0 %vm7614_vm0, %v9479_v22  ;;  %7255 = vmatpush3.msra.mxu0 %v9056_v38 }
 0x6a4   :  { %7256 = vmatprep.subr.mxu0 %v9479_v22  ;;  %7249 = vmatprep.subr.mxu1 %v9479_v22 }
 0x6a5   :  { %7257 = vmatpush3.msra.mxu0 %v9070_v40  ;;  %7250 = vmatpush3.msra.mxu1 %v9093_v11 }
 0x6a6   :  { %7258 = vmatprep.subr.mxu0 %v9479_v22  ;;  %7265 = vmatprep.subr.mxu1 %v9479_v22 }
 0x6a7   :  { %7259 = vmatpush3.msra.mxu0 %v9084_v25 }
 0x6a8   :  { %7260 = vmatprep.subr.mxu0 %v9479_v22 }
 0x6a9   :  { %7261 = vmatpush3.msra.mxu0 %v9098_v42 }
 0x6aa   :  { %7276 = vmatprep.subr.mxu0 %v9479_v22 }
 0x73c   :  { %v4049_v34 = vpop.f32.mrf.mxu0  ;;  %v4123_v52 = vpop.f32.mrf.mxu1 }
 0x73d   :  { %v4050_v6 = vadd.f32 %v8703_v2, %v4049_v34  ;;  %v4124_v59 = vadd.f32 %v8715_v13, %v4123_v52  ;;  %v6174_v2 = vld [vmem:[%s9456_s0 + $0xc] sm:$0x3] }
 0x73e   :  { %v7154_v31 = vpop.f32.mrf.mxu0  ;;  %v7165_v43 = vpop.f32.mrf.mxu1 }
 0x745   :  { %v4197_v7 = vpop.f32.mrf.mxu0  ;;  %v4274_v16 = vpop.f32.mrf.mxu1 }
 0x746   :  { %v4275_v12 = vadd.f32 %v8709_v4, %v4274_v16  ;;  %v4198_v43 = vadd.f32 %v8741_v62, %v4197_v7 }
 0x747   :  { %v7176_v37 = vpop.f32.mrf.mxu0  ;;  %v7187_v1 = vpop.f32.mrf.mxu1 }
 0x748   :  { %v4426_v54 = vadd.f32 %v4275_v12, %v4050_v6 }
 0x74a   :  { %v6171_v18 = vmul.f32 -1.442695, %v4426_v54 }
 0x74c   :  { %7523 = vpow2.f32 %v6171_v18 }
 0x74f   :  { %v4348_v56 = vpop.f32.mrf.mxu0  ;;  %v4422_v57 = vpop.f32.mrf.mxu1 }
 0x750   :  { %v4349_v60 = vadd.f32 %v9485_v29, %v4348_v56  ;;  %v4423_v52 = vadd.f32 %v9487_v55, %v4422_v57  ;;  %v9131_v55 = vld [vmem:[%s9461_s5 + $0x2] ss:$0 sm:$0xff] }
 0x751   :  { %v7198_v61 = vpop.f32.mrf.mxu0  ;;  %v7209_v63 = vpop.f32.mrf.mxu1 }
 0x752   :  { %v4433_v8 = vadd.f32 %v4349_v60, %v4124_v59  ;;  %v6176_v61 = vld [vmem:[%s9458_s2 + $0xc] sm:$0x3] }
 0x754   :  { %v6172_v23 = vmul.f32 -1.442695, %v4433_v8 }
 0x756   :  { %7525 = vpow2.f32 %v6172_v23 }
 0x759   :  { %v7524_v24 = vpop.eup %7523  ;;  %v4525_v4 = vpop.f32.mrf.mxu0 }
 0x75a   :  { %v4599_v26 = vpop.f32.mrf.mxu1  ;;  %v4430_v28 = vadd.f32 1.0, %v7524_v24  ;;  %v4526_v13 = vadd.f32 %v9114_v44, %v4525_v4 }
 0x75b   :  { %v7220_v29 = vpop.f32.mrf.mxu0  ;;  %v4600_v58 = vadd.f32 %v9120_v32, %v4599_v26 }
 0x75c   :  { %v7231_v30 = vpop.f32.mrf.mxu1  ;;  %7527 = vrcp.f32 %v4430_v28  ;;  %v4677_v27 = vadd.f32 %v6174_v2, %v4526_v13  ;;  %v9151_v13 = vld [vmem:[%s9462_s6 + $0x58] sm:$0xff] }
 0x75d   :  { %v4684_v33 = vadd.f32 %v6175_v17, %v4600_v58  ;;  %v9156_v29 = vld [vmem:[%s9464_s8 + $0x18] sm:$0xff]  ;;  %v9170_v30 = vld [vmem:[%s9464_s8 + $0x10] sm:$0xff]  ;;  %v9184_v58 = vld [vmem:[%s9464_s8 + $0x8] sm:$0xff] }
 0x75e   :  { %v6188_v51 = vmul.f32 -1.442695, %v4677_v27  ;;  %v9179_v27 = vld [vmem:[%s9462_s6 + $0x48] sm:$0xff]  ;;  %v9200_v17 = vld [vmem:[%s9464_s8] sm:$0xff] }
 0x75f   :  { %v6189_v35 = vmul.f32 -1.442695, %v4684_v33  ;;  %v9213_v33 = vld [vmem:[%s9464_s8 + $0x38] sm:$0xff] }
 0x760   :  { %7529 = vpow2.f32 %v6188_v51  ;;  %v9193_v51 = vld [vmem:[%s9462_s6 + $0x40] sm:$0xff] }
 0x761   :  { %7531 = vpow2.f32 %v6189_v35  ;;  %v9243_v35 = vld [vmem:[%s9464_s8 + $0x28] sm:$0xff] }
 0x762   :  { %v4673_v3 = vpop.f32.mrf.mxu0 }
 0x763   :  { %v7526_v0 = vpop.eup %7525  ;;  %v4674_v57 = vadd.f32 %v9131_v55, %v4673_v3  ;;  %v9218_v3 = vld [vmem:[%s9464_s8 + $0x58] sm:$0xff] }
 0x764   :  { %v7242_v10 = vpop.f32.mrf.mxu0  ;;  %v4437_v34 = vadd.f32 1.0, %v7526_v0  ;;  %v9229_v0 = vld [vmem:[%s9464_s8 + $0x30] sm:$0xff] }
 0x765   :  { %v9234_v10 = vld [vmem:[%s9464_s8 + $0x50] sm:$0xff] }
 0x766   :  { %7533 = vrcp.f32 %v4437_v34  ;;  %v9248_v34 = vld [vmem:[%s9464_s8 + $0x48] sm:$0xff] }
 0x769   :  { %v7528_v31 = vpop.eup %7527 }
 0x76a   :  { %v4440_v16 = vmul.f32 %v7528_v31, %v4423_v52  ;;  %v9257_v52 = vld [vmem:[%s9464_s8 + $0x20] sm:$0xff] }
 0x76b   :  { %v9264_v31 = vld [vmem:[%s9464_s8 + $0x40] sm:$0xff] }
 0x76c   :  { %v4441_v6 = vadd.f32 %v4440_v16, %v4198_v43 }
 0x76d   :  { %v7530_v12 = vpop.eup %7529 }
 0x76e   :  { %7535 = vtanh.f32 %v4441_v6  ;;  %v4681_v37 = vadd.f32 1.0, %v7530_v12  ;;  %v7532_v1 = vpop.eup %7531 }
 0x76f   :  { %v4688_v18 = vadd.f32 1.0, %v7532_v1  ;;  %v6215_v1 = vld [vmem:[%s9456_s0 + $0xe] sm:$0x3] }
 0x770   :  { %7537 = vrcp.f32 %v4681_v37 }
 0x771   :  { %7539 = vrcp.f32 %v4688_v18 }
 0x773   :  { %v7534_v54 = vpop.eup %7533 }
 0x774   :  { %v4443_v56 = vsub.f32 1.0, %v7534_v54  ;;  %v4445_v7 = vmul.f32 %v7534_v54, %v8886_v20 }
 0x77b   :  { %v7536_v59 = vpop.eup %7535 }
 0x77c   :  { %v4444_v62 = vmul.f32 %v7536_v59, %v4443_v56 }
 0x77d   :  { %v7538_v60 = vpop.eup %7537 }
 0x77e   :  { %v4691_v63 = vmul.f32 %v7538_v60, %v4674_v57  ;;  %v9138_v8 = vadd.f32 %v4445_v7, %v4444_v62  ;;  %v7540_v24 = vpop.eup %7539 }
 0x77f   :  { %v4694_v2 = vsub.f32 1.0, %v7540_v24  ;;  %v4696_v4 = vmul.f32 %v7540_v24, %v8894_v14  ;;  %v9165_v14 = vld [vmem:[%s9462_s6 + $0x50] sm:$0xff] }
 0x780   :  { %v4692_v23 = vadd.f32 %v6176_v61, %v4691_v63  ;;  %6173 = vst.msk [vmem:[%s9466_s10 + $0xa] sm:$0x3] %vm837_vm2, %v9138_v8  ;;  %v6216_v63 = vld [vmem:[%s9457_s1 + $0xe] sm:$0x3] }
 0x782   :  { %7541 = vtanh.f32 %v4692_v23 }
 0x78f   :  { %v7542_v20 = vpop.eup %7541 }
 0x790   :  { %v4695_v26 = vmul.f32 %v7542_v20, %v4694_v2 }
 0x792   :  { %v9146_v28 = vadd.f32 %v4696_v4, %v4695_v26 }
 0x794   :  { %7252 = vmatmul.mubr.msk.f32.vlgmr.msra.gmra.mxu1 %vm117_vm1, %v9146_v28  ;;  %7263 = vmatmul.mubr.msk.f32.vlgmr.msra.gmra.mxu0 %vm117_vm1, %v9146_v28 }
 0x795   :  { %7266 = vmatpush3.msra.mxu1 %v9151_v13  ;;  %7277 = vmatpush3.msra.mxu0 %v9156_v29 }
 0x796   :  { %7267 = vmatprep.subr.mxu1 %v9479_v22  ;;  %7278 = vmatprep.subr.mxu0 %v9479_v22 }
 0x797   :  { %7268 = vmatpush3.msra.mxu1 %v9165_v14  ;;  %7279 = vmatpush3.msra.mxu0 %v9170_v30 }
 0x798   :  { %7269 = vmatprep.subr.mxu1 %v9479_v22  ;;  %7280 = vmatprep.subr.mxu0 %v9479_v22 }
 0x799   :  { %7270 = vmatpush3.msra.mxu1 %v9179_v27  ;;  %7281 = vmatpush3.msra.mxu0 %v9184_v58 }
 0x79a   :  { %7271 = vmatprep.subr.mxu1 %v9479_v22  ;;  %7282 = vmatprep.subr.mxu0 %v9479_v22 }
 0x79b   :  { %7272 = vmatpush3.msra.mxu1 %v9193_v51  ;;  %7273 = vmatprep.mubr.msk.f32.mxu1 %vm7614_vm0, %v9479_v22 }
 0x79c   :  { %7283 = vmatpush3.msra.mxu0 %v9200_v17  ;;  %7284 = vmatprep.mubr.msk.f32.mxu0 %vm7614_vm0, %v9479_v22 }
 0x79d   :  { %7274 = vmatmul.mubr.msk.f32.vlgmr.msra.gmra.mxu1 %vm117_vm1, %v9146_v28  ;;  %7285 = vmatmul.mubr.msk.f32.vlgmr.msra.gmra.mxu0 %vm117_vm1, %v9138_v8 }
 0x79e   :  { %7287 = vmatprep.subr.mxu1 %v9479_v22  ;;  %7298 = vmatprep.subr.mxu0 %v9479_v22 }
 0x79f   :  { %7288 = vmatpush3.msra.mxu1 %v9213_v33  ;;  %7299 = vmatpush3.msra.mxu0 %v9218_v3 }
 0x7a0   :  { %7289 = vmatprep.subr.mxu1 %v9479_v22  ;;  %7300 = vmatprep.subr.mxu0 %v9479_v22 }
 0x7a1   :  { %7290 = vmatpush3.msra.mxu1 %v9229_v0  ;;  %7301 = vmatpush3.msra.mxu0 %v9234_v10 }
 0x7a2   :  { %7291 = vmatprep.subr.mxu1 %v9479_v22  ;;  %7302 = vmatprep.subr.mxu0 %v9479_v22 }
 0x7a3   :  { %7292 = vmatpush3.msra.mxu1 %v9243_v35  ;;  %7303 = vmatpush3.msra.mxu0 %v9248_v34 }
 0x7a4   :  { %7293 = vmatprep.subr.mxu1 %v9479_v22  ;;  %7304 = vmatprep.subr.mxu0 %v9479_v22 }
 0x7a5   :  { %7294 = vmatpush3.msra.mxu1 %v9257_v52  ;;  %7295 = vmatprep.mubr.msk.f32.mxu1 %vm7614_vm0, %v9479_v22 }
 0x7a6   :  { %7305 = vmatpush3.msra.mxu0 %v9264_v31  ;;  %7306 = vmatprep.mubr.msk.f32.mxu0 %vm7614_vm0, %v9479_v22 }
 0x7a7   :  { %7296 = vmatmul.mubr.msk.f32.vlgmr.msra.gmra.mxu1 %vm117_vm1, %v9138_v8  ;;  %7307 = vmatmul.mubr.msk.f32.vlgmr.msra.gmra.mxu0 %vm117_vm1, %v9138_v8 }
 0x7a8   :  { %7309 = vmatprep.subr.mxu1 %v9479_v22  ;;  %7320 = vmatprep.subr.mxu0 %v9479_v22 }
 0x7a9   :  { %7310 = vmatpush3.msra.mxu1 %v8945_v45  ;;  %7321 = vmatpush3.msra.mxu0 %v8950_v46 }
 0x7aa   :  { %7311 = vmatprep.subr.mxu1 %v9479_v22  ;;  %7322 = vmatprep.subr.mxu0 %v9479_v22 }
 0x7ab   :  { %7312 = vmatpush3.msra.mxu1 %v8961_v50  ;;  %7323 = vmatpush3.msra.mxu0 %v8966_v19 }
 0x7ac   :  { %7313 = vmatprep.subr.mxu1 %v9479_v22  ;;  %7324 = vmatprep.subr.mxu0 %v9479_v22 }
 0x7ad   :  { %7314 = vmatpush3.msra.mxu1 %v8975_v15  ;;  %7325 = vmatpush3.msra.mxu0 %v8980_v5 }
 0x7ae   :  { %7315 = vmatprep.subr.mxu1 %v9479_v22  ;;  %7326 = vmatprep.subr.mxu0 %v9479_v22 }
 0x7af   :  { %7316 = vmatpush3.msra.mxu1 %v8989_v21  ;;  %7317 = vmatprep.mubr.msk.f32.mxu1 %vm7614_vm0, %v9479_v22  ;;  %v9339_v21 = vld [vmem:[%s9463_s7] ss:$0 sm:$0xff] }
 0x7b0   :  { %7327 = vmatpush3.msra.mxu0 %v8996_v53  ;;  %7328 = vmatprep.mubr.msk.f32.mxu0 %vm7614_vm0, %v9479_v22 }
 0x7b1   :  { %7318 = vmatmul.mubr.msk.f32.vlgmr.msra.gmra.mxu1 %vm117_vm1, %v9146_v28  ;;  %7329 = vmatmul.mubr.msk.f32.vlgmr.msra.gmra.mxu0 %vm117_vm1, %v9146_v28 }
 0x7b2   :  { %7331 = vmatprep.subr.mxu1 %v9479_v22  ;;  %7339 = vmatprep.mubr.msk.f32.mxu1 %vm7614_vm0, %v9479_v22 }
 0x7b3   :  { %7332 = vmatpush3.msra.mxu1 %v9009_v41  ;;  %7342 = vmatprep.subr.mxu0 %v9479_v22  ;;  %v9345_v41 = vld [vmem:[%s9465_s9] ss:$0 sm:$0xff] }
 0x7b4   :  { %7333 = vmatprep.subr.mxu1 %v9479_v22  ;;  %7343 = vmatpush3.msra.mxu0 %v9051_v49 }
 0x7b5   :  { %7334 = vmatpush3.msra.mxu1 %v9019_v47  ;;  %7344 = vmatprep.subr.mxu0 %v9479_v22 }
 0x7b6   :  { %7335 = vmatprep.subr.mxu1 %v9479_v22  ;;  %7345 = vmatpush3.msra.mxu0 %v9065_v36 }
 0x7b7   :  { %7336 = vmatpush3.msra.mxu1 %v9029_v39  ;;  %7346 = vmatprep.subr.mxu0 %v9479_v22 }
 0x7b8   :  { %7337 = vmatprep.subr.mxu1 %v9479_v22  ;;  %7347 = vmatpush3.msra.mxu0 %v9079_v9  ;;  %v9351_v9 = vld [vmem:[%s9463_s7 + $0x1] ss:$0 sm:$0xff] }
 0x7b9   :  { %7338 = vmatpush3.msra.mxu1 %v9038_v48  ;;  %7348 = vmatprep.subr.mxu0 %v9479_v22 }
 0x7ba   :  { %7340 = vmatmul.mubr.msk.f32.vlgmr.msra.gmra.mxu1 %vm117_vm1, %v9146_v28  ;;  %7353 = vmatprep.subr.mxu1 %v9479_v22 }
 0x7bb   :  { %7354 = vmatpush3.msra.mxu1 %v9056_v38  ;;  %7349 = vmatpush3.msra.mxu0 %v9093_v11  ;;  %v9357_v11 = vld [vmem:[%s9465_s9 + $0x1] ss:$0 sm:$0xff] }
 0x7bc   :  { %7355 = vmatprep.subr.mxu1 %v9479_v22  ;;  %7350 = vmatprep.mubr.msk.f32.mxu0 %vm7614_vm0, %v9479_v22 }
 0x7bd   :  { %7356 = vmatpush3.msra.mxu1 %v9070_v40  ;;  %7361 = vmatprep.mubr.msk.f32.mxu1 %vm7614_vm0, %v9479_v22 }
 0x7be   :  { %7357 = vmatprep.subr.mxu1 %v9479_v22  ;;  %7364 = vmatprep.subr.mxu0 %v9479_v22 }
 0x7bf   :  { %7358 = vmatpush3.msra.mxu1 %v9084_v25 }
 0x7c0   :  { %7359 = vmatprep.subr.mxu1 %v9479_v22 }
 0x7c1   :  { %7360 = vmatpush3.msra.mxu1 %v9098_v42 }
 0x7c2   :  { %7375 = vmatprep.subr.mxu1 %v9479_v22 }
 0x854   :  { %v4771_v45 = vpop.f32.mrf.mxu1  ;;  %v4845_v46 = vpop.f32.mrf.mxu0 }
 0x855   :  { %v4772_v53 = vadd.f32 %v9339_v21, %v4771_v45  ;;  %v4846_v25 = vadd.f32 %v9351_v9, %v4845_v46  ;;  %v9377_v46 = vld [vmem:[%s9463_s7 + $0x2] ss:$0 sm:$0xff] }
 0x856   :  { %v7253_v50 = vpop.f32.mrf.mxu1  ;;  %v7264_v19 = vpop.f32.mrf.mxu0 }
 0x85d   :  { %v4919_v15 = vpop.f32.mrf.mxu1  ;;  %v4996_v5 = vpop.f32.mrf.mxu0 }
 0x85e   :  { %v4997_v47 = vadd.f32 %v9345_v41, %v4996_v5  ;;  %v4920_v50 = vadd.f32 %v9377_v46, %v4919_v15  ;;  %v6217_v15 = vld [vmem:[%s9458_s2 + $0xe] sm:$0x3]  ;;  %s7615_s2 = smov [#allocation2]  }
 0x85f   :  { %v7275_v39 = vpop.f32.mrf.mxu1  ;;  %v7286_v48 = vpop.f32.mrf.mxu0  ;;  %s5903_s22 = sshll.u32 %s7615_s2, 4  ;;  %s5904_s22 = int_to_ptr.vmem [resolvable:$true] %s5903_s22 }
 0x860   :  { %v5148_v49 = vadd.f32 %v4997_v47, %v4772_v53  ;;  %s7591_s25 = scalar_lea.vmem %s5904_s22, 64  ;;  %p7596_p1 = scmp.lt.s32.totalorder %s5904_s22, %s5904_s22 }
 0x861   :  { %p7592_p0 = scmp.ne.s32.totalorder %s5904_s22, %s7591_s25  ;;  %p7597_p2 = scmp.lt.s32.totalorder %s7591_s25, %s7591_s25 }
 0x862   :  { %v6212_v38 = vmul.f32 -1.442695, %v5148_v49 }
 0x863   :  { %p7598_p3 = por %p7597_p2, %p7596_p1 }
 0x864   :  { %7543 = vpow2.f32 %v6212_v38 }
 0x865   :  { %p7599_p4 = pnand %p7598_p3, %p7592_p0 }
 0x867   :  { %v5070_v36 = vpop.f32.mrf.mxu1  ;;  %v5144_v40 = vpop.f32.mrf.mxu0 }
 0x868   :  { %v5071_v42 = vadd.f32 %v9357_v11, %v5070_v36 }
 0x869   :  { %v7297_v43 = vpop.f32.mrf.mxu1  ;;  %v7308_v16 = vpop.f32.mrf.mxu0 }
 0x86a   :  { %v5155_v6 = vadd.f32 %v5071_v42, %v4846_v25 }
 0x86c   :  { %v6213_v12 = vmul.f32 -1.442695, %v5155_v6 }
 0x86e   :  { %7545 = vpow2.f32 %v6213_v12 }
 0x871   :  { %v7544_v37 = vpop.eup %7543  ;;  %v5247_v54 = vpop.f32.mrf.mxu1 }
 0x872   :  { %v5321_v18 = vpop.f32.mrf.mxu0  ;;  %v5152_v56 = vadd.f32 1.0, %v7544_v37  ;;  %v5248_v59 = vadd.f32 %v9114_v44, %v5247_v54  ;;  %v9371_v44 = vld [vmem:[%s9465_s9 + $0x2] ss:$0 sm:$0xff] }
 0x873   :  { %v7319_v57 = vpop.f32.mrf.mxu1  ;;  %v5322_v60 = vadd.f32 %v9120_v32, %v5321_v18  ;;  %v5145_v45 = vadd.f32 %v9371_v44, %v5144_v40 }
 0x874   :  { %v7330_v62 = vpop.f32.mrf.mxu0  ;;  %7547 = vrcp.f32 %v5152_v56  ;;  %v5399_v7 = vadd.f32 %v6215_v1, %v5248_v59 }
 0x875   :  { %v5406_v23 = vadd.f32 %v6216_v63, %v5322_v60 }
 0x876   :  { %v6229_v61 = vmul.f32 -1.442695, %v5399_v7 }
 0x877   :  { %v6230_v4 = vmul.f32 -1.442695, %v5406_v23 }
 0x878   :  { %7549 = vpow2.f32 %v6229_v61 }
 0x879   :  { %7551 = vpow2.f32 %v6230_v4 }
 0x87a   :  { %v5395_v24 = vpop.f32.mrf.mxu1 }
 0x87b   :  { %v7546_v2 = vpop.eup %7545  ;;  %v5396_v40 = vadd.f32 %v9131_v55, %v5395_v24 }
 0x87c   :  { %v7341_v20 = vpop.f32.mrf.mxu1  ;;  %v5159_v26 = vadd.f32 1.0, %v7546_v2 }
 0x87e   :  { %7553 = vrcp.f32 %v5159_v26 }
 0x881   :  { %v7548_v32 = vpop.eup %7547 }
 0x882   :  { %v5162_v19 = vmul.f32 %v7548_v32, %v5145_v45 }
 0x884   :  { %v5163_v5 = vadd.f32 %v5162_v19, %v4920_v50 }
 0x885   :  { %v7550_v53 = vpop.eup %7549 }
 0x886   :  { %7555 = vtanh.f32 %v5163_v5  ;;  %v5403_v47 = vadd.f32 1.0, %v7550_v53  ;;  %v7552_v39 = vpop.eup %7551 }
 0x887   :  { %v5410_v49 = vadd.f32 1.0, %v7552_v39 }
 0x888   :  { %7557 = vrcp.f32 %v5403_v47 }
 0x889   :  { %7559 = vrcp.f32 %v5410_v49 }
 0x88b   :  { %v7554_v48 = vpop.eup %7553 }
 0x88c   :  { %v5165_v38 = vsub.f32 1.0, %v7554_v48  ;;  %v5167_v42 = vmul.f32 %v7554_v48, %v9138_v8 }
 0x893   :  { %v7556_v36 = vpop.eup %7555 }
 0x894   :  { %v5166_v25 = vmul.f32 %v7556_v36, %v5165_v38 }
 0x895   :  { %v7558_v43 = vpop.eup %7557 }
 0x896   :  { %v5413_v16 = vmul.f32 %v7558_v43, %v5396_v40  ;;  %v9385_v6 = vadd.f32 %v5167_v42, %v5166_v25  ;;  %v7560_v55 = vpop.eup %7559 }
 0x897   :  { %v5416_v37 = vsub.f32 1.0, %v7560_v55  ;;  %v5418_v54 = vmul.f32 %v7560_v55, %v9146_v28 }
 0x898   :  { %v5414_v12 = vadd.f32 %v6217_v15, %v5413_v16  ;;  %6214 = vst.msk [vmem:[%s9466_s10 + $0xc] sm:$0x3] %vm837_vm2, %v9385_v6 }
 0x89a   :  { %7561 = vtanh.f32 %v5414_v12 }
 0x8a7   :  { %v7562_v8 = vpop.eup %7561 }
 0x8a8   :  { %v5417_v1 = vmul.f32 %v7562_v8, %v5416_v37 }
 0x8aa   :  { %v5419_v18 = vadd.f32 %v5418_v54, %v5417_v1 }
 0x8ac   :  { %7351 = vmatmul.mubr.msk.f32.vlgmr.msra.gmra.mxu0 %vm117_vm1, %v5419_v18  ;;  %5893 = vst.msk [vmem:[#allocation2] sm:$0x3] %vm837_vm2, %v5419_v18  ;;  %7362 = vmatmul.mubr.msk.f32.vlgmr.msra.gmra.mxu1 %vm117_vm1, %v5419_v18 }
 0x8ad   :  { %7365 = vmatpush3.msra.mxu0 %v9151_v13  ;;  %7376 = vmatpush3.msra.mxu1 %v9156_v29 }
 0x8ae   :  { %7366 = vmatprep.subr.mxu0 %v9479_v22  ;;  %7377 = vmatprep.subr.mxu1 %v9479_v22 }
 0x8af   :  { %7367 = vmatpush3.msra.mxu0 %v9165_v14  ;;  %7378 = vmatpush3.msra.mxu1 %v9170_v30 }
 0x8b0   :  { %7368 = vmatprep.subr.mxu0 %v9479_v22  ;;  %7379 = vmatprep.subr.mxu1 %v9479_v22 }
 0x8b1   :  { %7369 = vmatpush3.msra.mxu0 %v9179_v27  ;;  %7380 = vmatpush3.msra.mxu1 %v9184_v58 }
 0x8b2   :  { %7370 = vmatprep.subr.mxu0 %v9479_v22  ;;  %7381 = vmatprep.subr.mxu1 %v9479_v22 }
 0x8b3   :  { %7371 = vmatpush3.msra.mxu0 %v9193_v51  ;;  %7372 = vmatprep.mubr.msk.f32.mxu0 %vm7614_vm0, %v9479_v22 }
 0x8b4   :  { %7382 = vmatpush3.msra.mxu1 %v9200_v17  ;;  %7383 = vmatprep.mubr.msk.f32.mxu1 %vm7614_vm0, %v9479_v22 }
 0x8b5   :  { %7373 = vmatmul.mubr.msk.f32.vlgmr.msra.gmra.mxu0 %vm117_vm1, %v5419_v18  ;;  %7384 = vmatmul.mubr.msk.f32.vlgmr.msra.gmra.mxu1 %vm117_vm1, %v9385_v6 }
 0x8b6   :  { %7386 = vmatprep.subr.mxu0 %v9479_v22  ;;  %7397 = vmatprep.subr.mxu1 %v9479_v22 }
 0x8b7   :  { %7387 = vmatpush3.msra.mxu0 %v9213_v33  ;;  %7398 = vmatpush3.msra.mxu1 %v9218_v3 }
 0x8b8   :  { %7388 = vmatprep.subr.mxu0 %v9479_v22  ;;  %7399 = vmatprep.subr.mxu1 %v9479_v22 }
 0x8b9   :  { %7389 = vmatpush3.msra.mxu0 %v9229_v0  ;;  %7400 = vmatpush3.msra.mxu1 %v9234_v10 }
 0x8ba   :  { %7390 = vmatprep.subr.mxu0 %v9479_v22  ;;  %7401 = vmatprep.subr.mxu1 %v9479_v22 }
 0x8bb   :  { %7391 = vmatpush3.msra.mxu0 %v9243_v35  ;;  %7402 = vmatpush3.msra.mxu1 %v9248_v34 }
 0x8bc   :  { %7392 = vmatprep.subr.mxu0 %v9479_v22  ;;  %7403 = vmatprep.subr.mxu1 %v9479_v22 }
 0x8bd   :  { %7393 = vmatpush3.msra.mxu0 %v9257_v52  ;;  %7394 = vmatprep.mubr.msk.f32.mxu0 %vm7614_vm0, %v9479_v22 }
 0x8be   :  { %7404 = vmatpush3.msra.mxu1 %v9264_v31  ;;  %7405 = vmatprep.mubr.msk.f32.mxu1 %vm7614_vm0, %v9479_v22 }
 0x8bf   :  { %7395 = vmatmul.mubr.msk.f32.vlgmr.msra.gmra.mxu0 %vm117_vm1, %v9385_v6  ;;  %7406 = vmatmul.mubr.msk.f32.vlgmr.msra.gmra.mxu1 %vm117_vm1, %v9385_v6 }
 0x96c   :  { %v5493_v28 = vpop.f32.mrf.mxu0  ;;  %v5567_v13 = vpop.f32.mrf.mxu1 }
 0x96d   :  { %v5494_v58 = vadd.f32 %v9339_v21, %v5493_v28  ;;  %v5568_v35 = vadd.f32 %v9351_v9, %v5567_v13 }
 0x96e   :  { %v7352_v29 = vpop.f32.mrf.mxu0  ;;  %v7363_v14 = vpop.f32.mrf.mxu1 }
 0x975   :  { %v5641_v30 = vpop.f32.mrf.mxu0  ;;  %v5718_v27 = vpop.f32.mrf.mxu1 }
 0x976   :  { %v5719_v51 = vadd.f32 %v9345_v41, %v5718_v27  ;;  %v5642_v61 = vadd.f32 %v9377_v46, %v5641_v30 }
 0x977   :  { %v7374_v17 = vpop.f32.mrf.mxu0  ;;  %v7385_v33 = vpop.f32.mrf.mxu1 }
 0x978   :  { %v5870_v3 = vadd.f32 %v5719_v51, %v5494_v58 }
 0x97a   :  { %v6253_v22 = vmul.f32 -1.442695, %v5870_v3 }
 0x97c   :  { %7563 = vpow2.f32 %v6253_v22 }
 0x97f   :  { %v5792_v0 = vpop.f32.mrf.mxu0  ;;  %v5866_v10 = vpop.f32.mrf.mxu1 }
 0x980   :  { %v5793_v34 = vadd.f32 %v9357_v11, %v5792_v0  ;;  %v5867_v7 = vadd.f32 %v9371_v44, %v5866_v10 }
 0x981   :  { %v7396_v52 = vpop.f32.mrf.mxu0  ;;  %v7407_v31 = vpop.f32.mrf.mxu1 }
 0x982   :  { %v5877_v56 = vadd.f32 %v5793_v34, %v5568_v35 }
 0x984   :  { %v6254_v59 = vmul.f32 -1.442695, %v5877_v56 }
 0x986   :  { %7565 = vpow2.f32 %v6254_v59 }
 0x989   :  { %v7564_v57 = vpop.eup %7563 }
 0x98a   :  { %v5874_v21 = vadd.f32 1.0, %v7564_v57 }
 0x98c   :  { %7567 = vrcp.f32 %v5874_v21 }
 0x993   :  { %v7566_v41 = vpop.eup %7565 }
 0x994   :  { %v5881_v62 = vadd.f32 1.0, %v7566_v41 }
 0x996   :  { %7569 = vrcp.f32 %v5881_v62 }
 0x999   :  { %v7568_v60 = vpop.eup %7567 }
 0x99a   :  { %v5884_v63 = vmul.f32 %v7568_v60, %v5867_v7 }
 0x99c   :  { %v5885_v9 = vadd.f32 %v5884_v63, %v5642_v61 }
 0x99e   :  { %7571 = vtanh.f32 %v5885_v9 }
 0x9a3   :  { %v7570_v11 = vpop.eup %7569 }
 0x9a4   :  { %v5887_v23 = vsub.f32 1.0, %v7570_v11  ;;  %v5889_v20 = vmul.f32 %v7570_v11, %v9385_v6 }
 0x9ab   :  { %v7572_v24 = vpop.eup %7571 }
 0x9ac   :  { %v5888_v2 = vmul.f32 %v7572_v24, %v5887_v23 }
 0x9ae   :  { %v5890_v4 = vadd.f32 %v5889_v20, %v5888_v2 }
 0x9b0   :  { %6255 = vst.msk [vmem:[%s9466_s10 + $0xe] sm:$0x3] %vm837_vm2, %v5890_v4  ;;  %5895 = vst.msk [vmem:[#allocation2 + $0x2] sm:$0x3] %vm837_vm2, %v5890_v4 }
 0x9b1   :  { %7602 = shalt.err (!%p7599_p4)
}
 0x9b2   :  { %s7616_s26 = smov 32   ;;  %s7617_s27 = smov 2  }
 0x9b3   :  { %5909 = dma.vmem_to_hbm [thread:$0]  %s5904_s22, 64, %s9467_s11, [#allocation3], %s7616_s26, %s7616_s26, %s7617_s27  }
 0x9b4   :  { %7611 = dma.done.wait [#allocation3], 64  }
 0x9b5   :  { %7612 = vsyncadd [#allocation3], 4294967232 }
 0x9b6   :  { %5915 = vsyncpa [#allocation3], 1 }

</bundles_post_ra>
